<compile_context>
chip_gen: v6e
topology: v6e:2x2x1
jax: 0.10.0
libtpu: 0.0.40
codegen_flags: <defaults>
</compile_context>

<pallas_src>
import jax
import jax.numpy as jnp
from jax.experimental import pallas as pl
from jax.experimental.pallas import tpu as pltpu


def _edge_feat_film_kernel(node_ref, cond_ref, spat_ref,
                           wn_ref, bn_ref,          # node proj (folded weight_norm): (node_dim, E), (1, E)
                           wc_ref, bc_ref,          # cond -> [gamma|beta]: (cond_dim, 2E), (1, 2E) [+1 folded]
                           wj_ref, ws_ref, bf_ref,  # film linear row-split: (E, E), (S, E), (1, E)
                           out_ref,                 # (Bt*N*N, E)
                           joint_ref):              # VMEM scratch (Bt*N*N, E), matmul dtype
    e = out_ref.shape[1]
    n = out_ref.shape[0] // node_ref.shape[0]      # nodes per graph
    bt = node_ref.shape[0] // n                    # graphs per grid step
    m = n * n                                      # edges per graph
    mm_dtype = wn_ref.dtype

    # node_proj_l: weight_norm linear (folded on host) + ReLU, all Bt graphs in one matmul
    proj = jnp.dot(node_ref[...].astype(mm_dtype), wn_ref[...],
                   preferred_element_type=jnp.float32) + bn_ref[...]
    proj = jnp.maximum(proj, 0.0)                                      # (Bt*N, E) f32

    # node_intersect (n2n_method='mul'): stage all ordered-pair products in VMEM scratch
    for b in range(bt):                                                # statically unrolled, bt small
        pb = proj[b * n:(b + 1) * n, :]                                # (N, E)
        jb = (pb[:, None, :] * pb[None, :, :]).reshape(m, e)          # f32 outer product
        joint_ref[b * m:(b + 1) * m, :] = jb.astype(joint_ref.dtype)

    # FiLM parameters: single fused dot; "+1" already folded into the gamma bias columns
    gb = jnp.dot(cond_ref[...].astype(mm_dtype), wc_ref[...],
                 preferred_element_type=jnp.float32) + bc_ref[...]     # (Bt, 2E)
    gamma = gb[:, :e]                                                  # lane-tile aligned slice
    beta = gb[:, e:]

    # film linear: concat([joint, spat]) @ W + b == joint @ wj + spat @ ws + b
    h = (jnp.dot(joint_ref[...], wj_ref[...], preferred_element_type=jnp.float32)
         + jnp.dot(spat_ref[...].astype(mm_dtype), ws_ref[...],
                   preferred_element_type=jnp.float32)
         + bf_ref[...])                                                # (Bt*N*N, E) f32

    # LayerNorm (no affine, eps = 1e-5), one-pass moments
    mu = jnp.mean(h, axis=-1, keepdims=True)
    ex2 = jnp.mean(h * h, axis=-1, keepdims=True)
    var = jnp.maximum(ex2 - mu * mu, 0.0)
    hn = (h - mu) * jax.lax.rsqrt(var + 1e-5)

    # FiLM conditioning (per-graph gamma/beta over that graph's N*N edges) + ReLU
    for b in range(bt):
        hb = hn[b * m:(b + 1) * m, :]
        out_ref[b * m:(b + 1) * m, :] = jnp.maximum(
            hb * gamma[b:b + 1, :] + beta[b:b + 1, :], 0.0).astype(out_ref.dtype)


def _pad_bytes(rows, cols, itemsize):
    return (-(-rows // 8) * 8) * (-(-cols // 128) * 128) * itemsize


def _vmem_step_bytes(bt, n, node_dim, cond_dim, edge_dim, spat_dim, mm_bytes):
    m = n * n
    streamed = (_pad_bytes(bt * n, node_dim, 4)
                + _pad_bytes(bt, cond_dim, 4)
                + _pad_bytes(bt * m, spat_dim, 4)
                + _pad_bytes(bt * m, edge_dim, 4)) * 2        # double-buffered
    scratch = _pad_bytes(bt * m, edge_dim, mm_bytes)          # joint staging buffer
    weights = (_pad_bytes(node_dim, edge_dim, mm_bytes)
               + _pad_bytes(cond_dim, 2 * edge_dim, mm_bytes)
               + _pad_bytes(edge_dim, edge_dim, mm_bytes)
               + _pad_bytes(spat_dim, edge_dim, mm_bytes)
               + 4 * _pad_bytes(1, 2 * edge_dim, 4)) * 2      # conservatively x2
    return streamed + scratch + weights


def choose_block_batch(B, n, node_dim, cond_dim, edge_dim, spat_dim, mm_bytes,
                       vmem_budget_bytes=12 * 1024 * 1024):
    """Largest Bt (divisor of B) whose per-step VMEM fits a conservative budget (safe under
    the v5e 16 MiB scoped default and v6e/v7x 32 MiB defaults) while keeping >= 2 grid
    steps so the 'parallel' axis can shard across v7x's two TensorCores."""
    best = 1
    for bt in range(1, B + 1):
        if B % bt:
            continue
        if B >= 2 and B // bt < 2:
            continue
        if _vmem_step_bytes(bt, n, node_dim, cond_dim, edge_dim,
                            spat_dim, mm_bytes) <= vmem_budget_bytes:
            best = bt
    return best


def edge_feat_film_forward(node_feats, cond_feats, spatial_feats, params,
                           matmul_dtype=jnp.bfloat16, block_batch=None):
    """EdgeFeatFilm forward: Bt graphs per grid step, weights VMEM-resident."""
    B, N, node_dim = node_feats.shape
    cond_dim = cond_feats.shape[-1]
    edge_dim = params["wn"].shape[1]
    spat_dim = spatial_feats.shape[-1]
    M = N * N

    mm_bytes = jnp.dtype(matmul_dtype).itemsize
    if block_batch is None:
        block_batch = choose_block_batch(B, N, node_dim, cond_dim, edge_dim,
                                         spat_dim, mm_bytes)
    Bt = block_batch
    assert B % Bt == 0, "block_batch must divide the batch"
    grid = (B // Bt,)

    # Flatten streamed operands so every block is a lane-dense 2D slab.
    node2 = node_feats.reshape(B * N, node_dim)
    spat2 = spatial_feats.reshape(B * M, spat_dim)

    # Matmul operands in matmul_dtype (bf16 is MXU-native on v5e/v6e/v7x, halves weight
    # DMA + resident VMEM); biases and all elementwise math stay f32.
    wn = params["wn"].astype(matmul_dtype)
    wc = params["wc"].astype(matmul_dtype)
    wj = params["wj"].astype(matmul_dtype)
    ws = params["ws"].astype(matmul_dtype)

    def resident(arr):
        # Constant index_map -> stays VMEM-resident across grid steps.
        # TODO(synk): for the production coord-concat branch (node_dim ~ 2052) mark these
        # pipeline_mode=pl.Buffered(1); at these sizes double-buffering costs < 100 KiB.
        return pl.BlockSpec(arr.shape, lambda g: (0, 0))

    operands = (node2, cond_feats, spat2,
                wn, params["bn"], wc, params["bc"], wj, ws, params["bf"])

    out = pl.pallas_call(
        _edge_feat_film_kernel,
        out_shape=jax.ShapeDtypeStruct((B * M, edge_dim), jnp.float32),
        grid=grid,
        in_specs=[
            pl.BlockSpec((Bt * N, node_dim), lambda g: (g, 0)),
            pl.BlockSpec((Bt, cond_dim), lambda g: (g, 0)),
            pl.BlockSpec((Bt * M, spat_dim), lambda g: (g, 0)),
            resident(wn), resident(params["bn"]),
            resident(wc), resident(params["bc"]),
            resident(wj), resident(ws), resident(params["bf"]),
        ],
        out_specs=pl.BlockSpec((Bt * M, edge_dim), lambda g: (g, 0)),
        scratch_shapes=[pltpu.VMEM((Bt * M, edge_dim), matmul_dtype)],
        compiler_params=pltpu.CompilerParams(
            dimension_semantics=("parallel",)),
    )(*operands)
    return out


def _weight_norm_effective(v, g):
    """PyTorch weight_norm on nn.Linear (dim=0): W[o,:] = g[o] * v[o,:] / ||v[o,:]||."""
    norm = jnp.sqrt(jnp.sum(v * v, axis=1, keepdims=True))
    return g * v / norm


def init_params(key, node_dim, cond_dim, edge_dim, spat_dim):
    keys = jax.random.split(key, 8)

    def wn_linear(kv, kg, kb, in_f, out_f):
        v = jax.random.normal(kv, (out_f, in_f), jnp.float32) * 0.1
        g = 1.0 + 0.05 * jax.random.normal(kg, (out_f, 1), jnp.float32)
        b = 0.05 * jax.random.normal(kb, (out_f,), jnp.float32)
        return _weight_norm_effective(v, g).T, b.reshape(1, out_f)   # (in_f, out_f), (1, out_f)

    def plain_linear(kw, kb, in_f, out_f):
        w = jax.random.normal(kw, (out_f, in_f), jnp.float32) * 0.1
        b = 0.05 * jax.random.normal(kb, (out_f,), jnp.float32)
        return w.T, b.reshape(1, out_f)

    # node_proj_l: weight_norm(Linear(node_dim, edge_dim)) + ReLU
    wn, bn = wn_linear(keys[0], keys[1], keys[2], node_dim, edge_dim)

    # cond_proj_l: weight_norm(Linear(cond_dim, 2*edge_dim)); keep the fused [gamma|beta]
    # layout and fold "gamma += 1" into the first edge_dim bias columns (inference fold).
    wc, bc = wn_linear(keys[3], keys[4], keys[5], cond_dim, 2 * edge_dim)
    bc = bc.at[:, :edge_dim].add(1.0)

    # film_l linear: Linear(edge_dim + spat_dim, edge_dim); split rows so the kernel does
    # joint @ wj + spat @ ws instead of concatenating inputs.
    wf, bf = plain_linear(keys[6], keys[7], edge_dim + spat_dim, edge_dim)
    wj, ws = wf[:edge_dim, :], wf[edge_dim:, :]

    return dict(wn=wn, bn=bn, wc=wc, bc=bc, wj=wj, ws=ws, bf=bf)


def reference_forward(node_feats, cond_feats, spatial_feats, p, matmul_dtype=jnp.float32):
    """Pure-JAX reference matching EdgeFeatFilm semantics (eval mode)."""
    B, N, _ = node_feats.shape
    E = p["wn"].shape[1]
    cast = lambda x: x.astype(matmul_dtype)
    prec = jax.lax.Precision.HIGHEST if matmul_dtype == jnp.float32 else None

    def mm(eq, a, b):
        return jnp.einsum(eq, cast(a), cast(b), precision=prec,
                          preferred_element_type=jnp.float32)

    proj = jnp.maximum(mm("bnd,de->bne", node_feats, p["wn"]) + p["bn"], 0.0)
    joint = (proj[:, :, None, :] * proj[:, None, :, :]).reshape(B, N * N, E)
    spat = spatial_feats.reshape(B, N * N, -1)
    gb = mm("bc,ce->be", cond_feats, p["wc"]) + p["bc"]
    gamma, beta = gb[:, :E], gb[:, E:]
    h = (mm("bme,ef->bmf", joint, p["wj"])
         + mm("bms,se->bme", spat, p["ws"])
         + p["bf"])
    mu = h.mean(-1, keepdims=True)
    var = ((h - mu) ** 2).mean(-1, keepdims=True)
    hn = (h - mu) / jnp.sqrt(var + 1e-5)
    y = jnp.maximum(hn * gamma[:, None, :] + beta[:, None, :], 0.0)
    return y.reshape(B * N * N, E)


if __name__ == "__main__":
    B, N = 16, 8                      # 16 graphs x 8 nodes -> 64 edges/graph, 1024 edges total
    node_dim, cond_dim = 32, 32
    edge_dim, spat_dim = 128, 8       # edge_dim = 128 keeps every tile lane-dense

    key = jax.random.PRNGKey(0)
    kn, kc, ks, kp = jax.random.split(key, 4)
    node_feats = jax.random.normal(kn, (B, N, node_dim), jnp.float32)
    cond_feats = jax.random.normal(kc, (B, cond_dim), jnp.float32)
    spatial_feats = jax.random.normal(ks, (B * N * N, spat_dim), jnp.float32)
    params = init_params(kp, node_dim, cond_dim, edge_dim, spat_dim)

    # bf16 matmul operands (f32 accumulate): MXU-native path recommended for v5e/v6e/v7x.
    out_bf16 = jax.block_until_ready(
        edge_feat_film_forward(node_feats, cond_feats, spatial_feats, params,
                               matmul_dtype=jnp.bfloat16))
    ref_bf16 = reference_forward(node_feats, cond_feats, spatial_feats, params,
                                 matmul_dtype=jnp.bfloat16)
    assert out_bf16.shape == (B * N * N, edge_dim)
    assert jnp.allclose(out_bf16, ref_bf16, atol=5e-3, rtol=5e-3), "bf16 path mismatch"

    # f32 matmul operands for strict parity with the PyTorch f32 module.
    out_f32 = jax.block_until_ready(
        edge_feat_film_forward(node_feats, cond_feats, spatial_feats, params,
                               matmul_dtype=jnp.float32))
    ref_f32 = reference_forward(node_feats, cond_feats, spatial_feats, params,
                                matmul_dtype=jnp.float32)
    assert jnp.allclose(out_f32, ref_f32, atol=3e-3, rtol=3e-3), "f32 path mismatch"

    print("KERNEL_OK")
</pallas_src>

<mosaic_0001>
module attributes {stable_mosaic.version = 11 : i64} {
  func.func @_edge_feat_film_kernel(%arg0: i32, %arg1: memref<64x32xf32, #tpu.memory_space<vmem>>, %arg2: memref<8x32xf32, #tpu.memory_space<vmem>>, %arg3: memref<512x8xf32, #tpu.memory_space<vmem>>, %arg4: memref<32x128xbf16, #tpu.memory_space<vmem>>, %arg5: memref<1x128xf32, #tpu.memory_space<vmem>>, %arg6: memref<32x256xbf16, #tpu.memory_space<vmem>>, %arg7: memref<1x256xf32, #tpu.memory_space<vmem>>, %arg8: memref<128x128xbf16, #tpu.memory_space<vmem>>, %arg9: memref<8x128xbf16, #tpu.memory_space<vmem>>, %arg10: memref<1x128xf32, #tpu.memory_space<vmem>>, %arg11: memref<512x128xf32, #tpu.memory_space<vmem>>, %arg12: memref<512x128xbf16, #tpu.memory_space<vmem>>) attributes {dimension_semantics = [#tpu.dimension_semantics<parallel>], iteration_bounds = array<i64: 2>, scalar_prefetch = 0 : i64, scratch_operands = 1 : i64, tpu.core_type = #tpu.core_type<tc>, window_params = [{transform_indices = @transform_0, window_bounds = array<i64: 64, 32>}, {transform_indices = @transform_1, window_bounds = array<i64: 8, 32>}, {transform_indices = @transform_2, window_bounds = array<i64: 512, 8>}, {pipeline_mode = #tpu.pipeline_mode<synchronous>, transform_indices = @transform_3, window_bounds = array<i64: 32, 128>}, {pipeline_mode = #tpu.pipeline_mode<synchronous>, transform_indices = @transform_4, window_bounds = array<i64: 1, 128>}, {pipeline_mode = #tpu.pipeline_mode<synchronous>, transform_indices = @transform_5, window_bounds = array<i64: 32, 256>}, {pipeline_mode = #tpu.pipeline_mode<synchronous>, transform_indices = @transform_6, window_bounds = array<i64: 1, 256>}, {pipeline_mode = #tpu.pipeline_mode<synchronous>, transform_indices = @transform_7, window_bounds = array<i64: 128, 128>}, {pipeline_mode = #tpu.pipeline_mode<synchronous>, transform_indices = @transform_8, window_bounds = array<i64: 8, 128>}, {pipeline_mode = #tpu.pipeline_mode<synchronous>, transform_indices = @transform_9, window_bounds = array<i64: 1, 128>}, {transform_indices = @transform_10, window_bounds = array<i64: 512, 128>}]} {
    %c0 = arith.constant 0 : index
    %c0_0 = arith.constant 0 : index
    %0 = vector.load %arg1[%c0, %c0_0] : memref<64x32xf32, #tpu.memory_space<vmem>>, vector<64x32xf32>
    %1 = arith.truncf %0 : vector<64x32xf32> to vector<64x32xbf16>
    %c0_1 = arith.constant 0 : index
    %c0_2 = arith.constant 0 : index
    %2 = vector.load %arg4[%c0_1, %c0_2] : memref<32x128xbf16, #tpu.memory_space<vmem>>, vector<32x128xbf16>
    %cst = arith.constant dense<0.000000e+00> : vector<64x128xf32>
    %3 = tpu.matmul %1, %2, %cst {dimension_numbers = #tpu.dot_dimension_numbers<[1], [0], [0], [1], [0, 0, 1, 1], [], []>} : vector<64x32xbf16>, vector<32x128xbf16>, vector<64x128xf32> -> vector<64x128xf32>
    %c0_3 = arith.constant 0 : index
    %c0_4 = arith.constant 0 : index
    %4 = vector.load %arg5[%c0_3, %c0_4] : memref<1x128xf32, #tpu.memory_space<vmem>>, vector<1x128xf32>
    %5 = vector.broadcast %4 : vector<1x128xf32> to vector<64x128xf32>
    %6 = arith.addf %3, %5 : vector<64x128xf32>
    %cst_5 = arith.constant 0.000000e+00 : f32
    %7 = vector.broadcast %cst_5 : f32 to vector<64x128xf32>
    %8 = arith.maximumf %6, %7 : vector<64x128xf32>
    %9 = vector.extract_strided_slice %8 {offsets = [0, 0], sizes = [8, 128], strides = [1, 1]} : vector<64x128xf32> to vector<8x128xf32>
    %10 = vector.shape_cast %9 : vector<8x128xf32> to vector<8x1x128xf32>
    %11 = vector.shape_cast %9 : vector<8x128xf32> to vector<1x8x128xf32>
    %12 = vector.broadcast %10 : vector<8x1x128xf32> to vector<8x8x128xf32>
    %13 = vector.broadcast %11 : vector<1x8x128xf32> to vector<8x8x128xf32>
    %14 = arith.mulf %12, %13 : vector<8x8x128xf32>
    %15 = vector.shape_cast %14 : vector<8x8x128xf32> to vector<64x128xf32>
    %16 = arith.truncf %15 : vector<64x128xf32> to vector<64x128xbf16>
    %c0_6 = arith.constant 0 : index
    %c0_7 = arith.constant 0 : index
    %17 = vector.load %arg12[%c0_6, %c0_7] : memref<512x128xbf16, #tpu.memory_space<vmem>>, vector<64x128xbf16>
    tpu.vector_store %arg12[%c0_6, %c0_7], %16 {strides = array<i32>} : memref<512x128xbf16, #tpu.memory_space<vmem>>, vector<64x128xbf16>,
    %18 = vector.extract_strided_slice %8 {offsets = [8, 0], sizes = [8, 128], strides = [1, 1]} : vector<64x128xf32> to vector<8x128xf32>
    %19 = vector.shape_cast %18 : vector<8x128xf32> to vector<8x1x128xf32>
    %20 = vector.shape_cast %18 : vector<8x128xf32> to vector<1x8x128xf32>
    %21 = vector.broadcast %19 : vector<8x1x128xf32> to vector<8x8x128xf32>
    %22 = vector.broadcast %20 : vector<1x8x128xf32> to vector<8x8x128xf32>
    %23 = arith.mulf %21, %22 : vector<8x8x128xf32>
    %24 = vector.shape_cast %23 : vector<8x8x128xf32> to vector<64x128xf32>
    %25 = arith.truncf %24 : vector<64x128xf32> to vector<64x128xbf16>
    %c64 = arith.constant 64 : index
    %c0_8 = arith.constant 0 : index
    %26 = vector.load %arg12[%c64, %c0_8] : memref<512x128xbf16, #tpu.memory_space<vmem>>, vector<64x128xbf16>
    tpu.vector_store %arg12[%c64, %c0_8], %25 {strides = array<i32>} : memref<512x128xbf16, #tpu.memory_space<vmem>>, vector<64x128xbf16>,
    %27 = vector.extract_strided_slice %8 {offsets = [16, 0], sizes = [8, 128], strides = [1, 1]} : vector<64x128xf32> to vector<8x128xf32>
    %28 = vector.shape_cast %27 : vector<8x128xf32> to vector<8x1x128xf32>
    %29 = vector.shape_cast %27 : vector<8x128xf32> to vector<1x8x128xf32>
    %30 = vector.broadcast %28 : vector<8x1x128xf32> to vector<8x8x128xf32>
    %31 = vector.broadcast %29 : vector<1x8x128xf32> to vector<8x8x128xf32>
    %32 = arith.mulf %30, %31 : vector<8x8x128xf32>
    %33 = vector.shape_cast %32 : vector<8x8x128xf32> to vector<64x128xf32>
    %34 = arith.truncf %33 : vector<64x128xf32> to vector<64x128xbf16>
    %c128 = arith.constant 128 : index
    %c0_9 = arith.constant 0 : index
    %35 = vector.load %arg12[%c128, %c0_9] : memref<512x128xbf16, #tpu.memory_space<vmem>>, vector<64x128xbf16>
    tpu.vector_store %arg12[%c128, %c0_9], %34 {strides = array<i32>} : memref<512x128xbf16, #tpu.memory_space<vmem>>, vector<64x128xbf16>,
    %36 = vector.extract_strided_slice %8 {offsets = [24, 0], sizes = [8, 128], strides = [1, 1]} : vector<64x128xf32> to vector<8x128xf32>
    %37 = vector.shape_cast %36 : vector<8x128xf32> to vector<8x1x128xf32>
    %38 = vector.shape_cast %36 : vector<8x128xf32> to vector<1x8x128xf32>
    %39 = vector.broadcast %37 : vector<8x1x128xf32> to vector<8x8x128xf32>
    %40 = vector.broadcast %38 : vector<1x8x128xf32> to vector<8x8x128xf32>
    %41 = arith.mulf %39, %40 : vector<8x8x128xf32>
    %42 = vector.shape_cast %41 : vector<8x8x128xf32> to vector<64x128xf32>
    %43 = arith.truncf %42 : vector<64x128xf32> to vector<64x128xbf16>
    %c192 = arith.constant 192 : index
    %c0_10 = arith.constant 0 : index
    %44 = vector.load %arg12[%c192, %c0_10] : memref<512x128xbf16, #tpu.memory_space<vmem>>, vector<64x128xbf16>
    tpu.vector_store %arg12[%c192, %c0_10], %43 {strides = array<i32>} : memref<512x128xbf16, #tpu.memory_space<vmem>>, vector<64x128xbf16>,
    %45 = vector.extract_strided_slice %8 {offsets = [32, 0], sizes = [8, 128], strides = [1, 1]} : vector<64x128xf32> to vector<8x128xf32>
    %46 = vector.shape_cast %45 : vector<8x128xf32> to vector<8x1x128xf32>
    %47 = vector.shape_cast %45 : vector<8x128xf32> to vector<1x8x128xf32>
    %48 = vector.broadcast %46 : vector<8x1x128xf32> to vector<8x8x128xf32>
    %49 = vector.broadcast %47 : vector<1x8x128xf32> to vector<8x8x128xf32>
    %50 = arith.mulf %48, %49 : vector<8x8x128xf32>
    %51 = vector.shape_cast %50 : vector<8x8x128xf32> to vector<64x128xf32>
    %52 = arith.truncf %51 : vector<64x128xf32> to vector<64x128xbf16>
    %c256 = arith.constant 256 : index
    %c0_11 = arith.constant 0 : index
    %53 = vector.load %arg12[%c256, %c0_11] : memref<512x128xbf16, #tpu.memory_space<vmem>>, vector<64x128xbf16>
    tpu.vector_store %arg12[%c256, %c0_11], %52 {strides = array<i32>} : memref<512x128xbf16, #tpu.memory_space<vmem>>, vector<64x128xbf16>,
    %54 = vector.extract_strided_slice %8 {offsets = [40, 0], sizes = [8, 128], strides = [1, 1]} : vector<64x128xf32> to vector<8x128xf32>
    %55 = vector.shape_cast %54 : vector<8x128xf32> to vector<8x1x128xf32>
    %56 = vector.shape_cast %54 : vector<8x128xf32> to vector<1x8x128xf32>
    %57 = vector.broadcast %55 : vector<8x1x128xf32> to vector<8x8x128xf32>
    %58 = vector.broadcast %56 : vector<1x8x128xf32> to vector<8x8x128xf32>
    %59 = arith.mulf %57, %58 : vector<8x8x128xf32>
    %60 = vector.shape_cast %59 : vector<8x8x128xf32> to vector<64x128xf32>
    %61 = arith.truncf %60 : vector<64x128xf32> to vector<64x128xbf16>
    %c320 = arith.constant 320 : index
    %c0_12 = arith.constant 0 : index
    %62 = vector.load %arg12[%c320, %c0_12] : memref<512x128xbf16, #tpu.memory_space<vmem>>, vector<64x128xbf16>
    tpu.vector_store %arg12[%c320, %c0_12], %61 {strides = array<i32>} : memref<512x128xbf16, #tpu.memory_space<vmem>>, vector<64x128xbf16>,
    %63 = vector.extract_strided_slice %8 {offsets = [48, 0], sizes = [8, 128], strides = [1, 1]} : vector<64x128xf32> to vector<8x128xf32>
    %64 = vector.shape_cast %63 : vector<8x128xf32> to vector<8x1x128xf32>
    %65 = vector.shape_cast %63 : vector<8x128xf32> to vector<1x8x128xf32>
    %66 = vector.broadcast %64 : vector<8x1x128xf32> to vector<8x8x128xf32>
    %67 = vector.broadcast %65 : vector<1x8x128xf32> to vector<8x8x128xf32>
    %68 = arith.mulf %66, %67 : vector<8x8x128xf32>
    %69 = vector.shape_cast %68 : vector<8x8x128xf32> to vector<64x128xf32>
    %70 = arith.truncf %69 : vector<64x128xf32> to vector<64x128xbf16>
    %c384 = arith.constant 384 : index
    %c0_13 = arith.constant 0 : index
    %71 = vector.load %arg12[%c384, %c0_13] : memref<512x128xbf16, #tpu.memory_space<vmem>>, vector<64x128xbf16>
    tpu.vector_store %arg12[%c384, %c0_13], %70 {strides = array<i32>} : memref<512x128xbf16, #tpu.memory_space<vmem>>, vector<64x128xbf16>,
    %72 = vector.extract_strided_slice %8 {offsets = [56, 0], sizes = [8, 128], strides = [1, 1]} : vector<64x128xf32> to vector<8x128xf32>
    %73 = vector.shape_cast %72 : vector<8x128xf32> to vector<8x1x128xf32>
    %74 = vector.shape_cast %72 : vector<8x128xf32> to vector<1x8x128xf32>
    %75 = vector.broadcast %73 : vector<8x1x128xf32> to vector<8x8x128xf32>
    %76 = vector.broadcast %74 : vector<1x8x128xf32> to vector<8x8x128xf32>
    %77 = arith.mulf %75, %76 : vector<8x8x128xf32>
    %78 = vector.shape_cast %77 : vector<8x8x128xf32> to vector<64x128xf32>
    %79 = arith.truncf %78 : vector<64x128xf32> to vector<64x128xbf16>
    %c448 = arith.constant 448 : index
    %c0_14 = arith.constant 0 : index
    %80 = vector.load %arg12[%c448, %c0_14] : memref<512x128xbf16, #tpu.memory_space<vmem>>, vector<64x128xbf16>
    tpu.vector_store %arg12[%c448, %c0_14], %79 {strides = array<i32>} : memref<512x128xbf16, #tpu.memory_space<vmem>>, vector<64x128xbf16>,
    %c0_15 = arith.constant 0 : index
    %c0_16 = arith.constant 0 : index
    %81 = vector.load %arg2[%c0_15, %c0_16] : memref<8x32xf32, #tpu.memory_space<vmem>>, vector<8x32xf32>
    %82 = arith.truncf %81 : vector<8x32xf32> to vector<8x32xbf16>
    %c0_17 = arith.constant 0 : index
    %c0_18 = arith.constant 0 : index
    %83 = vector.load %arg6[%c0_17, %c0_18] : memref<32x256xbf16, #tpu.memory_space<vmem>>, vector<32x256xbf16>
    %cst_19 = arith.constant dense<0.000000e+00> : vector<8x256xf32>
    %84 = tpu.matmul %82, %83, %cst_19 {dimension_numbers = #tpu.dot_dimension_numbers<[1], [0], [0], [1], [0, 0, 1, 1], [], []>} : vector<8x32xbf16>, vector<32x256xbf16>, vector<8x256xf32> -> vector<8x256xf32>
    %c0_20 = arith.constant 0 : index
    %c0_21 = arith.constant 0 : index
    %85 = vector.load %arg7[%c0_20, %c0_21] : memref<1x256xf32, #tpu.memory_space<vmem>>, vector<1x256xf32>
    %86 = vector.broadcast %85 : vector<1x256xf32> to vector<8x256xf32>
    %87 = arith.addf %84, %86 : vector<8x256xf32>
    %88 = vector.extract_strided_slice %87 {offsets = [0, 0], sizes = [8, 128], strides = [1, 1]} : vector<8x256xf32> to vector<8x128xf32>
    %89 = vector.extract_strided_slice %87 {offsets = [0, 128], sizes = [8, 128], strides = [1, 1]} : vector<8x256xf32> to vector<8x128xf32>
    %c0_22 = arith.constant 0 : index
    %c0_23 = arith.constant 0 : index
    %90 = vector.load %arg12[%c0_22, %c0_23] : memref<512x128xbf16, #tpu.memory_space<vmem>>, vector<512x128xbf16>
    %c0_24 = arith.constant 0 : index
    %c0_25 = arith.constant 0 : index
    %91 = vector.load %arg8[%c0_24, %c0_25] : memref<128x128xbf16, #tpu.memory_space<vmem>>, vector<128x128xbf16>
    %cst_26 = arith.constant dense<0.000000e+00> : vector<512x128xf32>
    %92 = tpu.matmul %90, %91, %cst_26 {dimension_numbers = #tpu.dot_dimension_numbers<[1], [0], [0], [1], [0, 0, 1, 1], [], []>} : vector<512x128xbf16>, vector<128x128xbf16>, vector<512x128xf32> -> vector<512x128xf32>
    %c0_27 = arith.constant 0 : index
    %c0_28 = arith.constant 0 : index
    %93 = vector.load %arg3[%c0_27, %c0_28] : memref<512x8xf32, #tpu.memory_space<vmem>>, vector<512x8xf32>
    %94 = arith.truncf %93 : vector<512x8xf32> to vector<512x8xbf16>
    %c0_29 = arith.constant 0 : index
    %c0_30 = arith.constant 0 : index
    %95 = vector.load %arg9[%c0_29, %c0_30] : memref<8x128xbf16, #tpu.memory_space<vmem>>, vector<8x128xbf16>
    %cst_31 = arith.constant dense<0.000000e+00> : vector<512x128xf32>
    %96 = tpu.matmul %94, %95, %cst_31 {dimension_numbers = #tpu.dot_dimension_numbers<[1], [0], [0], [1], [0, 0, 1, 1], [], []>} : vector<512x8xbf16>, vector<8x128xbf16>, vector<512x128xf32> -> vector<512x128xf32>
    %97 = arith.addf %92, %96 : vector<512x128xf32>
    %c0_32 = arith.constant 0 : index
    %c0_33 = arith.constant 0 : index
    %98 = vector.load %arg10[%c0_32, %c0_33] : memref<1x128xf32, #tpu.memory_space<vmem>>, vector<1x128xf32>
    %99 = vector.broadcast %98 : vector<1x128xf32> to vector<512x128xf32>
    %100 = arith.addf %97, %99 : vector<512x128xf32>
    %cst_34 = arith.constant dense<0.000000e+00> : vector<512xf32>
    %101 = vector.multi_reduction <add>, %100, %cst_34 [1] : vector<512x128xf32> to vector<512xf32>
    %102 = vector.shape_cast %101 : vector<512xf32> to vector<512x1xf32>
    %cst_35 = arith.constant 1.280000e+02 : f32
    %103 = vector.broadcast %cst_35 : f32 to vector<512x1xf32>
    %104 = arith.divf %102, %103 : vector<512x1xf32>
    %105 = arith.mulf %100, %100 : vector<512x128xf32>
    %cst_36 = arith.constant dense<0.000000e+00> : vector<512xf32>
    %106 = vector.multi_reduction <add>, %105, %cst_36 [1] : vector<512x128xf32> to vector<512xf32>
    %107 = vector.shape_cast %106 : vector<512xf32> to vector<512x1xf32>
    %cst_37 = arith.constant 1.280000e+02 : f32
    %108 = vector.broadcast %cst_37 : f32 to vector<512x1xf32>
    %109 = arith.divf %107, %108 : vector<512x1xf32>
    %110 = arith.mulf %104, %104 : vector<512x1xf32>
    %111 = arith.subf %109, %110 : vector<512x1xf32>
    %cst_38 = arith.constant 0.000000e+00 : f32
    %112 = vector.broadcast %cst_38 : f32 to vector<512x1xf32>
    %113 = arith.maximumf %111, %112 : vector<512x1xf32>
    %114 = vector.broadcast %104 : vector<512x1xf32> to vector<512x128xf32>
    %115 = arith.subf %100, %114 : vector<512x128xf32>
    %cst_39 = arith.constant 9.99999974E-6 : f32
    %116 = vector.broadcast %cst_39 : f32 to vector<512x1xf32>
    %117 = arith.addf %113, %116 : vector<512x1xf32>
    %118 = math.rsqrt %117 : vector<512x1xf32>
    %119 = vector.broadcast %118 : vector<512x1xf32> to vector<512x128xf32>
    %120 = arith.mulf %115, %119 : vector<512x128xf32>
    %121 = vector.extract_strided_slice %120 {offsets = [0, 0], sizes = [64, 128], strides = [1, 1]} : vector<512x128xf32> to vector<64x128xf32>
    %122 = vector.extract_strided_slice %88 {offsets = [0, 0], sizes = [1, 128], strides = [1, 1]} : vector<8x128xf32> to vector<1x128xf32>
    %123 = vector.broadcast %122 : vector<1x128xf32> to vector<64x128xf32>
    %124 = arith.mulf %121, %123 : vector<64x128xf32>
    %125 = vector.extract_strided_slice %89 {offsets = [0, 0], sizes = [1, 128], strides = [1, 1]} : vector<8x128xf32> to vector<1x128xf32>
    %126 = vector.broadcast %125 : vector<1x128xf32> to vector<64x128xf32>
    %127 = arith.addf %124, %126 : vector<64x128xf32>
    %cst_40 = arith.constant 0.000000e+00 : f32
    %128 = vector.broadcast %cst_40 : f32 to vector<64x128xf32>
    %129 = arith.maximumf %127, %128 : vector<64x128xf32>
    %c0_41 = arith.constant 0 : index
    %c0_42 = arith.constant 0 : index
    %130 = vector.load %arg11[%c0_41, %c0_42] : memref<512x128xf32, #tpu.memory_space<vmem>>, vector<64x128xf32>
    tpu.vector_store %arg11[%c0_41, %c0_42], %129 {strides = array<i32>} : memref<512x128xf32, #tpu.memory_space<vmem>>, vector<64x128xf32>,
    %131 = vector.extract_strided_slice %120 {offsets = [64, 0], sizes = [64, 128], strides = [1, 1]} : vector<512x128xf32> to vector<64x128xf32>
    %132 = vector.extract_strided_slice %88 {offsets = [1, 0], sizes = [1, 128], strides = [1, 1]} : vector<8x128xf32> to vector<1x128xf32>
    %133 = vector.broadcast %132 : vector<1x128xf32> to vector<64x128xf32>
    %134 = arith.mulf %131, %133 : vector<64x128xf32>
    %135 = vector.extract_strided_slice %89 {offsets = [1, 0], sizes = [1, 128], strides = [1, 1]} : vector<8x128xf32> to vector<1x128xf32>
    %136 = vector.broadcast %135 : vector<1x128xf32> to vector<64x128xf32>
    %137 = arith.addf %134, %136 : vector<64x128xf32>
    %cst_43 = arith.constant 0.000000e+00 : f32
    %138 = vector.broadcast %cst_43 : f32 to vector<64x128xf32>
    %139 = arith.maximumf %137, %138 : vector<64x128xf32>
    %c64_44 = arith.constant 64 : index
    %c0_45 = arith.constant 0 : index
    %140 = vector.load %arg11[%c64_44, %c0_45] : memref<512x128xf32, #tpu.memory_space<vmem>>, vector<64x128xf32>
    tpu.vector_store %arg11[%c64_44, %c0_45], %139 {strides = array<i32>} : memref<512x128xf32, #tpu.memory_space<vmem>>, vector<64x128xf32>,
    %141 = vector.extract_strided_slice %120 {offsets = [128, 0], sizes = [64, 128], strides = [1, 1]} : vector<512x128xf32> to vector<64x128xf32>
    %142 = vector.extract_strided_slice %88 {offsets = [2, 0], sizes = [1, 128], strides = [1, 1]} : vector<8x128xf32> to vector<1x128xf32>
    %143 = vector.broadcast %142 : vector<1x128xf32> to vector<64x128xf32>
    %144 = arith.mulf %141, %143 : vector<64x128xf32>
    %145 = vector.extract_strided_slice %89 {offsets = [2, 0], sizes = [1, 128], strides = [1, 1]} : vector<8x128xf32> to vector<1x128xf32>
    %146 = vector.broadcast %145 : vector<1x128xf32> to vector<64x128xf32>
    %147 = arith.addf %144, %146 : vector<64x128xf32>
    %cst_46 = arith.constant 0.000000e+00 : f32
    %148 = vector.broadcast %cst_46 : f32 to vector<64x128xf32>
    %149 = arith.maximumf %147, %148 : vector<64x128xf32>
    %c128_47 = arith.constant 128 : index
    %c0_48 = arith.constant 0 : index
    %150 = vector.load %arg11[%c128_47, %c0_48] : memref<512x128xf32, #tpu.memory_space<vmem>>, vector<64x128xf32>
    tpu.vector_store %arg11[%c128_47, %c0_48], %149 {strides = array<i32>} : memref<512x128xf32, #tpu.memory_space<vmem>>, vector<64x128xf32>,
    %151 = vector.extract_strided_slice %120 {offsets = [192, 0], sizes = [64, 128], strides = [1, 1]} : vector<512x128xf32> to vector<64x128xf32>
    %152 = vector.extract_strided_slice %88 {offsets = [3, 0], sizes = [1, 128], strides = [1, 1]} : vector<8x128xf32> to vector<1x128xf32>
    %153 = vector.broadcast %152 : vector<1x128xf32> to vector<64x128xf32>
    %154 = arith.mulf %151, %153 : vector<64x128xf32>
    %155 = vector.extract_strided_slice %89 {offsets = [3, 0], sizes = [1, 128], strides = [1, 1]} : vector<8x128xf32> to vector<1x128xf32>
    %156 = vector.broadcast %155 : vector<1x128xf32> to vector<64x128xf32>
    %157 = arith.addf %154, %156 : vector<64x128xf32>
    %cst_49 = arith.constant 0.000000e+00 : f32
    %158 = vector.broadcast %cst_49 : f32 to vector<64x128xf32>
    %159 = arith.maximumf %157, %158 : vector<64x128xf32>
    %c192_50 = arith.constant 192 : index
    %c0_51 = arith.constant 0 : index
    %160 = vector.load %arg11[%c192_50, %c0_51] : memref<512x128xf32, #tpu.memory_space<vmem>>, vector<64x128xf32>
    tpu.vector_store %arg11[%c192_50, %c0_51], %159 {strides = array<i32>} : memref<512x128xf32, #tpu.memory_space<vmem>>, vector<64x128xf32>,
    %161 = vector.extract_strided_slice %120 {offsets = [256, 0], sizes = [64, 128], strides = [1, 1]} : vector<512x128xf32> to vector<64x128xf32>
    %162 = vector.extract_strided_slice %88 {offsets = [4, 0], sizes = [1, 128], strides = [1, 1]} : vector<8x128xf32> to vector<1x128xf32>
    %163 = vector.broadcast %162 : vector<1x128xf32> to vector<64x128xf32>
    %164 = arith.mulf %161, %163 : vector<64x128xf32>
    %165 = vector.extract_strided_slice %89 {offsets = [4, 0], sizes = [1, 128], strides = [1, 1]} : vector<8x128xf32> to vector<1x128xf32>
    %166 = vector.broadcast %165 : vector<1x128xf32> to vector<64x128xf32>
    %167 = arith.addf %164, %166 : vector<64x128xf32>
    %cst_52 = arith.constant 0.000000e+00 : f32
    %168 = vector.broadcast %cst_52 : f32 to vector<64x128xf32>
    %169 = arith.maximumf %167, %168 : vector<64x128xf32>
    %c256_53 = arith.constant 256 : index
    %c0_54 = arith.constant 0 : index
    %170 = vector.load %arg11[%c256_53, %c0_54] : memref<512x128xf32, #tpu.memory_space<vmem>>, vector<64x128xf32>
    tpu.vector_store %arg11[%c256_53, %c0_54], %169 {strides = array<i32>} : memref<512x128xf32, #tpu.memory_space<vmem>>, vector<64x128xf32>,
    %171 = vector.extract_strided_slice %120 {offsets = [320, 0], sizes = [64, 128], strides = [1, 1]} : vector<512x128xf32> to vector<64x128xf32>
    %172 = vector.extract_strided_slice %88 {offsets = [5, 0], sizes = [1, 128], strides = [1, 1]} : vector<8x128xf32> to vector<1x128xf32>
    %173 = vector.broadcast %172 : vector<1x128xf32> to vector<64x128xf32>
    %174 = arith.mulf %171, %173 : vector<64x128xf32>
    %175 = vector.extract_strided_slice %89 {offsets = [5, 0], sizes = [1, 128], strides = [1, 1]} : vector<8x128xf32> to vector<1x128xf32>
    %176 = vector.broadcast %175 : vector<1x128xf32> to vector<64x128xf32>
    %177 = arith.addf %174, %176 : vector<64x128xf32>
    %cst_55 = arith.constant 0.000000e+00 : f32
    %178 = vector.broadcast %cst_55 : f32 to vector<64x128xf32>
    %179 = arith.maximumf %177, %178 : vector<64x128xf32>
    %c320_56 = arith.constant 320 : index
    %c0_57 = arith.constant 0 : index
    %180 = vector.load %arg11[%c320_56, %c0_57] : memref<512x128xf32, #tpu.memory_space<vmem>>, vector<64x128xf32>
    tpu.vector_store %arg11[%c320_56, %c0_57], %179 {strides = array<i32>} : memref<512x128xf32, #tpu.memory_space<vmem>>, vector<64x128xf32>,
    %181 = vector.extract_strided_slice %120 {offsets = [384, 0], sizes = [64, 128], strides = [1, 1]} : vector<512x128xf32> to vector<64x128xf32>
    %182 = vector.extract_strided_slice %88 {offsets = [6, 0], sizes = [1, 128], strides = [1, 1]} : vector<8x128xf32> to vector<1x128xf32>
    %183 = vector.broadcast %182 : vector<1x128xf32> to vector<64x128xf32>
    %184 = arith.mulf %181, %183 : vector<64x128xf32>
    %185 = vector.extract_strided_slice %89 {offsets = [6, 0], sizes = [1, 128], strides = [1, 1]} : vector<8x128xf32> to vector<1x128xf32>
    %186 = vector.broadcast %185 : vector<1x128xf32> to vector<64x128xf32>
    %187 = arith.addf %184, %186 : vector<64x128xf32>
    %cst_58 = arith.constant 0.000000e+00 : f32
    %188 = vector.broadcast %cst_58 : f32 to vector<64x128xf32>
    %189 = arith.maximumf %187, %188 : vector<64x128xf32>
    %c384_59 = arith.constant 384 : index
    %c0_60 = arith.constant 0 : index
    %190 = vector.load %arg11[%c384_59, %c0_60] : memref<512x128xf32, #tpu.memory_space<vmem>>, vector<64x128xf32>
    tpu.vector_store %arg11[%c384_59, %c0_60], %189 {strides = array<i32>} : memref<512x128xf32, #tpu.memory_space<vmem>>, vector<64x128xf32>,
    %191 = vector.extract_strided_slice %120 {offsets = [448, 0], sizes = [64, 128], strides = [1, 1]} : vector<512x128xf32> to vector<64x128xf32>
    %192 = vector.extract_strided_slice %88 {offsets = [7, 0], sizes = [1, 128], strides = [1, 1]} : vector<8x128xf32> to vector<1x128xf32>
    %193 = vector.broadcast %192 : vector<1x128xf32> to vector<64x128xf32>
    %194 = arith.mulf %191, %193 : vector<64x128xf32>
    %195 = vector.extract_strided_slice %89 {offsets = [7, 0], sizes = [1, 128], strides = [1, 1]} : vector<8x128xf32> to vector<1x128xf32>
    %196 = vector.broadcast %195 : vector<1x128xf32> to vector<64x128xf32>
    %197 = arith.addf %194, %196 : vector<64x128xf32>
    %cst_61 = arith.constant 0.000000e+00 : f32
    %198 = vector.broadcast %cst_61 : f32 to vector<64x128xf32>
    %199 = arith.maximumf %197, %198 : vector<64x128xf32>
    %c448_62 = arith.constant 448 : index
    %c0_63 = arith.constant 0 : index
    %200 = vector.load %arg11[%c448_62, %c0_63] : memref<512x128xf32, #tpu.memory_space<vmem>>, vector<64x128xf32>
    tpu.vector_store %arg11[%c448_62, %c0_63], %199 {strides = array<i32>} : memref<512x128xf32, #tpu.memory_space<vmem>>, vector<64x128xf32>,
    return
  }
  func.func @transform_0(%arg0: i32) -> (i32, i32) {
    %c0_i32 = arith.constant 0 : i32
    %c0_i32_0 = arith.constant 0 : i32
    return %arg0, %c0_i32 : i32, i32
  }
  func.func @transform_1(%arg0: i32) -> (i32, i32) {
    %c0_i32 = arith.constant 0 : i32
    %c0_i32_0 = arith.constant 0 : i32
    return %arg0, %c0_i32 : i32, i32
  }
  func.func @transform_2(%arg0: i32) -> (i32, i32) {
    %c0_i32 = arith.constant 0 : i32
    %c0_i32_0 = arith.constant 0 : i32
    return %arg0, %c0_i32 : i32, i32
  }
  func.func @transform_3(%arg0: i32) -> (i32, i32) {
    %c0_i32 = arith.constant 0 : i32
    %c0_i32_0 = arith.constant 0 : i32
    %c0_i32_1 = arith.constant 0 : i32
    return %c0_i32, %c0_i32_0 : i32, i32
  }
  func.func @transform_4(%arg0: i32) -> (i32, i32) {
    %c0_i32 = arith.constant 0 : i32
    %c0_i32_0 = arith.constant 0 : i32
    %c0_i32_1 = arith.constant 0 : i32
    return %c0_i32, %c0_i32_0 : i32, i32
  }
  func.func @transform_5(%arg0: i32) -> (i32, i32) {
    %c0_i32 = arith.constant 0 : i32
    %c0_i32_0 = arith.constant 0 : i32
    %c0_i32_1 = arith.constant 0 : i32
    return %c0_i32, %c0_i32_0 : i32, i32
  }
  func.func @transform_6(%arg0: i32) -> (i32, i32) {
    %c0_i32 = arith.constant 0 : i32
    %c0_i32_0 = arith.constant 0 : i32
    %c0_i32_1 = arith.constant 0 : i32
    return %c0_i32, %c0_i32_0 : i32, i32
  }
  func.func @transform_7(%arg0: i32) -> (i32, i32) {
    %c0_i32 = arith.constant 0 : i32
    %c0_i32_0 = arith.constant 0 : i32
    %c0_i32_1 = arith.constant 0 : i32
    return %c0_i32, %c0_i32_0 : i32, i32
  }
  func.func @transform_8(%arg0: i32) -> (i32, i32) {
    %c0_i32 = arith.constant 0 : i32
    %c0_i32_0 = arith.constant 0 : i32
    %c0_i32_1 = arith.constant 0 : i32
    return %c0_i32, %c0_i32_0 : i32, i32
  }
  func.func @transform_9(%arg0: i32) -> (i32, i32) {
    %c0_i32 = arith.constant 0 : i32
    %c0_i32_0 = arith.constant 0 : i32
    %c0_i32_1 = arith.constant 0 : i32
    return %c0_i32, %c0_i32_0 : i32, i32
  }
  func.func @transform_10(%arg0: i32) -> (i32, i32) {
    %c0_i32 = arith.constant 0 : i32
    %c0_i32_0 = arith.constant 0 : i32
    return %arg0, %c0_i32 : i32, i32
  }
}

</mosaic_0001>

<bundles_post_ra>
// kernel: tpu_custom_call.1
= control target key start
LH: loop header
LB: loop body
LE: loop exit
PB: predicated region body
PF: predicated region fallthrough
CT: control target
= control target key end

     0   :  { %15 = vsyncpa [#allocation4], 0  ;;  %s6806_s0 = inlined_call_operand.vmem [shape: f32[128,32], index: 0, kind: input, shape index: {}]   ;;  %s6807_s1 = inlined_call_operand.vmem [shape: f32[16,32], index: 1, kind: input, shape index: {}]   ;;  %s6808_s2 = inlined_call_operand.vmem [shape: f32[1024,8], index: 2, kind: input, shape index: {}]   ;;  %s6809_s3 = inlined_call_operand.vmem [shape: bf16[32,128], index: 3, kind: input, shape index: {}]   ;;  %s6810_s4 = inlined_call_operand.vmem [shape: f32[1,128], index: 4, kind: input, shape index: {}]   ;;  %s6811_s5 = inlined_call_operand.vmem [shape: bf16[32,256], index: 5, kind: input, shape index: {}]   ;;  %s6812_s6 = inlined_call_operand.vmem [shape: f32[1,256], index: 6, kind: input, shape index: {}]   ;;  %s6813_s7 = inlined_call_operand.vmem [shape: bf16[128,128], index: 7, kind: input, shape index: {}]   ;;  %s6814_s8 = inlined_call_operand.vmem [shape: bf16[8,128], index: 8, kind: input, shape index: {}]   ;;  %s6815_s9 = inlined_call_operand.vmem [shape: f32[1,128], index: 9, kind: input, shape index: {}]   ;;  %s6816_s10 = inlined_call_operand.hbm [shape: f32[1024,128], index: 10, kind: output, shape index: {}]  }
   0x1   :  { %17 = vsyncpa [#allocation4 + $0x1], 0  ;;  %s5192_s13 = smov 0   ;;  %s5194_s14 = smov 0  }
   0x2   :  { %s5196_s15 = smov 0   ;;  %s5198_s16 = smov 0  }
   0x3 LB: > { %s5213_s17 = sadd.s32 4294967295, %s5130_s16   ;;  %s4192_s18 = sadd.s32 4294967294, %s5130_s16   ;;  %s5130_s16 = sphi %s5198_s16, %s6885_s16   ;;  %s5126_s15 = sphi %s5196_s15, %s6884_s15   ;;  %s5122_s14 = sphi %s5194_s14, %s6883_s14   ;;  %s5118_s13 = sphi %s5192_s13, %s6882_s13  }
   0x4   : > { %s5217_s19 = sadd.s32 1, %s5130_s16   ;;  %s255_s20 = sadd.s32 1, %s5126_s15 }
   0x5   : > { %s252_s21 = ssub.s32 %s5130_s16, %s5217_s19  ;;  %p265_p0 = scmp.ne.s32.totalorder %s5126_s15, %s5122_s14 }
   0x6   : > { %p253_p1 = scmp.eq.s32.totalorder %s252_s21, 0  ;;  %p266_p2 = scmp.eq.s32.totalorder %s5213_s17, 1 }
   0x7   : > { %p271_p3 = scmp.ne.s32.totalorder %s5122_s14, %s5118_s13  ;;  %p272_p4 = scmp.eq.s32.totalorder %s4192_s18, 1 }
   0x8   : > { %s5228_s22 = scalar_select %p253_p1, %s5126_s15, %s255_s20  }
   0x9   : > { %p5230_p5 = por %p266_p2, %p265_p0  ;;  %p5234_p6 = por %p272_p4, %p271_p3 }
   0xa   : > { %p4195_p7 = scmp.ge.s32.totalorder %s5130_s16, 1  ;;  %p336_p8 = scmp.lt.s32.totalorder %s5130_s16, 3 }
   0xc   : > { %p337_p9 = pnand %p4195_p7, %p336_p8 }
   0xe   : > { %340 = sbr.rel (%p337_p9) target bundleno = 884 (0x374), region = 60 }
  0x13   : > { %v4893_v0 = vld [vmem:[%s6809_s3 + $0x8] sm:$0xff]   ;;  %s4197_s27 = sshll.u32 %s5213_s17, 3  ;;  %v4894_v1 = vld [vmem:[%s6809_s3] sm:$0xff]   ;;  %v4895_v2 = vld [vmem:[%s6813_s7 + $0x38] sm:$0xff]   ;;  %vm436_vm0 = vcmask 261120   ;;  %p389_p11 = scmp.lt.s32.totalorder %s5213_s17, 1 }
  0x14   : > { %p384_p10 = scmp.lt.s32.totalorder %s4197_s27, 15  ;;  %4691 = vmatprep.subr.bf16.mxu1 %v4893_v0  ;;  %4769 = vmatprep.subr.bf16.mxu0 %v4895_v2  ;;  %v4896_v15 = vld [vmem:[%s6813_s7 + $0x30] sm:$0xff]   ;;  %v4900_v16 = vld [vmem:[%s6813_s7 + $0x28] sm:$0xff]   ;;  %v4901_v19 = vld [vmem:[%s6813_s7 + $0x20] sm:$0xff]   ;;  %v5132_v23 = vmov 0   ;;  %vm1982_vm1 = vcmask 1043456  }
  0x15   : > { %4692 = vmatpush3.bf16.msra.mxu1 %v4893_v0  ;;  %4770 = vmatpush3.bf16.msra.mxu0 %v4895_v2  ;;  %v4899_v17 = vld [vmem:[%s6811_s5 + $0x14] ss:$8 sps:$4 sm:$0xff]   ;;  %v4897_v18 = vld [vmem:[%s6811_s5 + $0x10] ss:$8 sps:$4 sm:$0xff]   ;;  %v4902_v20 = vld [vmem:[%s6811_s5] ss:$8 sps:$4 sm:$0xff]  }
  0x16   : > { %s6887_s27 = smov (!%p384_p10, %s4197_s27), 15  ;;  %4693 = vmatprep.subr.bf16.mxu1 %v4894_v1  ;;  %4771 = vmatprep.subr.bf16.mxu0 %v4896_v15  ;;  %v4904_v21 = vld [vmem:[%s6811_s5 + $0x4] ss:$8 sps:$4 sm:$0xff]   ;;  %v4905_v22 = vld [vmem:[%s6813_s7 + $0x18] sm:$0xff]   ;;  %v1884_v24 = vld [vmem:[%s6814_s8] sm:$0xf] }
  0x17   : > { %s4198_s12 = sshll.u32 %s6887_s27, 3  ;;  %s4200_s18 = sshll.u32 %s5213_s17, 6  ;;  %v4906_v25 = vld [vmem:[%s6813_s7 + $0x10] sm:$0xff]   ;;  %v1984_v28 = vsel %vm1982_vm1, %v1884_v24, 0  ;;  %v4907_v29 = vld [vmem:[%s6813_s7 + $0x8] sm:$0xff]   ;;  %vm1885_vm2 = vcmask 64512  }
  0x18   : > { %s387_s21 = scalar_lea.vmem %s6806_s0, %s4198_s12  ;;  %p394_p12 = scmp.lt.s32.totalorder %s4200_s18, 127  ;;  %v4908_v35 = vld [vmem:[%s6813_s7] sm:$0xff]  }
  0x19   : > { %4694 = vmatpush3.bf16.msra.mxu1 %v4894_v1  ;;  %v401_v3 = vld [vmem:[%s387_s21] sm:$0xff]  ;;  %v402_v4 = vld [vmem:[%s387_s21 + $0x8] sm:$0xff]  ;;  %v403_v5 = vld [vmem:[%s387_s21 + $0x10] sm:$0xff]  ;;  %4772 = vmatpush3.bf16.msra.mxu0 %v4896_v15  ;;  %s390_s30 = scalar_select %p389_p11, %s5213_s17, 1 }
  0x1a   : > { %v409_v6 = vpack.c.bf16 %v402_v4, %v401_v3  ;;  %v404_v7 = vld [vmem:[%s387_s21 + $0x18] sm:$0xff]  ;;  %v405_v8 = vld [vmem:[%s387_s21 + $0x20] sm:$0xff]  ;;  %v406_v9 = vld [vmem:[%s387_s21 + $0x28] sm:$0xff]  ;;  %4773 = vmatprep.subr.bf16.mxu0 %v4900_v16  ;;  %1679 = vmatprep.subr.bf16.mxu1 %v4899_v17  ;;  %s6889_s18 = smov (!%p394_p12, %s4200_s18), 127  ;;  %s380_s12 = sand.u32 1, %s5122_s14  }
  0x1b   : > { %v410_v10 = vpack.c.bf16 %v404_v7, %v403_v5  ;;  %v411_v11 = vpack.c.bf16 %v406_v9, %v405_v8  ;;  %v407_v12 = vld [vmem:[%s387_s21 + $0x30] sm:$0xff]  ;;  %v408_v13 = vld [vmem:[%s387_s21 + $0x38] sm:$0xff]  ;;  %s4199_s20 = sshll.u32 %s390_s30, 3  ;;  %s4201_s30 = sshll.u32 %s6889_s18, 3 }
  0x1c   : > { %4695 = vmatprep.mubr.msk.bf16.mxu1 %vm436_vm0, %v409_v6  ;;  %v412_v14 = vpack.c.bf16 %v408_v13, %v407_v12  ;;  %s392_s28 = scalar_lea.vmem %s6807_s1, %s4199_s20  ;;  %s5300_s25 = scalar_lea.vmem %s6808_s2, %s4201_s30 }
  0x1d   : > { %4696 = vmatmul.mubr.msk.bf16.vlgmr.msra.gmra.mxu1 %vm436_vm0, %v410_v10  ;;  %4774 = vmatpush3.bf16.msra.mxu0 %v4900_v16  ;;  %v1626_v26 = vld [vmem:[%s392_s28] sm:$0xff]  ;;  %v1789_v31 = vld [vmem:[%s5300_s25 + $0x8] sm:$0xff]  ;;  %v1790_v32 = vld [vmem:[%s5300_s25 + $0x10] sm:$0xff]  ;;  %s6002_s21 = sshll.u32 %s380_s12, 9  ;;  %s4420_s26 = sshll.u32 %s5213_s17, 13 }
  0x1e   : > { %4699 = vmatprep.mubr.msk.bf16.mxu1 %vm436_vm0, %v411_v11  ;;  %1680 = vmatpush1.bf16.msra.mxu1 %v4897_v18  ;;  %v1627_v27 = vpack.c.bf16 %v1626_v26, %v1626_v26  ;;  %v1788_v30 = vld [vmem:[%s5300_s25] sm:$0xff]  ;;  %v1791_v34 = vld [vmem:[%s5300_s25 + $0x18] sm:$0xff]  ;;  %v1793_v38 = vld [vmem:[%s5300_s25 + $0x28] sm:$0xff]  ;;  %s6758_s11 = scalar_lea.hbm %s6816_s10, %s4420_s26  ;;  %s6766_s30 = scalar_lea.sflag [#allocation4], %s380_s12 }
  0x1f   : > { %4775 = vmatprep.subr.bf16.mxu0 %v4901_v19  ;;  %1681 = vmatprep.subr.bf16.mxu1 %v4904_v21  ;;  %v1852_v33 = vpack.c.bf16 %v1789_v31, %v1788_v30  ;;  %v1853_v36 = vpack.c.bf16 %v1791_v34, %v1790_v32  ;;  %v1792_v37 = vld [vmem:[%s5300_s25 + $0x20] sm:$0xff]  ;;  %v1794_v39 = vld [vmem:[%s5300_s25 + $0x30] sm:$0xff]  ;;  %v1795_v41 = vld [vmem:[%s5300_s25 + $0x38] sm:$0xff] }
  0x20   : > { %v1854_v40 = vpack.c.bf16 %v1793_v38, %v1792_v37  ;;  %v1855_v42 = vpack.c.bf16 %v1795_v41, %v1794_v39  ;;  %v1796_v43 = vld [vmem:[%s5300_s25 + $0x40] sm:$0xff]  ;;  %v1797_v44 = vld [vmem:[%s5300_s25 + $0x48] sm:$0xff]  ;;  %v1798_v45 = vld [vmem:[%s5300_s25 + $0x50] sm:$0xff] }
  0x21   : > { %4776 = vmatpush3.bf16.msra.mxu0 %v4901_v19  ;;  %v1856_v46 = vpack.c.bf16 %v1797_v44, %v1796_v43  ;;  %v1799_v47 = vld [vmem:[%s5300_s25 + $0x58] sm:$0xff]  ;;  %v1800_v49 = vld [vmem:[%s5300_s25 + $0x60] sm:$0xff]  ;;  %v1801_v50 = vld [vmem:[%s5300_s25 + $0x68] sm:$0xff] }
  0x22   : > { %4777 = vmatprep.subr.bf16.mxu0 %v4905_v22  ;;  %1682 = vmatpush1.bf16.msra.mxu1 %v4902_v20  ;;  %v1857_v48 = vpack.c.bf16 %v1799_v47, %v1798_v45  ;;  %v1802_v51 = vld [vmem:[%s5300_s25 + $0x70] sm:$0xff]  ;;  %v1858_v52 = vpack.c.bf16 %v1801_v50, %v1800_v49  ;;  %v1803_v53 = vld [vmem:[%s5300_s25 + $0x78] sm:$0xff]  ;;  %v1804_v55 = vld [vmem:[%s5300_s25 + $0x80] sm:$0xff]  ;;  %v5133_v45 = vmov 1966171168   ;;  %v527_v47 = vlaneseq }
  0x23   : > { %4849 = vmatprep.subr.msk.bf16.mxu1 %vm1982_vm1, %v1884_v24  ;;  %v1859_v54 = vpack.c.bf16 %v1803_v53, %v1802_v51  ;;  %v1805_v56 = vld [vmem:[%s5300_s25 + $0x88] sm:$0xff]  ;;  %v1806_v57 = vld [vmem:[%s5300_s25 + $0x90] sm:$0xff]  ;;  %v1807_v59 = vld [vmem:[%s5300_s25 + $0x98] sm:$0xff] }
  0x24   : > { %v1860_v58 = vpack.c.bf16 %v1805_v56, %v1804_v55  ;;  %v1861_v60 = vpack.c.bf16 %v1807_v59, %v1806_v57  ;;  %v1808_v61 = vld [vmem:[%s5300_s25 + $0xa0] sm:$0xff]  ;;  %v1809_v62 = vld [vmem:[%s5300_s25 + $0xa8] sm:$0xff]  ;;  %v1810_v63 = vld [vmem:[%s5300_s25 + $0xb0] sm:$0xff]  ;;  %v5383_v49 = vshrl.u32 %v527_v47, 7 }
  0x25   : > { %4700 = vmatmul.mubr.msk.bf16.gmra.mxu1 %vm436_vm0, %v412_v14  ;;  %4778 = vmatpush3.bf16.msra.mxu0 %v4905_v22  ;;  %v1862_v0 = vpack.c.bf16 %v1809_v62, %v1808_v61  ;;  %v1811_v1 = vld [vmem:[%s5300_s25 + $0xb8] sm:$0xff]  ;;  %v1812_v3 = vld [vmem:[%s5300_s25 + $0xc0] sm:$0xff]  ;;  %v1813_v4 = vld [vmem:[%s5300_s25 + $0xc8] sm:$0xff] }
  0x26   : > { %1699 = vmatprep.mubr.bf16.mxu1 %v5132_v23  ;;  %4779 = vmatprep.subr.bf16.mxu0 %v4906_v25  ;;  %v1863_v2 = vpack.c.bf16 %v1811_v1, %v1810_v63  ;;  %v1814_v5 = vld [vmem:[%s5300_s25 + $0xd0] sm:$0xff]  ;;  %v1864_v6 = vpack.c.bf16 %v1813_v4, %v1812_v3  ;;  %v1815_v7 = vld [vmem:[%s5300_s25 + $0xd8] sm:$0xff]  ;;  %v1816_v9 = vld [vmem:[%s5300_s25 + $0xe0] sm:$0xff] }
  0x27   : > { %v1865_v8 = vpack.c.bf16 %v1815_v7, %v1814_v5  ;;  %v1817_v10 = vld [vmem:[%s5300_s25 + $0xe8] sm:$0xff]  ;;  %v1818_v11 = vld [vmem:[%s5300_s25 + $0xf0] sm:$0xff]  ;;  %v1819_v13 = vld [vmem:[%s5300_s25 + $0xf8] sm:$0xff]  ;;  %v5411_v5 = vsub.s32 0, %v5383_v49 }
  0x28   : > { %v1866_v12 = vpack.c.bf16 %v1817_v10, %v1816_v9  ;;  %v1867_v14 = vpack.c.bf16 %v1819_v13, %v1818_v11  ;;  %v1820_v15 = vld [vmem:[%s5300_s25 + $0x100] sm:$0xff]  ;;  %v1821_v16 = vld [vmem:[%s5300_s25 + $0x108] sm:$0xff]  ;;  %v1822_v18 = vld [vmem:[%s5300_s25 + $0x110] sm:$0xff] }
  0x29   : > { %4780 = vmatpush3.bf16.msra.mxu0 %v4906_v25  ;;  %v1868_v17 = vpack.c.bf16 %v1821_v16, %v1820_v15  ;;  %v1823_v19 = vld [vmem:[%s5300_s25 + $0x118] sm:$0xff]  ;;  %v1824_v21 = vld [vmem:[%s5300_s25 + $0x120] sm:$0xff]  ;;  %v1825_v22 = vld [vmem:[%s5300_s25 + $0x128] sm:$0xff] }
  0x2a   : > { %4781 = vmatprep.subr.bf16.mxu0 %v4907_v29  ;;  %v1869_v20 = vpack.c.bf16 %v1823_v19, %v1822_v18  ;;  %v1870_v23 = vpack.c.bf16 %v1825_v22, %v1824_v21  ;;  %v1826_v24 = vld [vmem:[%s5300_s25 + $0x130] sm:$0xff]  ;;  %v1827_v25 = vld [vmem:[%s5300_s25 + $0x138] sm:$0xff]  ;;  %v1833_v34 = vld [vmem:[%s5300_s25 + $0x168] sm:$0xff] }
  0x2b   : > { %v1871_v26 = vpack.c.bf16 %v1827_v25, %v1826_v24  ;;  %v1830_v30 = vld [vmem:[%s5300_s25 + $0x150] sm:$0xff]  ;;  %v1831_v31 = vld [vmem:[%s5300_s25 + $0x158] sm:$0xff]  ;;  %v1836_v39 = vld [vmem:[%s5300_s25 + $0x180] sm:$0xff] }
  0x2c   : > { %v1873_v32 = vpack.c.bf16 %v1831_v31, %v1830_v30  ;;  %v1835_v37 = vld [vmem:[%s5300_s25 + $0x178] sm:$0xff]  ;;  %v5388_v50 = vld [vmem:[%s6810_s4] ss:$0 sm:$0xff]  ;;  %v1845_v7 = vld [vmem:[%s5300_s25 + $0x1c8] sm:$0xff] }
  0x2d   : > { %4277 = vmatmul.mubr.msk.bf16.vlgmr.msra.gmra.mxu1 %vm436_vm0, %v1627_v27  ;;  %4782 = vmatpush3.bf16.msra.mxu0 %v4907_v29  ;;  %v1828_v27 = vld [vmem:[%s5300_s25 + $0x140] sm:$0xff]  ;;  %v1839_v43 = vld [vmem:[%s5300_s25 + $0x198] sm:$0xff] }
  0x2e   : > { %4704 = vmatpush3.bf16.msra.mxu1 %v1984_v28  ;;  %4705 = vmatprep.mubr.msk.bf16.mxu1 %vm1885_vm2, %v1852_v33  ;;  %v1829_v28 = vld [vmem:[%s5300_s25 + $0x148] sm:$0xff]  ;;  %v1832_v33 = vld [vmem:[%s5300_s25 + $0x160] sm:$0xff]  ;;  %v1843_v55 = vld [vmem:[%s5300_s25 + $0x1b8] sm:$0xff] }
  0x2f   : > { %4783 = vmatprep.subr.bf16.mxu0 %v4908_v35  ;;  %v1872_v29 = vpack.c.bf16 %v1829_v28, %v1828_v27  ;;  %v1840_v51 = vld [vmem:[%s5300_s25 + $0x1a0] sm:$0xff] }
  0x31   : > { %4784 = vmatpush3.bf16.msra.mxu0 %v4908_v35  ;;  %v1874_v35 = vpack.c.bf16 %v1833_v34, %v1832_v33 }
  0x35   : > { %4706 = vmatmul.mubr.msk.bf16.vlgmr.msra.gmra.mxu1 %vm1885_vm2, %v1853_v36  ;;  %v1834_v36 = vld [vmem:[%s5300_s25 + $0x170] sm:$0xff] }
  0x36   : > { %4709 = vmatprep.mubr.msk.bf16.mxu1 %vm1885_vm2, %v1854_v40  ;;  %v1875_v38 = vpack.c.bf16 %v1835_v37, %v1834_v36  ;;  %v1837_v40 = vld [vmem:[%s5300_s25 + $0x188] sm:$0xff] }
  0x37   : > { %v1876_v41 = vpack.c.bf16 %v1837_v40, %v1836_v39 }
  0x3d   : > { %4710 = vmatmul.mubr.msk.bf16.gmra.mxu1 %vm1885_vm2, %v1855_v42  ;;  %v1838_v42 = vld [vmem:[%s5300_s25 + $0x190] sm:$0xff] }
  0x3e   : > { %4713 = vmatprep.mubr.msk.bf16.mxu1 %vm1885_vm2, %v1856_v46  ;;  %v1877_v44 = vpack.c.bf16 %v1839_v43, %v1838_v42  ;;  %v525_v46 = vunpack.c.l.s4 %v5133_v45 }
  0x45   : > { %4714 = vmatmul.mubr.msk.bf16.gmra.mxu1 %vm1885_vm2, %v1857_v48  ;;  %v526_v48 = vunpack.c.0.s8 %v525_v46 }
  0x46   : > { %4717 = vmatprep.mubr.msk.bf16.mxu1 %vm1885_vm2, %v1858_v52  ;;  %v1841_v52 = vld [vmem:[%s5300_s25 + $0x1a8] sm:$0xff] }
  0x47   : > { %v1878_v53 = vpack.c.bf16 %v1841_v52, %v1840_v51  ;;  %v5396_v59 = vsub.s32 %v526_v48, %v5383_v49 }
  0x4d   : > { %4718 = vmatmul.mubr.msk.bf16.gmra.mxu1 %vm1885_vm2, %v1859_v54  ;;  %v1842_v54 = vld [vmem:[%s5300_s25 + $0x1b0] sm:$0xff] }
  0x4e   : > { %4721 = vmatprep.mubr.msk.bf16.mxu1 %vm1885_vm2, %v1860_v58  ;;  %v1879_v57 = vpack.c.bf16 %v1843_v55, %v1842_v54 }
  0x55   : > { %4722 = vmatmul.mubr.msk.bf16.gmra.mxu1 %vm1885_vm2, %v1861_v60 }
  0x56   : > { %4725 = vmatprep.mubr.msk.bf16.mxu1 %vm1885_vm2, %v1862_v0 }
  0x5d   : > { %4726 = vmatmul.mubr.msk.bf16.gmra.mxu1 %vm1885_vm2, %v1863_v2 }
  0x5e   : > { %4729 = vmatprep.mubr.msk.bf16.mxu1 %vm1885_vm2, %v1864_v6  ;;  %v1844_v6 = vld [vmem:[%s5300_s25 + $0x1c0] sm:$0xff] }
  0x5f   : > { %v1880_v15 = vpack.c.bf16 %v1845_v7, %v1844_v6 }
  0x65   : > { %4730 = vmatmul.mubr.msk.bf16.gmra.mxu1 %vm1885_vm2, %v1865_v8 }
  0x66   : > { %4733 = vmatprep.mubr.msk.bf16.mxu1 %vm1885_vm2, %v1866_v12 }
  0x6d   : > { %4734 = vmatmul.mubr.msk.bf16.gmra.mxu1 %vm1885_vm2, %v1867_v14 }
  0x6e   : > { %4737 = vmatprep.mubr.msk.bf16.mxu1 %vm1885_vm2, %v1868_v17 }
  0x75   : > { %4738 = vmatmul.mubr.msk.bf16.gmra.mxu1 %vm1885_vm2, %v1869_v20 }
  0x76   : > { %4741 = vmatprep.mubr.msk.bf16.mxu1 %vm1885_vm2, %v1870_v23 }
  0x7d   : > { %4742 = vmatmul.mubr.msk.bf16.gmra.mxu1 %vm1885_vm2, %v1871_v26 }
  0x7e   : > { %4745 = vmatprep.mubr.msk.bf16.mxu1 %vm1885_vm2, %v1872_v29 }
  0x85   : > { %4746 = vmatmul.mubr.msk.bf16.gmra.mxu1 %vm1885_vm2, %v1873_v32 }
  0x86   : > { %4749 = vmatprep.mubr.msk.bf16.mxu1 %vm1885_vm2, %v1874_v35 }
  0x8d   : > { %4750 = vmatmul.mubr.msk.bf16.gmra.mxu1 %vm1885_vm2, %v1875_v38 }
  0x8e   : > { %4753 = vmatprep.mubr.msk.bf16.mxu1 %vm1885_vm2, %v1876_v41 }
  0x95   : > { %4754 = vmatmul.mubr.msk.bf16.gmra.mxu1 %vm1885_vm2, %v1877_v44 }
  0x96   : > { %4757 = vmatprep.mubr.msk.bf16.mxu1 %vm1885_vm2, %v1878_v53 }
  0x9d   : > { %4758 = vmatmul.mubr.msk.bf16.gmra.mxu1 %vm1885_vm2, %v1879_v57 }
  0x9e   : > { %4761 = vmatprep.mubr.msk.bf16.mxu1 %vm1885_vm2, %v1880_v15 }
  0xdd   : > { %v4697_v56 = vpop.f32.mrf.mxu1 }
  0xde   : > { %v492_v58 = vadd.f32 %v4697_v56, %v5388_v50 }
  0xdf   : > { %v483_v60 = vpop.f32.mrf.mxu1 }
  0xe0   : > { %v5399_v61 = vmax.f32 %v492_v58, 0.0  ;;  %v484_v62 = vadd.f32 %v5388_v50, %v483_v60 }
  0xe1   : > { %v4698_v63 = vpop.f32.mrf.mxu1 }
  0xe2   : > { %v5403_v0 = vmax.f32 %v484_v62, 0.0  ;;  %v495_v1 = vadd.f32 %v4698_v63, %v5388_v50  ;;  %v806_v2 = vrot.slane %v5399_v61, %v5396_v59  ;;  %v799_v3 = vcombine.high %v5399_v61, %v5399_v61 }
  0xe3   : > { %v486_v4 = vpop.f32.mrf.mxu1 }
  0xe4   : > { %v5415_v8 = vmax.f32 %v495_v1, 0.0  ;;  %v487_v9 = vadd.f32 %v5388_v50, %v486_v4  ;;  %v530_v10 = vrot.slane %v5403_v0, %v5396_v59  ;;  %v523_v11 = vcombine.high %v5403_v0, %v5403_v0 }
  0xe5   : > { %v814_v12 = vcombine.high %v806_v2, %v806_v2  ;;  %v5423_v13 = vrot.slane %v806_v2, %v5396_v59  ;;  %v5426_v14 = vrot.slane %v799_v3, %v5396_v59  ;;  %v4701_v20 = vpop.f32.mrf.mxu1 }
  0xe6   : > { %v5428_v16 = vmax.f32 %v487_v9, 0.0  ;;  %v538_v17 = vcombine.high %v530_v10, %v530_v10  ;;  %v546_v18 = vrot.slane %v530_v10, %v5396_v59  ;;  %v537_v19 = vrot.slane %v523_v11, %v5396_v59 }
  0xe7   : > { %v5433_v21 = vrot.slane %v814_v12, %v5396_v59  ;;  %v851_v22 = vrot.slane %v5423_v13, %v5411_v5  ;;  %v844_v23 = vcombine.high %v5423_v13, %v5423_v13  ;;  %v5440_v24 = vadd.f32 %v4701_v20, %v5388_v50 }
  0xe8   : > { %v560_v25 = vrot.slane %v538_v17, %v5396_v59  ;;  %v568_v26 = vcombine.high %v546_v18, %v546_v18  ;;  %v575_v27 = vrot.slane %v546_v18, %v5411_v5  ;;  %v539_v28 = vcombine.high %v537_v19, %v537_v19 }
  0xe9   : > { %v553_v29 = vrot.slane %v537_v19, %v5396_v59  ;;  %v668_v30 = vrot.slane %v5428_v16, %v5396_v59  ;;  %v661_v31 = vcombine.high %v5428_v16, %v5428_v16  ;;  %v855_v32 = vrot.slane %v5433_v21, %v5411_v5 }
  0xea   : > { %v570_v33 = vcombine.high %v560_v25, %v560_v25  ;;  %v579_v34 = vrot.slane %v560_v25, %v5411_v5  ;;  %v612_v35 = vmul.f32 %v575_v27, %v5403_v0  ;;  %v583_v36 = vrot.slane %v568_v26, %v5411_v5 }
  0xeb   : > { %v567_v37 = vrot.slane %v539_v28, %v5396_v59  ;;  %v591_v38 = vrot.slane %v553_v29, %v5411_v5  ;;  %v569_v39 = vcombine.high %v553_v29, %v553_v29  ;;  %v676_v40 = vcombine.high %v668_v30, %v668_v30 }
  0xec   : > { %v613_v41 = vmul.f32 %v579_v34, %v5403_v0  ;;  %v587_v42 = vrot.slane %v570_v33, %v5411_v5  ;;  %v614_v43 = vmul.f32 %v583_v36, %v5403_v0  ;;  %v684_v44 = vrot.slane %v668_v30, %v5396_v59 }
  0xed   : > { %v595_v45 = vrot.slane %v567_v37, %v5411_v5  ;;  %v616_v46 = vmul.f32 %v591_v38, %v5403_v0  ;;  %v571_v47 = vcombine.high %v567_v37, %v567_v37  ;;  %v599_v48 = vrot.slane %v569_v39, %v5411_v5 }
  0xee   : > { %v4424_v51 = vpack.c.bf16 %v613_v41, %v612_v35  ;;  %v615_v52 = vmul.f32 %v587_v42, %v5403_v0  ;;  %v698_v53 = vrot.slane %v676_v40, %v5396_v59  ;;  %v713_v54 = vrot.slane %v684_v44, %v5411_v5 }
  0xef   : > { %v617_v55 = vmul.f32 %v595_v45, %v5403_v0  ;;  %v603_v56 = vrot.slane %v571_v47, %v5411_v5  ;;  %v618_v57 = vmul.f32 %v599_v48, %v5403_v0  ;;  %v706_v58 = vcombine.high %v684_v44, %v684_v44 }
  0xf0   : > { %4425 = vst [vmem:[#allocation2] sm:$0xff] %v4424_v51   ;;  %v4429_v60 = vpack.c.bf16 %v615_v52, %v614_v43  ;;  %v717_v62 = vrot.slane %v698_v53, %v5411_v5  ;;  %v750_v63 = vmul.f32 %v713_v54, %v5428_v16  ;;  %v708_v1 = vcombine.high %v698_v53, %v698_v53 }
  0xf1   : > { %v4434_v2 = vpack.c.bf16 %v617_v55, %v616_v46  ;;  %v619_v3 = vmul.f32 %v603_v56, %v5403_v0  ;;  %v721_v4 = vrot.slane %v706_v58, %v5411_v5  ;;  %v675_v6 = vrot.slane %v661_v31, %v5396_v59 }
  0xf2   : > { %4581 = vst [vmem:[#allocation2 + $0x8] sm:$0xff] %v4429_v60   ;;  %v751_v7 = vmul.f32 %v717_v62, %v5428_v16  ;;  %v725_v9 = vrot.slane %v708_v1, %v5411_v5  ;;  %v888_v10 = vmul.f32 %v851_v22, %v5399_v61  ;;  %v889_v11 = vmul.f32 %v855_v32, %v5399_v61 }
  0xf3   : > { %4582 = vst [vmem:[#allocation2 + $0x10] sm:$0xff] %v4434_v2   ;;  %v4439_v12 = vpack.c.bf16 %v619_v3, %v618_v57  ;;  %v752_v13 = vmul.f32 %v721_v4, %v5428_v16  ;;  %v677_v15 = vcombine.high %v675_v6, %v675_v6  ;;  %v691_v0 = vrot.slane %v675_v6, %v5396_v59 }
  0xf4   : > { %v4444_v17 = vpack.c.bf16 %v751_v7, %v750_v63  ;;  %v753_v18 = vmul.f32 %v725_v9, %v5428_v16  ;;  %v4464_v19 = vpack.c.bf16 %v889_v11, %v888_v10  ;;  %v846_v20 = vcombine.high %v5433_v21, %v5433_v21  ;;  %v499_v21 = vpop.f32.mrf.mxu1 }
  0xf5   : > { %4583 = vst [vmem:[#allocation2 + $0x18] sm:$0xff] %v4439_v12   ;;  %v705_v25 = vrot.slane %v677_v15, %v5396_v59  ;;  %v729_v22 = vrot.slane %v691_v0, %v5411_v5  ;;  %v707_v26 = vcombine.high %v691_v0, %v691_v0  ;;  %v859_v27 = vrot.slane %v844_v23, %v5411_v5 }
  0xf6   : > { %4584 = vst [vmem:[#allocation2 + $0x20] sm:$0xff] %v4444_v17   ;;  %v4449_v28 = vpack.c.bf16 %v753_v18, %v752_v13  ;;  %4588 = vst [vmem:[#allocation2 + $0x40] sm:$0xff] %v4464_v19   ;;  %v863_v29 = vrot.slane %v846_v20, %v5411_v5  ;;  %v5489_v30 = vmax.f32 %v5440_v24, 0.0  ;;  %v815_v31 = vcombine.high %v5426_v14, %v5426_v14  ;;  %v4702_v39 = vpop.f32.mrf.mxu1 }
  0xf7   : > { %v4909_v32 = vld [vmem:[#allocation2] sm:$0xff]   ;;  %v733_v33 = vrot.slane %v705_v25, %v5411_v5  ;;  %v754_v34 = vmul.f32 %v729_v22, %v5428_v16  ;;  %v709_v35 = vcombine.high %v705_v25, %v705_v25  ;;  %v737_v23 = vrot.slane %v707_v26, %v5411_v5 }
  0xf8   : > { %4585 = vst [vmem:[#allocation2 + $0x28] sm:$0xff] %v4449_v28   ;;  %v890_v36 = vmul.f32 %v859_v27, %v5399_v61  ;;  %v891_v37 = vmul.f32 %v863_v29, %v5399_v61  ;;  %v829_v24 = vrot.slane %v5426_v14, %v5396_v59  ;;  %v843_v38 = vrot.slane %v815_v31, %v5396_v59  ;;  %v502_v60 = vpop.f32.mrf.mxu1 }
  0xf9   : > { %4785 = vmatprep.mubr.bf16.mxu0 %v4909_v32  ;;  %v4910_v40 = vld [vmem:[#allocation2 + $0x8] sm:$0xff]   ;;  %v755_v41 = vmul.f32 %v733_v33, %v5428_v16  ;;  %v741_v42 = vrot.slane %v709_v35, %v5411_v5  ;;  %v756_v43 = vmul.f32 %v737_v23, %v5428_v16  ;;  %v500_v44 = vadd.f32 %v5388_v50, %v499_v21 }
  0xfa   : > { %v4911_v45 = vld [vmem:[#allocation2 + $0x10] sm:$0xff]   ;;  %v4469_v46 = vpack.c.bf16 %v891_v37, %v890_v36  ;;  %v867_v47 = vrot.slane %v829_v24, %v5411_v5  ;;  %v871_v48 = vrot.slane %v843_v38, %v5411_v5  ;;  %v845_v14 = vcombine.high %v829_v24, %v829_v24  ;;  %4786 = vmatmul.mubr.bf16.vlgmr.msra.gmra.mxu0 %v4910_v40 }
  0xfb   : > { %v4454_v51 = vpack.c.bf16 %v755_v41, %v754_v34  ;;  %v757_v52 = vmul.f32 %v741_v42, %v5428_v16  ;;  %v5508_v53 = vmax.f32 %v500_v44, 0.0  ;;  %v847_v54 = vcombine.high %v843_v38, %v843_v38  ;;  %4789 = vmatprep.mubr.bf16.mxu0 %v4911_v45 }
  0xfc   : > { %4589 = vst [vmem:[#allocation2 + $0x48] sm:$0xff] %v4469_v46   ;;  %v892_v55 = vmul.f32 %v867_v47, %v5399_v61  ;;  %v893_v56 = vmul.f32 %v871_v48, %v5399_v61  ;;  %v875_v57 = vrot.slane %v845_v14, %v5411_v5  ;;  %v944_v58 = vrot.slane %v5415_v8, %v5396_v59  ;;  %v4912_v17 = vld [vmem:[#allocation2 + $0x18] sm:$0xff]  }
  0xfd   : > { %4586 = vst [vmem:[#allocation2 + $0x30] sm:$0xff] %v4454_v51   ;;  %v4459_v62 = vpack.c.bf16 %v757_v52, %v756_v43  ;;  %v879_v63 = vrot.slane %v847_v54, %v5411_v5  ;;  %v511_v16 = vadd.f32 %v4702_v39, %v5388_v50  ;;  %v937_v1 = vcombine.high %v5415_v8, %v5415_v8  ;;  %v4913_v25 = vld [vmem:[#allocation2 + $0x20] sm:$0xff]  }
  0xfe   : > { %v4474_v2 = vpack.c.bf16 %v893_v56, %v892_v55  ;;  %v894_v3 = vmul.f32 %v875_v57, %v5399_v61  ;;  %v952_v4 = vcombine.high %v944_v58, %v944_v58  ;;  %v960_v6 = vrot.slane %v944_v58, %v5396_v59 }
  0xff   : > { %4587 = vst [vmem:[#allocation2 + $0x38] sm:$0xff] %v4459_v62   ;;  %v895_v7 = vmul.f32 %v879_v63, %v5399_v61  ;;  %v5522_v9 = vmax.f32 %v511_v16, 0.0  ;;  %v951_v10 = vrot.slane %v937_v1, %v5396_v59  ;;  %v503_v11 = vadd.f32 %v5388_v50, %v502_v60  ;;  %v4914_v51 = vld [vmem:[#allocation2 + $0x28] sm:$0xff]  }
 0x100   : > { %4590 = vst [vmem:[#allocation2 + $0x50] sm:$0xff] %v4474_v2   ;;  %v974_v12 = vrot.slane %v952_v4, %v5396_v59  ;;  %v989_v13 = vrot.slane %v960_v6, %v5411_v5  ;;  %v982_v15 = vcombine.high %v960_v6, %v960_v6  ;;  %v1082_v0 = vrot.slane %v5508_v53, %v5396_v59 }
 0x101   : > { %v4479_v18 = vpack.c.bf16 %v895_v7, %v894_v3  ;;  %v953_v19 = vcombine.high %v951_v10, %v951_v10  ;;  %v967_v61 = vrot.slane %v951_v10, %v5396_v59  ;;  %v5531_v20 = vmax.f32 %v503_v11, 0.0 }
 0x102   : > { %v993_v22 = vrot.slane %v974_v12, %v5411_v5  ;;  %v1026_v50 = vmul.f32 %v989_v13, %v5415_v8  ;;  %v984_v26 = vcombine.high %v974_v12, %v974_v12  ;;  %v997_v27 = vrot.slane %v982_v15, %v5411_v5  ;;  %4790 = vmatmul.mubr.bf16.gmra.mxu0 %v4912_v17 }
 0x103   : > { %4591 = vst [vmem:[#allocation2 + $0x58] sm:$0xff] %v4479_v18   ;;  %v981_v28 = vrot.slane %v953_v19, %v5396_v59  ;;  %v1005_v29 = vrot.slane %v967_v61, %v5411_v5  ;;  %v983_v31 = vcombine.high %v967_v61, %v967_v61  ;;  %v1090_v21 = vcombine.high %v1082_v0, %v1082_v0 }
 0x104   : > { %4793 = vmatprep.mubr.bf16.mxu0 %v4913_v25  ;;  %v1027_v32 = vmul.f32 %v993_v22, %v5415_v8  ;;  %v1001_v33 = vrot.slane %v984_v26, %v5411_v5  ;;  %v1028_v34 = vmul.f32 %v997_v27, %v5415_v8  ;;  %v1098_v35 = vrot.slane %v1082_v0, %v5396_v59  ;;  %v4915_v57 = vld [vmem:[#allocation2 + $0x30] sm:$0xff]  }
 0x105   : > { %v1009_v23 = vrot.slane %v981_v28, %v5411_v5  ;;  %v1030_v36 = vmul.f32 %v1005_v29, %v5415_v8  ;;  %v985_v37 = vcombine.high %v981_v28, %v981_v28  ;;  %v1013_v24 = vrot.slane %v983_v31, %v5411_v5 }
 0x106   : > { %v4484_v38 = vpack.c.bf16 %v1027_v32, %v1026_v50  ;;  %v1029_v39 = vmul.f32 %v1001_v33, %v5415_v8  ;;  %v1112_v40 = vrot.slane %v1090_v21, %v5396_v59  ;;  %v1127_v41 = vrot.slane %v1098_v35, %v5411_v5  ;;  %v4916_v29 = vld [vmem:[#allocation2 + $0x38] sm:$0xff]  }
 0x107   : > { %v1031_v42 = vmul.f32 %v1009_v23, %v5415_v8  ;;  %v1017_v43 = vrot.slane %v985_v37, %v5411_v5  ;;  %v1032_v44 = vmul.f32 %v1013_v24, %v5415_v8  ;;  %v1120_v45 = vcombine.high %v1098_v35, %v1098_v35 }
 0x108   : > { %4592 = vst [vmem:[#allocation2 + $0x60] sm:$0xff] %v4484_v38   ;;  %v4489_v46 = vpack.c.bf16 %v1029_v39, %v1028_v34  ;;  %v1131_v47 = vrot.slane %v1112_v40, %v5411_v5  ;;  %v1164_v48 = vmul.f32 %v1127_v41, %v5508_v53  ;;  %v1122_v14 = vcombine.high %v1112_v40, %v1112_v40  ;;  %v4917_v34 = vld [vmem:[#allocation2 + $0x40] sm:$0xff]  }
 0x109   : > { %v4494_v52 = vpack.c.bf16 %v1031_v42, %v1030_v36  ;;  %v1033_v54 = vmul.f32 %v1017_v43, %v5415_v8  ;;  %v1135_v55 = vrot.slane %v1120_v45, %v5411_v5  ;;  %v1075_v56 = vcombine.high %v5508_v53, %v5508_v53 }
 0x10a   : > { %4593 = vst [vmem:[#allocation2 + $0x68] sm:$0xff] %v4489_v46   ;;  %v1165_v58 = vmul.f32 %v1131_v47, %v5508_v53  ;;  %v1139_v60 = vrot.slane %v1122_v14, %v5411_v5  ;;  %v1220_v62 = vrot.slane %v5531_v20, %v5396_v59  ;;  %v1213_v63 = vcombine.high %v5531_v20, %v5531_v20 }
 0x10b   : > { %4794 = vmatmul.mubr.bf16.gmra.mxu0 %v4914_v51  ;;  %4594 = vst [vmem:[#allocation2 + $0x70] sm:$0xff] %v4494_v52   ;;  %v4499_v8 = vpack.c.bf16 %v1033_v54, %v1032_v44  ;;  %v1166_v16 = vmul.f32 %v1135_v55, %v5508_v53  ;;  %v1089_v1 = vrot.slane %v1075_v56, %v5396_v59 }
 0x10c   : > { %v1358_v2 = vrot.slane %v5489_v30, %v5396_v59  ;;  %4797 = vmatprep.mubr.bf16.mxu0 %v4915_v57  ;;  %v4504_v3 = vpack.c.bf16 %v1165_v58, %v1164_v48  ;;  %v1167_v4 = vmul.f32 %v1139_v60, %v5508_v53  ;;  %v1228_v6 = vcombine.high %v1220_v62, %v1220_v62 }
 0x10d   : > { %v1236_v7 = vrot.slane %v1220_v62, %v5396_v59  ;;  %4595 = vst [vmem:[#allocation2 + $0x78] sm:$0xff] %v4499_v8   ;;  %v1091_v10 = vcombine.high %v1089_v1, %v1089_v1  ;;  %v1105_v11 = vrot.slane %v1089_v1, %v5396_v59  ;;  %v1227_v12 = vrot.slane %v1213_v63, %v5396_v59  ;;  %v1846_v8 = vld [vmem:[%s5300_s25 + $0x1d0] sm:$0xff]  ;;  %v4918_v1 = vld [vmem:[#allocation2 + $0x48] sm:$0xff]  }
 0x10e   : > { %v1366_v13 = vcombine.high %v1358_v2, %v1358_v2  ;;  %4596 = vst [vmem:[#allocation2 + $0x80] sm:$0xff] %v4504_v3   ;;  %v4509_v15 = vpack.c.bf16 %v1167_v4, %v1166_v16  ;;  %v1250_v0 = vrot.slane %v1228_v6, %v5396_v59  ;;  %v1374_v54 = vrot.slane %v1358_v2, %v5396_v59  ;;  %v1847_v16 = vld [vmem:[%s5300_s25 + $0x1d8] sm:$0xff] }
 0x10f   : > { %v1265_v17 = vrot.slane %v1236_v7, %v5411_v5  ;;  %v1258_v18 = vcombine.high %v1236_v7, %v1236_v7  ;;  %v1119_v19 = vrot.slane %v1091_v10, %v5396_v59  ;;  %v1143_v61 = vrot.slane %v1105_v11, %v5411_v5  ;;  %v4919_v7 = vld [vmem:[#allocation2 + $0x50] sm:$0xff]  }
 0x110   : > { %v1121_v25 = vcombine.high %v1105_v11, %v1105_v11  ;;  %v1229_v22 = vcombine.high %v1227_v12, %v1227_v12  ;;  %4597 = vst [vmem:[#allocation2 + $0x88] sm:$0xff] %v4509_v15   ;;  %v1269_v50 = vrot.slane %v1250_v0, %v5411_v5  ;;  %v1260_v27 = vcombine.high %v1250_v0, %v1250_v0 }
 0x111   : > { %v1302_v26 = vmul.f32 %v1265_v17, %v5531_v20  ;;  %v1273_v28 = vrot.slane %v1258_v18, %v5411_v5  ;;  %v1147_v31 = vrot.slane %v1119_v19, %v5411_v5  ;;  %v1168_v21 = vmul.f32 %v1143_v61, %v5508_v53 }
 0x112   : > { %v1123_v32 = vcombine.high %v1119_v19, %v1119_v19  ;;  %v1151_v33 = vrot.slane %v1121_v25, %v5411_v5  ;;  %v1303_v35 = vmul.f32 %v1269_v50, %v5531_v20  ;;  %v1277_v23 = vrot.slane %v1260_v27, %v5411_v5 }
 0x113   : > { %v1304_v36 = vmul.f32 %v1273_v28, %v5531_v20  ;;  %v1243_v37 = vrot.slane %v1227_v12, %v5396_v59  ;;  %4798 = vmatmul.mubr.bf16.gmra.mxu0 %v4916_v29  ;;  %v1169_v24 = vmul.f32 %v1147_v31, %v5508_v53  ;;  %v1257_v40 = vrot.slane %v1229_v22, %v5396_v59 }
 0x114   : > { %v1155_v38 = vrot.slane %v1123_v32, %v5411_v5  ;;  %v1170_v39 = vmul.f32 %v1151_v33, %v5508_v53  ;;  %4801 = vmatprep.mubr.bf16.mxu0 %v4917_v34  ;;  %v4524_v41 = vpack.c.bf16 %v1303_v35, %v1302_v26  ;;  %v1305_v42 = vmul.f32 %v1277_v23, %v5531_v20  ;;  %v1848_v23 = vld [vmem:[%s5300_s25 + $0x1e0] sm:$0xff] }
 0x115   : > { %v1281_v43 = vrot.slane %v1243_v37, %v5411_v5  ;;  %v1259_v44 = vcombine.high %v1243_v37, %v1243_v37  ;;  %v4514_v45 = vpack.c.bf16 %v1169_v24, %v1168_v21  ;;  %v1285_v47 = vrot.slane %v1257_v40, %v5411_v5 }
 0x116   : > { %v1171_v46 = vmul.f32 %v1155_v38, %v5508_v53  ;;  %v1261_v48 = vcombine.high %v1257_v40, %v1257_v40  ;;  %4600 = vst [vmem:[#allocation2 + $0xa0] sm:$0xff] %v4524_v41   ;;  %v4529_v14 = vpack.c.bf16 %v1305_v42, %v1304_v36  ;;  %v1388_v53 = vrot.slane %v1366_v13, %v5396_v59  ;;  %v4920_v40 = vld [vmem:[#allocation2 + $0x58] sm:$0xff]  }
 0x117   : > { %v1306_v51 = vmul.f32 %v1281_v43, %v5531_v20  ;;  %v1289_v52 = vrot.slane %v1259_v44, %v5411_v5  ;;  %4598 = vst [vmem:[#allocation2 + $0x90] sm:$0xff] %v4514_v45   ;;  %v1307_v56 = vmul.f32 %v1285_v47, %v5531_v20  ;;  %v1403_v60 = vrot.slane %v1374_v54, %v5411_v5  ;;  %v1850_v45 = vld [vmem:[%s5300_s25 + $0x1f0] sm:$0xff]  ;;  %v4921_v47 = vld [vmem:[#allocation2 + $0x60] sm:$0xff]  }
 0x118   : > { %v4519_v55 = vpack.c.bf16 %v1171_v46, %v1170_v39  ;;  %v1293_v57 = vrot.slane %v1261_v48, %v5411_v5  ;;  %4601 = vst [vmem:[#allocation2 + $0xa8] sm:$0xff] %v4529_v14   ;;  %v1396_v62 = vcombine.high %v1374_v54, %v1374_v54  ;;  %v1351_v63 = vcombine.high %v5489_v30, %v5489_v30  ;;  %v1849_v39 = vld [vmem:[%s5300_s25 + $0x1e8] sm:$0xff]  ;;  %v1851_v46 = vld [vmem:[%s5300_s25 + $0x1f8] sm:$0xff]  ;;  %s6019_s25 = scalar_lea.vmem [#allocation3], %s6002_s21  ;;  %s5134_s21 = smov [#allocation3]  }
 0x119   : > { %v1308_v58 = vmul.f32 %v1289_v52, %v5531_v20  ;;  %v4534_v2 = vpack.c.bf16 %v1307_v56, %v1306_v51  ;;  %v1407_v4 = vrot.slane %v1388_v53, %v5411_v5  ;;  %v1398_v6 = vcombine.high %v1388_v53, %v1388_v53  ;;  %s4106_s27 = sshll.u32 %s6019_s25, 4  ;;  %s5074_s18 = sshll.u32 %s5134_s21, 4  ;;  %s6760_s27 = int_to_ptr.vmem [resolvable:$true] %s4106_s27  ;;  %s5075_s18 = int_to_ptr.vmem [resolvable:$false] %s5074_s18 }
 0x11a   : > { %4599 = vst [vmem:[#allocation2 + $0x98] sm:$0xff] %v4519_v55   ;;  %v1309_v3 = vmul.f32 %v1293_v57, %v5531_v20  ;;  %v1440_v10 = vmul.f32 %v1403_v60, %v5489_v30  ;;  %v1411_v11 = vrot.slane %v1396_v62, %v5411_v5  ;;  %v1365_v12 = vrot.slane %v1351_v63, %v5396_v59  ;;  %s5070_s17 = scalar_lea.vmem %s6760_s27, 8192  ;;  %s5076_s20 = scalar_lea.vmem %s5075_s18, 16384 }
 0x11b   : > { %v1496_v13 = vrot.slane %v5522_v9, %v5396_v59  ;;  %4802 = vmatmul.mubr.bf16.gmra.mxu0 %v4918_v1  ;;  %4602 = vst [vmem:[#allocation2 + $0xb0] sm:$0xff] %v4534_v2   ;;  %v1441_v0 = vmul.f32 %v1407_v4, %v5489_v30  ;;  %v1415_v20 = vrot.slane %v1398_v6, %v5411_v5  ;;  %p5071_p13 = scmp.ne.s32.totalorder %s6760_s27, %s5070_s17  ;;  %p5077_p2 = scmp.lt.s32.totalorder %s6760_s27, %s5075_s18 }
 0x11c   : > { %v4539_v15 = vpack.c.bf16 %v1309_v3, %v1308_v58  ;;  %v1881_v17 = vpack.c.bf16 %v1847_v16, %v1846_v8  ;;  %4805 = vmatprep.mubr.bf16.mxu0 %v4919_v7  ;;  %v1442_v18 = vmul.f32 %v1411_v11, %v5489_v30  ;;  %v1367_v19 = vcombine.high %v1365_v12, %v1365_v12  ;;  %p5078_p3 = scmp.lt.s32.totalorder %s5076_s20, %s5070_s17 }
 0x11d   : > { %v1381_v61 = vrot.slane %v1365_v12, %v5396_v59  ;;  %v1504_v25 = vcombine.high %v1496_v13, %v1496_v13  ;;  %v4544_v22 = vpack.c.bf16 %v1441_v0, %v1440_v10  ;;  %v1443_v50 = vmul.f32 %v1415_v20, %v5489_v30  ;;  %v4922_v12 = vld [vmem:[#allocation2 + $0x68] sm:$0xff]   ;;  %p5072_p0 = pnand %p5071_p13, %p5230_p5 }
 0x11e   : > { %4603 = vst [vmem:[#allocation2 + $0xb8] sm:$0xff] %v4539_v15   ;;  %v1512_v26 = vrot.slane %v1496_v13, %v5396_v59  ;;  %4762 = vmatmul.mubr.msk.bf16.gmra.mxu1 %vm1885_vm2, %v1881_v17  ;;  %v1489_v27 = vcombine.high %v5522_v9, %v5522_v9  ;;  %v1395_v28 = vrot.slane %v1367_v19, %v5396_v59  ;;  %v4923_v13 = vld [vmem:[#allocation2 + $0x70] sm:$0xff]   ;;  %v4925_v19 = vld [vmem:[#allocation2 + $0x80] sm:$0xff]   ;;  %p5079_p4 = por %p5078_p3, %p5077_p2 }
 0x11f   : > { %v1419_v29 = vrot.slane %v1381_v61, %v5411_v5  ;;  %v1397_v31 = vcombine.high %v1381_v61, %v1381_v61  ;;  %v1526_v21 = vrot.slane %v1504_v25, %v5396_v59  ;;  %4604 = vst [vmem:[#allocation2 + $0xc0] sm:$0xff] %v4544_v22   ;;  %v4549_v32 = vpack.c.bf16 %v1443_v50, %v1442_v18  ;;  %v5656_v18 = vpop.f32.mrf.mxu1  ;;  %v4924_v25 = vld [vmem:[#allocation2 + $0x78] sm:$0xff]   ;;  %p5073_p1 = pneg %p5072_p0 }
 0x120   : > { %v1541_v33 = vrot.slane %v1512_v26, %v5411_v5  ;;  %v1534_v34 = vcombine.high %v1512_v26, %v1512_v26  ;;  %v1503_v35 = vrot.slane %v1489_v27, %v5396_v59  ;;  %v1423_v36 = vrot.slane %v1395_v28, %v5411_v5  ;;  %v4926_v26 = vld [vmem:[#allocation2 + $0x88] sm:$0xff]   ;;  %v4927_v27 = vld [vmem:[#allocation2 + $0x90] sm:$0xff]  }
 0x121   : > { %v1444_v37 = vmul.f32 %v1419_v29, %v5489_v30  ;;  %v1399_v24 = vcombine.high %v1395_v28, %v1395_v28  ;;  %v1427_v38 = vrot.slane %v1397_v31, %v5411_v5  ;;  %4605 = vst [vmem:[#allocation2 + $0xc8] sm:$0xff] %v4549_v32   ;;  %v1545_v41 = vrot.slane %v1526_v21, %v5411_v5  ;;  %v5658_v61 = vpop.f32.mrf.mxu1  ;;  %v4929_v28 = vld [vmem:[#allocation2 + $0xa0] sm:$0xff]   ;;  %v4930_v29 = vld [vmem:[#allocation2 + $0xa8] sm:$0xff]   ;;  %p5080_p7 = pnand %p5079_p4, %p5073_p1 }
 0x122   : > { %v1578_v42 = vmul.f32 %v1541_v33, %v5522_v9  ;;  %v1536_v43 = vcombine.high %v1526_v21, %v1526_v21  ;;  %v1549_v44 = vrot.slane %v1534_v34, %v5411_v5  ;;  %v1445_v48 = vmul.f32 %v1423_v36, %v5489_v30  ;;  %v4931_v31 = vld [vmem:[#allocation2 + $0xb0] sm:$0xff]  }
 0x123   : > { %v1431_v14 = vrot.slane %v1399_v24, %v5411_v5  ;;  %v1446_v51 = vmul.f32 %v1427_v38, %v5489_v30  ;;  %v1505_v52 = vcombine.high %v1503_v35, %v1503_v35  ;;  %4806 = vmatmul.mubr.bf16.gmra.mxu0 %v4920_v40  ;;  %v1579_v54 = vmul.f32 %v1545_v41, %v5522_v9  ;;  %v1705_v22 = vpop.f32.mrf.mxu1 }
 0x124   : > { %v1553_v55 = vrot.slane %v1536_v43, %v5411_v5  ;;  %v1580_v56 = vmul.f32 %v1549_v44, %v5522_v9  ;;  %v1519_v57 = vrot.slane %v1503_v35, %v5396_v59  ;;  %4809 = vmatprep.mubr.bf16.mxu0 %v4921_v47  ;;  %v4554_v53 = vpack.c.bf16 %v1445_v48, %v1444_v37  ;;  %v5663_v43 = vld [vmem:[%s6815_s9] ss:$0 sm:$0xff] }
 0x125   : > { %v1447_v58 = vmul.f32 %v1431_v14, %v5489_v30  ;;  %v1533_v60 = vrot.slane %v1505_v52, %v5396_v59  ;;  %v1882_v62 = vpack.c.bf16 %v1849_v39, %v1848_v23  ;;  %v4564_v63 = vpack.c.bf16 %v1579_v54, %v1578_v42  ;;  %v1706_v50 = vpop.f32.mrf.mxu1  ;;  %v4932_v21 = vld [vmem:[#allocation2 + $0xb8] sm:$0xff]  }
 0x126   : > { %v1581_v8 = vmul.f32 %v1553_v55, %v5522_v9  ;;  %v1557_v16 = vrot.slane %v1519_v57, %v5411_v5  ;;  %v1883_v1 = vpack.c.bf16 %v1851_v46, %v1850_v45  ;;  %4606 = vst [vmem:[#allocation2 + $0xd0] sm:$0xff] %v4554_v53   ;;  %v1535_v4 = vcombine.high %v1519_v57, %v1519_v57  ;;  %v4933_v32 = vld [vmem:[#allocation2 + $0xc0] sm:$0xff]  }
 0x127   : > { %v4559_v2 = vpack.c.bf16 %v1447_v58, %v1446_v51  ;;  %v1561_v3 = vrot.slane %v1533_v60, %v5411_v5  ;;  %4765 = vmatprep.mubr.msk.bf16.mxu1 %vm1885_vm2, %v1882_v62  ;;  %v1537_v6 = vcombine.high %v1533_v60, %v1533_v60  ;;  %4608 = vst [vmem:[#allocation2 + $0xe0] sm:$0xff] %v4564_v63   ;;  %v4707_v38 = vpop.f32.mrf.mxu1 }
 0x128   : > { %v4569_v7 = vpack.c.bf16 %v1581_v8, %v1580_v56  ;;  %v1582_v30 = vmul.f32 %v1557_v16, %v5522_v9  ;;  %4766 = vmatmul.mubr.msk.bf16.gmra.mxu1 %vm1885_vm2, %v1883_v1  ;;  %v1565_v10 = vrot.slane %v1535_v4, %v5411_v5  ;;  %v4934_v33 = vld [vmem:[#allocation2 + $0xc8] sm:$0xff]  }
 0x129   : > { %4607 = vst [vmem:[#allocation2 + $0xd8] sm:$0xff] %v4559_v2   ;;  %v1583_v59 = vmul.f32 %v1561_v3, %v5522_v9  ;;  %v1569_v11 = vrot.slane %v1537_v6, %v5411_v5  ;;  %v2020_v39 = vpop.f32.mrf.mxu1 }
 0x12a   : > { %4609 = vst [vmem:[#allocation2 + $0xe8] sm:$0xff] %v4569_v7   ;;  %v1584_v0 = vmul.f32 %v1565_v10, %v5522_v9 }
 0x12b   : > { %v4574_v15 = vpack.c.bf16 %v1583_v59, %v1582_v30  ;;  %v1585_v20 = vmul.f32 %v1569_v11, %v5522_v9  ;;  %4810 = vmatmul.mubr.bf16.gmra.mxu0 %v4922_v12  ;;  %v4928_v9 = vld [vmem:[#allocation2 + $0x98] sm:$0xff]   ;;  %v4708_v40 = vpop.f32.mrf.mxu1 }
 0x12c   : > { %4813 = vmatprep.mubr.bf16.mxu0 %v4923_v13 }
 0x12d   : > { %4610 = vst [vmem:[#allocation2 + $0xf0] sm:$0xff] %v4574_v15   ;;  %v4579_v17 = vpack.c.bf16 %v1585_v20, %v1584_v0  ;;  %v4935_v34 = vld [vmem:[#allocation2 + $0xd0] sm:$0xff]   ;;  %v2023_v41 = vpop.f32.mrf.mxu1 }
 0x12e   : > { %v4937_v23 = vld [vmem:[#allocation2 + $0xe0] sm:$0xff]  }
 0x12f   : > { %4611 = vst [vmem:[#allocation2 + $0xf8] sm:$0xff] %v4579_v17   ;;  %v4711_v45 = vpop.f32.mrf.mxu1 }
 0x130   : > { %v4936_v35 = vld [vmem:[#allocation2 + $0xd8] sm:$0xff]  }
 0x131   : > { %v4938_v36 = vld [vmem:[#allocation2 + $0xe8] sm:$0xff]   ;;  %v2036_v54 = vpop.f32.mrf.mxu1 }
 0x133   : > { %4814 = vmatmul.mubr.bf16.gmra.mxu0 %v4924_v25  ;;  %v4712_v60 = vpop.f32.mrf.mxu1 }
 0x134   : > { %4817 = vmatprep.mubr.bf16.mxu0 %v4925_v19  ;;  %v4939_v37 = vld [vmem:[#allocation2 + $0xf0] sm:$0xff]  }
 0x135   : > { %v2039_v1 = vpop.f32.mrf.mxu1 }
 0x136   : > { %v4940_v24 = vld [vmem:[#allocation2 + $0xf8] sm:$0xff]  }
 0x137   : > { %v4715_v30 = vpop.f32.mrf.mxu1 }
 0x139   : > { %v2052_v15 = vpop.f32.mrf.mxu1 }
 0x13b   : > { %4818 = vmatmul.mubr.bf16.gmra.mxu0 %v4926_v26  ;;  %v4716_v19 = vpop.f32.mrf.mxu1 }
 0x13c   : > { %4821 = vmatprep.mubr.bf16.mxu0 %v4927_v27 }
 0x13d   : > { %v2055_v50 = vpop.f32.mrf.mxu1 }
 0x143   : > { %4822 = vmatmul.mubr.bf16.gmra.mxu0 %v4928_v9 }
 0x144   : > { %4825 = vmatprep.mubr.bf16.mxu0 %v4929_v28 }
 0x14b   : > { %4826 = vmatmul.mubr.bf16.gmra.mxu0 %v4930_v29 }
 0x14c   : > { %4829 = vmatprep.mubr.bf16.mxu0 %v4931_v31  ;;  %v4719_v31 = vpop.f32.mrf.mxu1 }
 0x153   : > { %4830 = vmatmul.mubr.bf16.gmra.mxu0 %v4932_v21 }
 0x154   : > { %4833 = vmatprep.mubr.bf16.mxu0 %v4933_v32 }
 0x15b   : > { %4834 = vmatmul.mubr.bf16.gmra.mxu0 %v4934_v33 }
 0x15c   : > { %4837 = vmatprep.mubr.bf16.mxu0 %v4935_v34 }
 0x163   : > { %4838 = vmatmul.mubr.bf16.gmra.mxu0 %v4936_v35 }
 0x164   : > { %4841 = vmatprep.mubr.bf16.mxu0 %v4937_v23 }
 0x16b   : > { %4842 = vmatmul.mubr.bf16.gmra.mxu0 %v4938_v36  ;;  %v2068_v36 = vpop.f32.mrf.mxu1 }
 0x16c   : > { %4845 = vmatprep.mubr.bf16.mxu0 %v4939_v37 }
 0x173   : > { %4846 = vmatmul.mubr.bf16.gmra.mxu0 %v4940_v24 }
 0x1ba   : > { %v4787_v42 = vpop.f32.mrf.mxu0 }
 0x1bb   : > { %v2558_v44 = vadd.f32 %v4787_v42, %v4707_v38 }
 0x1bc   : > { %v2549_v46 = vpop.f32.mrf.mxu0 }
 0x1bd   : > { %v5666_v47 = vadd.f32 %v5663_v43, %v2558_v44  ;;  %v2550_v48 = vadd.f32 %v2549_v46, %v2020_v39  ;;  %v4720_v39 = vpop.f32.mrf.mxu1 }
 0x1be   : > { %v4788_v14 = vpop.f32.mrf.mxu0 }
 0x1bf   : > { %v5669_v51 = vadd.f32 %v5663_v43, %v2550_v48  ;;  %v2561_v52 = vadd.f32 %v4788_v14, %v4708_v40  ;;  %2879 = vadd.xlane.f32.xlu1 %v5666_v47  ;;  %v3070_v58 = vmul.f32 %v5666_v47, %v5666_v47  ;;  %v2071_v42 = vpop.f32.mrf.mxu1 }
 0x1c0   : > { %v2552_v55 = vpop.f32.mrf.mxu0 }
 0x1c1   : > { %v5673_v56 = vadd.f32 %v5663_v43, %v2561_v52  ;;  %v2553_v57 = vadd.f32 %v2552_v55, %v2023_v41  ;;  %2875 = vadd.xlane.f32.xlu0 %v5669_v51  ;;  %v3068_v2 = vmul.f32 %v5669_v51, %v5669_v51  ;;  %v4723_v52 = vpop.f32.mrf.mxu1 }
 0x1c2   : > { %v4791_v53 = vpop.f32.mrf.mxu0 }
 0x1c3   : > { %2881 = vadd.xlane.f32.xlu1 %v5673_v56  ;;  %v5680_v63 = vadd.f32 %v5663_v43, %v2553_v57  ;;  %v3071_v8 = vmul.f32 %v5673_v56, %v5673_v56  ;;  %v2574_v7 = vadd.f32 %v4791_v53, %v4711_v45 }
 0x1c4   : > { %v2565_v62 = vpop.f32.mrf.mxu0 }
 0x1c5   : > { %3136 = vadd.xlane.f32.xlu0 %v3070_v58  ;;  %v3069_v6 = vmul.f32 %v5680_v63, %v5680_v63  ;;  %v5693_v12 = vadd.f32 %v5663_v43, %v2574_v7  ;;  %v2566_v13 = vadd.f32 %v2565_v62, %v2036_v54  ;;  %v2084_v62 = vpop.f32.mrf.mxu1 }
 0x1c6   : > { %v4792_v16 = vpop.f32.mrf.mxu0 }
 0x1c7   : > { %3138 = vadd.xlane.f32.xlu1 %v3071_v8  ;;  %v2577_v4 = vadd.f32 %v4792_v16, %v4712_v60  ;;  %v5701_v17 = vadd.f32 %v5663_v43, %v2566_v13  ;;  %v3074_v27 = vmul.f32 %v5693_v12, %v5693_v12 }
 0x1c8   : > { %v2568_v3 = vpop.f32.mrf.mxu0 }
 0x1c9   : > { %3132 = vadd.xlane.f32.xlu0 %v3068_v2  ;;  %v5689_v10 = vadd.f32 %v5663_v43, %v2577_v4  ;;  %v2569_v11 = vadd.f32 %v2568_v3, %v2039_v1  ;;  %v3072_v32 = vmul.f32 %v5701_v17, %v5701_v17  ;;  %v4724_v2 = vpop.f32.mrf.mxu1 }
 0x1cb   : > { %v4795_v59 = vpop.f32.mrf.mxu0  ;;  %3134 = vadd.xlane.f32.xlu1 %v3069_v6  ;;  %v5697_v20 = vadd.f32 %v5663_v43, %v2569_v11  ;;  %v3075_v22 = vmul.f32 %v5689_v10, %v5689_v10  ;;  %v2087_v6 = vpop.f32.mrf.mxu1 }
 0x1cc   : > { %v2590_v29 = vadd.f32 %v4795_v59, %v4715_v30 }
 0x1cd   : > { %2877 = vadd.xlane.f32.xlu0 %v5680_v63  ;;  %v2581_v0 = vpop.f32.mrf.mxu0  ;;  %v3073_v28 = vmul.f32 %v5697_v20, %v5697_v20 }
 0x1ce   : > { %v5717_v35 = vadd.f32 %v5663_v43, %v2590_v29  ;;  %v2582_v23 = vadd.f32 %v2581_v0, %v2052_v15  ;;  %v4727_v15 = vpop.f32.mrf.mxu1 }
 0x1cf   : > { %2889 = vadd.xlane.f32.xlu1 %v5689_v10  ;;  %v4796_v25 = vpop.f32.mrf.mxu0 }
 0x1d0   : > { %v2593_v9 = vadd.f32 %v4796_v25, %v4716_v19  ;;  %v5725_v38 = vadd.f32 %v5663_v43, %v2582_v23  ;;  %v3078_v45 = vmul.f32 %v5717_v35, %v5717_v35 }
 0x1d1   : > { %2887 = vadd.xlane.f32.xlu0 %v5693_v12  ;;  %v2584_v26 = vpop.f32.mrf.mxu0 }
 0x1d2   : > { %v5714_v33 = vadd.f32 %v5663_v43, %v2593_v9  ;;  %v2585_v34 = vadd.f32 %v2584_v26, %v2055_v50  ;;  %v3076_v55 = vmul.f32 %v5725_v38, %v5725_v38 }
 0x1d3   : > { %2885 = vadd.xlane.f32.xlu1 %v5697_v20  ;;  %v4799_v21 = vpop.f32.mrf.mxu0 }
 0x1d4   : > { %v5721_v24 = vadd.f32 %v5663_v43, %v2585_v34  ;;  %v3079_v41 = vmul.f32 %v5714_v33, %v5714_v33  ;;  %v2606_v14 = vadd.f32 %v4799_v21, %v4719_v31 }
 0x1d5   : > { %2883 = vadd.xlane.f32.xlu0 %v5701_v17  ;;  %v2597_v37 = vpop.f32.mrf.mxu0 }
 0x1d6   : > { %v3077_v48 = vmul.f32 %v5721_v24, %v5721_v24  ;;  %v5741_v58 = vadd.f32 %v5663_v43, %v2606_v14  ;;  %v2598_v60 = vadd.f32 %v2597_v37, %v2068_v36 }
 0x1d7   : > { %3146 = vadd.xlane.f32.xlu1 %v3075_v22  ;;  %v4800_v40 = vpop.f32.mrf.mxu0 }
 0x1d8   : > { %v2609_v46 = vadd.f32 %v4800_v40, %v4720_v39  ;;  %v5749_v1 = vadd.f32 %v5663_v43, %v2598_v60  ;;  %v3082_v30 = vmul.f32 %v5741_v58, %v5741_v58 }
 0x1d9   : > { %3144 = vadd.xlane.f32.xlu0 %v3074_v27  ;;  %v2600_v44 = vpop.f32.mrf.mxu0  ;;  %v2100_v27 = vpop.f32.mrf.mxu1 }
 0x1da   : > { %v5738_v57 = vadd.f32 %v5663_v43, %v2609_v46  ;;  %v2601_v53 = vadd.f32 %v2600_v44, %v2071_v42  ;;  %v3080_v19 = vmul.f32 %v5749_v1, %v5749_v1 }
 0x1db   : > { %3142 = vadd.xlane.f32.xlu1 %v3073_v28  ;;  %v4803_v54 = vpop.f32.mrf.mxu0  ;;  %v4728_v31 = vpop.f32.mrf.mxu1 }
 0x1dc   : > { %v5745_v16 = vadd.f32 %v5663_v43, %v2601_v53  ;;  %v3083_v4 = vmul.f32 %v5738_v57, %v5738_v57  ;;  %v2622_v13 = vadd.f32 %v4803_v54, %v4723_v52 }
 0x1dd   : > { %3140 = vadd.xlane.f32.xlu0 %v3072_v32  ;;  %v2613_v8 = vpop.f32.mrf.mxu0  ;;  %v2103_v34 = vpop.f32.mrf.mxu1 }
 0x1de   : > { %v3081_v11 = vmul.f32 %v5745_v16, %v5745_v16  ;;  %v5765_v50 = vadd.f32 %v5663_v43, %v2622_v13  ;;  %v2614_v26 = vadd.f32 %v2613_v8, %v2084_v62 }
 0x1df   : > { %2897 = vadd.xlane.f32.xlu1 %v5714_v33  ;;  %v4804_v3 = vpop.f32.mrf.mxu0 }
 0x1e0   : > { %v2625_v59 = vadd.f32 %v4804_v3, %v4724_v2  ;;  %v5773_v29 = vadd.f32 %v5663_v43, %v2614_v26  ;;  %v3086_v36 = vmul.f32 %v5765_v50, %v5765_v50 }
 0x1e1   : > { %2895 = vadd.xlane.f32.xlu0 %v5717_v35  ;;  %v2616_v7 = vpop.f32.mrf.mxu0 }
 0x1e2   : > { %v5762_v25 = vadd.f32 %v5663_v43, %v2625_v59  ;;  %v2617_v22 = vadd.f32 %v2616_v7, %v2087_v6  ;;  %v3084_v44 = vmul.f32 %v5773_v29, %v5773_v29 }
 0x1e3   : > { %2893 = vadd.xlane.f32.xlu1 %v5721_v24  ;;  %v4807_v0 = vpop.f32.mrf.mxu0 }
 0x1e4   : > { %v5769_v28 = vadd.f32 %v5663_v43, %v2617_v22  ;;  %v3087_v32 = vmul.f32 %v5762_v25, %v5762_v25  ;;  %v2638_v40 = vadd.f32 %v4807_v0, %v4727_v15 }
 0x1e5   : > { %2891 = vadd.xlane.f32.xlu0 %v5725_v38  ;;  %v2629_v9 = vpop.f32.mrf.mxu0 }
 0x1e6   : > { %v3085_v39 = vmul.f32 %v5769_v28, %v5769_v28  ;;  %v2630_v14 = vadd.f32 %v2629_v9, %v2100_v27 }
 0x1e7   : > { %3154 = vadd.xlane.f32.xlu1 %v3079_v41  ;;  %v4808_v21 = vpop.f32.mrf.mxu0  ;;  %v4731_v41 = vpop.f32.mrf.mxu1 }
 0x1e8   : > { %v2641_v37 = vadd.f32 %v4808_v21, %v4728_v31  ;;  %v5797_v53 = vadd.f32 %v5663_v43, %v2630_v14 }
 0x1e9   : > { %3152 = vadd.xlane.f32.xlu0 %v3078_v45  ;;  %v2632_v23 = vpop.f32.mrf.mxu0  ;;  %v2116_v52 = vpop.f32.mrf.mxu1 }
 0x1ea   : > { %v5786_v45 = vadd.f32 %v5663_v43, %v2641_v37  ;;  %v2633_v46 = vadd.f32 %v2632_v23, %v2103_v34  ;;  %6841 = vst [vmem:[#allocation7_spill] sm:$0xff] %v5797_v53  ;;  %v3088_v13 = vmul.f32 %v5797_v53, %v5797_v53 }
 0x1eb   : > { %3150 = vadd.xlane.f32.xlu1 %v3077_v48  ;;  %v4811_v42 = vpop.f32.mrf.mxu0  ;;  %v5789_v48 = vadd.f32 %v5663_v43, %v2638_v40  ;;  %v4732_v60 = vpop.f32.mrf.mxu1 }
 0x1ec   : > { %v3091_v8 = vmul.f32 %v5786_v45, %v5786_v45 }
 0x1ed   : > { %3148 = vadd.xlane.f32.xlu0 %v3076_v55  ;;  %v2645_v54 = vpop.f32.mrf.mxu0  ;;  %v5793_v55 = vadd.f32 %v5663_v43, %v2633_v46  ;;  %v2119_v2 = vpop.f32.mrf.mxu1 }
 0x1ee   : > { %v2646_v22 = vadd.f32 %v2645_v54, %v2116_v52 }
 0x1ef   : > { %2905 = vadd.xlane.f32.xlu1 %v5738_v57  ;;  %6840 = vst [vmem:[#allocation6_spill] sm:$0xff] %v5793_v55  ;;  %v4812_v62 = vpop.f32.mrf.mxu0  ;;  %v3089_v7 = vmul.f32 %v5793_v55, %v5793_v55  ;;  %v4735_v59 = vpop.f32.mrf.mxu1 }
 0x1f0   : > { %v2657_v6 = vadd.f32 %v4812_v62, %v4732_v60  ;;  %v5821_v31 = vadd.f32 %v5663_v43, %v2646_v22 }
 0x1f1   : > { %2903 = vadd.xlane.f32.xlu0 %v5741_v58  ;;  %v2648_v3 = vpop.f32.mrf.mxu0  ;;  %v2132_v26 = vpop.f32.mrf.mxu1 }
 0x1f2   : > { %v5810_v15 = vadd.f32 %v5663_v43, %v2657_v6  ;;  %v2649_v0 = vadd.f32 %v2648_v3, %v2119_v2  ;;  %6845 = vst [vmem:[#allocation11_spill] sm:$0xff] %v5821_v31  ;;  %v3092_v46 = vmul.f32 %v5821_v31, %v5821_v31 }
 0x1f3   : > { %2901 = vadd.xlane.f32.xlu1 %v5745_v16  ;;  %v4736_v21 = vpop.f32.mrf.mxu1 }
 0x1f4   : > { %6842 = vst [vmem:[#allocation8_spill] sm:$0xff] %v5810_v15  ;;  %v5817_v9 = vadd.f32 %v5663_v43, %v2649_v0  ;;  %v3095_v34 = vmul.f32 %v5810_v15, %v5810_v15 }
 0x1f5   : > { %2899 = vadd.xlane.f32.xlu0 %v5749_v1  ;;  %v2135_v23 = vpop.f32.mrf.mxu1 }
 0x1f6   : > { %6844 = vst [vmem:[#allocation10_spill] sm:$0xff] %v5817_v9  ;;  %v3093_v40 = vmul.f32 %v5817_v9, %v5817_v9 }
 0x1f7   : > { %3162 = vadd.xlane.f32.xlu1 %v3083_v4  ;;  %v3090_v4 = vmul.f32 %v5789_v48, %v5789_v48 }
 0x1f9   : > { %3160 = vadd.xlane.f32.xlu0 %v3082_v30  ;;  %v2654_v30 = vadd.f32 %v4811_v42, %v4731_v41  ;;  %v4739_v42 = vpop.f32.mrf.mxu1 }
 0x1fb   : > { %3158 = vadd.xlane.f32.xlu1 %v3081_v11  ;;  %v4815_v11 = vpop.f32.mrf.mxu0  ;;  %v2148_v62 = vpop.f32.mrf.mxu1 }
 0x1fc   : > { %v2670_v41 = vadd.f32 %v4815_v11, %v4735_v59 }
 0x1fd   : > { %3156 = vadd.xlane.f32.xlu0 %v3080_v19  ;;  %v5813_v19 = vadd.f32 %v5663_v43, %v2654_v30  ;;  %v2661_v27 = vpop.f32.mrf.mxu0 }
 0x1fe   : > { %v5837_v54 = vadd.f32 %v5663_v43, %v2670_v41  ;;  %v2662_v60 = vadd.f32 %v2661_v27, %v2132_v26 }
 0x1ff   : > { %2913 = vadd.xlane.f32.xlu1 %v5762_v25  ;;  %6843 = vst [vmem:[#allocation9_spill] sm:$0xff] %v5813_v19  ;;  %v3094_v37 = vmul.f32 %v5813_v19, %v5813_v19 }
 0x200   : > { %6847 = vst [vmem:[#allocation13_spill] sm:$0xff] %v5837_v54  ;;  %v5845_v3 = vadd.f32 %v5663_v43, %v2662_v60  ;;  %v3098_v11 = vmul.f32 %v5837_v54, %v5837_v54 }
 0x201   : > { %2911 = vadd.xlane.f32.xlu0 %v5765_v50 }
 0x202   : > { %6849 = vst [vmem:[#allocation15_spill] sm:$0xff] %v5845_v3 }
 0x203   : > { %2909 = vadd.xlane.f32.xlu1 %v5769_v28 }
 0x205   : > { %2907 = vadd.xlane.f32.xlu0 %v5773_v29 }
 0x207   : > { %3170 = vadd.xlane.f32.xlu1 %v3087_v32  ;;  %v4816_v32 = vpop.f32.mrf.mxu0 }
 0x209   : > { %3168 = vadd.xlane.f32.xlu0 %v3086_v36  ;;  %v2664_v36 = vpop.f32.mrf.mxu0 }
 0x20a   : > { %v2665_v52 = vadd.f32 %v2664_v36, %v2135_v23 }
 0x20b   : > { %3166 = vadd.xlane.f32.xlu1 %v3085_v39  ;;  %v2673_v39 = vadd.f32 %v4816_v32, %v4736_v21  ;;  %v3096_v21 = vmul.f32 %v5845_v3, %v5845_v3 }
 0x20c   : > { %v5841_v2 = vadd.f32 %v5663_v43, %v2665_v52 }
 0x20d   : > { %3164 = vadd.xlane.f32.xlu0 %v3084_v44  ;;  %v4819_v44 = vpop.f32.mrf.mxu0  ;;  %v5834_v14 = vadd.f32 %v5663_v43, %v2673_v39 }
 0x20e   : > { %6848 = vst [vmem:[#allocation14_spill] sm:$0xff] %v5841_v2  ;;  %v3097_v0 = vmul.f32 %v5841_v2, %v5841_v2  ;;  %v2686_v22 = vadd.f32 %v4819_v44, %v4739_v42 }
 0x20f   : > { %2921 = vadd.xlane.f32.xlu1 %v5786_v45  ;;  %6846 = vst [vmem:[#allocation12_spill] sm:$0xff] %v5834_v14 }
 0x210   : > { %v5861_v23 = vadd.f32 %v5663_v43, %v2686_v22 }
 0x211   : > { %2919 = vadd.xlane.f32.xlu0 %v5789_v48 }
 0x212   : > { %6851 = vst [vmem:[#allocation17_spill] sm:$0xff] %v5861_v23 }
 0x213   : > { %2917 = vadd.xlane.f32.xlu1 %v5793_v55 }
 0x215   : > { %2915 = vadd.xlane.f32.xlu0 %v5797_v53 }
 0x217   : > { %3178 = vadd.xlane.f32.xlu1 %v3091_v8  ;;  %v2677_v8 = vpop.f32.mrf.mxu0 }
 0x218   : > { %v2678_v36 = vadd.f32 %v2677_v8, %v2148_v62  ;;  %v3102_v62 = vmul.f32 %v5861_v23, %v5861_v23 }
 0x219   : > { %3176 = vadd.xlane.f32.xlu0 %v3090_v4  ;;  %v4740_v4 = vpop.f32.mrf.mxu1  ;;  %v4820_v6 = vpop.f32.mrf.mxu0 }
 0x21a   : > { %v5869_v41 = vadd.f32 %v5663_v43, %v2678_v36 }
 0x21b   : > { %3174 = vadd.xlane.f32.xlu1 %v3089_v7  ;;  %v3099_v7 = vmul.f32 %v5834_v14, %v5834_v14  ;;  %v2151_v30 = vpop.f32.mrf.mxu1  ;;  %v2680_v59 = vpop.f32.mrf.mxu0 }
 0x21c   : > { %6853 = vst [vmem:[#allocation19_spill] sm:$0xff] %v5869_v41 }
 0x21d   : > { %3172 = vadd.xlane.f32.xlu0 %v3088_v13  ;;  %v2689_v13 = vadd.f32 %v4820_v6, %v4740_v4  ;;  %v4743_v26 = vpop.f32.mrf.mxu1  ;;  %v4823_v27 = vpop.f32.mrf.mxu0 }
 0x21f   : > { %2929 = vadd.xlane.f32.xlu1 %v5810_v15  ;;  %v5858_v32 = vadd.f32 %v5663_v43, %v2689_v13  ;;  %v2693_v39 = vpop.f32.mrf.mxu0 }
 0x221   : > { %2927 = vadd.xlane.f32.xlu0 %v5813_v19  ;;  %6850 = vst [vmem:[#allocation16_spill] sm:$0xff] %v5858_v32  ;;  %v4824_v44 = vpop.f32.mrf.mxu0 }
 0x223   : > { %2925 = vadd.xlane.f32.xlu1 %v5817_v9  ;;  %v2696_v60 = vpop.f32.mrf.mxu0 }
 0x225   : > { %2923 = vadd.xlane.f32.xlu0 %v5821_v31 }
 0x227   : > { %3186 = vadd.xlane.f32.xlu1 %v3095_v34  ;;  %v2681_v34 = vadd.f32 %v2680_v59, %v2151_v30  ;;  %v2702_v30 = vadd.f32 %v4823_v27, %v4743_v26 }
 0x229   : > { %3184 = vadd.xlane.f32.xlu0 %v3094_v37  ;;  %v2164_v37 = vpop.f32.mrf.mxu1  ;;  %v5889_v26 = vadd.f32 %v5663_v43, %v2702_v30 }
 0x22b   : > { %3182 = vadd.xlane.f32.xlu1 %v3093_v40  ;;  %v5865_v40 = vadd.f32 %v5663_v43, %v2681_v34  ;;  %v4744_v42 = vpop.f32.mrf.mxu1  ;;  %6855 = vst [vmem:[#allocation21_spill] sm:$0xff] %v5889_v26 }
 0x22c   : > { %v2705_v4 = vadd.f32 %v4824_v44, %v4744_v42  ;;  %v2694_v42 = vadd.f32 %v2693_v39, %v2164_v37 }
 0x22d   : > { %3180 = vadd.xlane.f32.xlu0 %v3092_v46  ;;  %6852 = vst [vmem:[#allocation18_spill] sm:$0xff] %v5865_v40  ;;  %v3103_v46 = vmul.f32 %v5858_v32, %v5858_v32  ;;  %v2167_v52 = vpop.f32.mrf.mxu1  ;;  %v3101_v6 = vmul.f32 %v5865_v40, %v5865_v40 }
 0x22e   : > { %v2697_v34 = vadd.f32 %v2696_v60, %v2167_v52  ;;  %v5907_v30 = vadd.f32 %v5663_v43, %v2694_v42 }
 0x22f   : > { %2937 = vadd.xlane.f32.xlu1 %v5834_v14  ;;  %v4747_v59 = vpop.f32.mrf.mxu1 }
 0x230   : > { %v5901_v60 = vadd.f32 %v5663_v43, %v2697_v34  ;;  %6857 = vst [vmem:[#allocation23_spill] sm:$0xff] %v5907_v30 }
 0x231   : > { %2935 = vadd.xlane.f32.xlu0 %v5837_v54  ;;  %v5891_v27 = vpop.f32.mrf.mxu1 }
 0x232   : > { %6856 = vst [vmem:[#allocation22_spill] sm:$0xff] %v5901_v60 }
 0x233   : > { %2933 = vadd.xlane.f32.xlu1 %v5841_v2  ;;  %v3105_v2 = vmul.f32 %v5901_v60, %v5901_v60 }
 0x235   : > { %2931 = vadd.xlane.f32.xlu0 %v5845_v3 }
 0x237   : > { %3194 = vadd.xlane.f32.xlu1 %v3099_v7 }
 0x239   : > { %3192 = vadd.xlane.f32.xlu0 %v3098_v11  ;;  %v4827_v11 = vpop.f32.mrf.mxu0 }
 0x23b   : > { %3190 = vadd.xlane.f32.xlu1 %v3097_v0  ;;  %v3100_v0 = vmul.f32 %v5869_v41, %v5869_v41 }
 0x23d   : > { %3188 = vadd.xlane.f32.xlu0 %v3096_v21  ;;  %v5884_v21 = vadd.f32 %v5663_v43, %v2705_v4 }
 0x23f   : > { %2945 = vadd.xlane.f32.xlu1 %v5858_v32  ;;  %6854 = vst [vmem:[#allocation20_spill] sm:$0xff] %v5884_v21  ;;  %v3107_v42 = vmul.f32 %v5884_v21, %v5884_v21 }
 0x241   : > { %2943 = vadd.xlane.f32.xlu0 %v5861_v23 }
 0x243   : > { %2941 = vadd.xlane.f32.xlu1 %v5865_v40 }
 0x245   : > { %2939 = vadd.xlane.f32.xlu0 %v5869_v41 }
 0x247   : > { %3202 = vadd.xlane.f32.xlu1 %v3103_v46  ;;  %v5893_v46 = vpop.f32.mrf.mxu0 }
 0x248   : > { %v2880_v8 = vpop.xlane.xlu1 %2879 }
 0x249   : > { %3200 = vadd.xlane.f32.xlu0 %v3102_v62  ;;  %v5879_v13 = vmul.f32 0.0078125, %v2880_v8 }
 0x24a   : > { %v2876_v7 = vpop.xlane.xlu0 %2875 }
 0x24b   : > { %3198 = vadd.xlane.f32.xlu1 %v3101_v6  ;;  %v3326_v62 = vmul.f32 %v5879_v13, %v5879_v13  ;;  %v5897_v8 = vmul.f32 0.0078125, %v2876_v7  ;;  %v4748_v7 = vpop.f32.mrf.mxu1 }
 0x24c   : > { %v2882_v22 = vpop.xlane.xlu1 %2881 }
 0x24d   : > { %v5886_v36 = vmul.f32 0.0078125, %v2882_v22  ;;  %3196 = vadd.xlane.f32.xlu0 %v3100_v0  ;;  %v4828_v22 = vpop.f32.mrf.mxu0 }
 0x24e   : > { %v3137_v44 = vpop.xlane.xlu0 %3136 }
 0x24f   : > { %v3262_v4 = vmul.f32 0.0078125, %v3137_v44  ;;  %2953 = vadd.xlane.f32.xlu1 %v5884_v21  ;;  %v3327_v37 = vmul.f32 %v5886_v36, %v5886_v36  ;;  %v3324_v44 = vmul.f32 %v5897_v8, %v5897_v8 }
 0x250   : > { %v3139_v52 = vpop.xlane.xlu1 %3138 }
 0x251   : > { %v3390_v39 = vsub.f32 %v3262_v4, %v3326_v62  ;;  %v3263_v6 = vmul.f32 0.0078125, %v3139_v52  ;;  %2951 = vadd.xlane.f32.xlu0 %v5889_v26  ;;  %v5916_v52 = vsub.s32 1, %v5383_v49 }
 0x252   : > { %v3133_v0 = vpop.xlane.xlu0 %3132 }
 0x253   : > { %v3454_v41 = vmax.f32 %v3390_v39, 0.0  ;;  %v3391_v40 = vsub.f32 %v3263_v6, %v3327_v37  ;;  %v3260_v34 = vmul.f32 0.0078125, %v3133_v0  ;;  %2949 = vadd.xlane.f32.xlu1 %v5901_v60  ;;  %v3106_v39 = vmul.f32 %v5889_v26, %v5889_v26  ;;  %v1632_v37 = vld [vmem:[%s6812_s6] sm:$0x3]  ;;  %v2183_v6 = vpop.f32.mrf.mxu1 }
 0x254   : > { %v3135_v23 = vpop.xlane.xlu1 %3134  ;;  %v1637_v31 = vrot.slane %v1632_v37, %v5411_v5 }
 0x255   : > { %v3582_v32 = vadd.f32 1e-05, %v3454_v41  ;;  %v3455_v62 = vmax.f32 %v3391_v40, 0.0  ;;  %v3388_v4 = vsub.f32 %v3260_v34, %v3324_v44  ;;  %2947 = vadd.xlane.f32.xlu0 %v5907_v30  ;;  %v2712_v41 = vpop.f32.mrf.mxu0  ;;  %v2721_v34 = vadd.f32 %v4828_v22, %v4748_v7 }
 0x256   : > { %v2878_v3 = vpop.xlane.xlu0 %2877  ;;  %v3261_v26 = vmul.f32 0.0078125, %v3135_v23  ;;  %v3104_v23 = vmul.f32 %v5907_v30, %v5907_v30 }
 0x257   : > { %4941 = vrsqrt.f32 %v3582_v32  ;;  %v3583_v40 = vadd.f32 1e-05, %v3455_v62  ;;  %v3452_v0 = vmax.f32 %v3388_v4, 0.0  ;;  %v5923_v44 = vmul.f32 0.0078125, %v2878_v3  ;;  %3210 = vadd.xlane.f32.xlu1 %v3107_v42  ;;  %v5931_v4 = vpop.f32.mrf.mxu1  ;;  %v5933_v7 = vpop.f32.mrf.mxu0 }
 0x258   : > { %v2890_v21 = vpop.xlane.xlu1 %2889  ;;  %v1641_v32 = vrot.slane %v1632_v37, %v5916_v52  ;;  %v2718_v3 = vadd.f32 %v4827_v11, %v4747_v59  ;;  %v5943_v59 = vadd.f32 %v5656_v18, %v1637_v31 }
 0x259   : > { %4943 = vrsqrt.f32 %v3583_v40  ;;  %v3580_v54 = vadd.f32 1e-05, %v3452_v0  ;;  %v3325_v14 = vmul.f32 %v5923_v44, %v5923_v44  ;;  %3208 = vadd.xlane.f32.xlu0 %v3106_v39  ;;  %v5938_v40 = vadd.f32 %v5663_v43, %v2721_v34  ;;  %v5955_v37 = vpop.f32.mrf.mxu0 }
 0x25a   : > { %v2888_v62 = vpop.xlane.xlu0 %2887  ;;  %v2713_v39 = vadd.f32 %v2712_v41, %v2183_v6  ;;  %v5940_v60 = vmul.f32 0.0078125, %v2890_v21  ;;  %v5946_v11 = vadd.f32 %v5658_v61, %v1641_v32 }
 0x25b   : > { %4945 = vrsqrt.f32 %v3580_v54  ;;  %v3389_v22 = vsub.f32 %v3261_v26, %v3325_v14  ;;  %3206 = vadd.xlane.f32.xlu1 %v3105_v2  ;;  %6858 = vst [vmem:[#allocation24_spill] sm:$0xff] %v5938_v40  ;;  %v2710_v14 = vadd.f32 %v5893_v46, %v5891_v27  ;;  %v5951_v2 = vadd.f32 %v5663_v43, %v2718_v3  ;;  %v5953_v26 = vpop.f32.mrf.mxu1 }
 0x25c   : > { %v2886_v42 = vpop.xlane.xlu1 %2885  ;;  %v5957_v6 = vmul.f32 0.0078125, %v2888_v62  ;;  %v5961_v61 = vadd.f32 %v5663_v43, %v2713_v39  ;;  %v3331_v31 = vmul.f32 %v5940_v60, %v5940_v60  ;;  %v5968_v46 = vrot.slane %v5943_v59, %v5411_v5 }
 0x25d   : > { %v3453_v0 = vmax.f32 %v3389_v22, 0.0  ;;  %3204 = vadd.xlane.f32.xlu0 %v3104_v23  ;;  %6859 = vst [vmem:[#allocation25_spill] sm:$0xff] %v5951_v2  ;;  %v5972_v41 = vrot.slane %v5946_v11, %v5411_v5  ;;  %v5975_v34 = vadd.f32 %v5663_v43, %v2710_v14  ;;  %v5977_v32 = vmul.f32 0.0078125, %v2886_v42  ;;  %v4752_v3 = vpop.f32.mrf.mxu1  ;;  %v4832_v22 = vpop.f32.mrf.mxu0 }
 0x25e   : > { %v2884_v54 = vpop.xlane.xlu0 %2883  ;;  %v3518_v23 = vsub.f32 %v5666_v47, %v5879_v13  ;;  %v3330_v39 = vmul.f32 %v5957_v6, %v5957_v6  ;;  %v3519_v14 = vsub.f32 %v5673_v56, %v5886_v36  ;;  %v3111_v30 = vmul.f32 %v5938_v40, %v5938_v40 }
 0x25f   : > { %v3581_v21 = vadd.f32 1e-05, %v3453_v0  ;;  %2961 = vadd.xlane.f32.xlu1 %v5938_v40  ;;  %6860 = vst [vmem:[#allocation26_spill] sm:$0xff] %v5975_v34  ;;  %v5987_v42 = vmul.f32 0.0078125, %v2884_v54  ;;  %v3110_v47 = vmul.f32 %v5951_v2, %v5951_v2  ;;  %v2737_v19 = vadd.f32 %v4832_v22, %v4752_v3  ;;  %v2199_v15 = vpop.f32.mrf.mxu1 }
 0x260   : > { %v3147_v18 = vpop.xlane.xlu1 %3146  ;;  %v3516_v56 = vsub.f32 %v5669_v51, %v5897_v8  ;;  %v3329_v36 = vmul.f32 %v5977_v32, %v5977_v32  ;;  %v3108_v40 = vmul.f32 %v5975_v34, %v5975_v34 }
 0x261   : > { %4947 = vrsqrt.f32 %v3581_v21  ;;  %v3267_v27 = vmul.f32 0.0078125, %v3147_v18  ;;  %2959 = vadd.xlane.f32.xlu0 %v5951_v2  ;;  %v2728_v2 = vpop.f32.mrf.mxu0  ;;  %v3328_v51 = vmul.f32 %v5987_v42, %v5987_v42 }
 0x262   : > { %v3145_v62 = vpop.xlane.xlu0 %3144 }
 0x263   : > { %v3395_v0 = vsub.f32 %v3267_v27, %v3331_v31  ;;  %v3266_v21 = vmul.f32 0.0078125, %v3145_v62  ;;  %2957 = vadd.xlane.f32.xlu1 %v5961_v61 }
 0x264   : > { %v4942_v5 = vpop.eup %4941  ;;  %v3143_v18 = vpop.xlane.xlu1 %3142 }
 0x265   : > { %v3710_v13 = vmul.f32 %v4942_v5, %v3518_v23  ;;  %v3459_v31 = vmax.f32 %v3395_v0, 0.0  ;;  %v3394_v27 = vsub.f32 %v3266_v21, %v3330_v39  ;;  %v3265_v62 = vmul.f32 0.0078125, %v3143_v18  ;;  %2955 = vadd.xlane.f32.xlu0 %v5975_v34 }
 0x266   : > { %v4944_v9 = vpop.eup %4943  ;;  %v3141_v54 = vpop.xlane.xlu0 %3140  ;;  %v3109_v18 = vmul.f32 %v5961_v61, %v5961_v61 }
 0x267   : > { %v3778_v23 = vmul.f32 %v5968_v46, %v3710_v13  ;;  %v3711_v39 = vmul.f32 %v4944_v9, %v3519_v14  ;;  %v3587_v0 = vadd.f32 1e-05, %v3459_v31  ;;  %v3458_v3 = vmax.f32 %v3394_v27, 0.0  ;;  %3218 = vadd.xlane.f32.xlu1 %v3111_v30 }
 0x268   : > { %v4946_v22 = vpop.eup %4945  ;;  %v3393_v8 = vsub.f32 %v3265_v62, %v3329_v36  ;;  %v3264_v21 = vmul.f32 0.0078125, %v3141_v54  ;;  %v2898_v5 = vpop.xlane.xlu1 %2897  ;;  %v2734_v9 = vadd.f32 %v5933_v7, %v5931_v4  ;;  %v6014_v27 = vadd.f32 %v5663_v43, %v2737_v19 }
 0x269   : > { %v3790_v34 = vadd.f32 %v5972_v41, %v3778_v23  ;;  %v3779_v53 = vmul.f32 %v5968_v46, %v3711_v39  ;;  %v3708_v55 = vmul.f32 %v4946_v22, %v3516_v56  ;;  %4949 = vrsqrt.f32 %v3587_v0  ;;  %3216 = vadd.xlane.f32.xlu0 %v3110_v47  ;;  %v4755_v62 = vpop.f32.mrf.mxu1  ;;  %v4835_v36 = vpop.f32.mrf.mxu0 }
 0x26a   : > { %v3586_v30 = vadd.f32 1e-05, %v3458_v3  ;;  %v3457_v14 = vmax.f32 %v3393_v8, 0.0  ;;  %v3392_v13 = vsub.f32 %v3264_v21, %v3328_v51  ;;  %v2896_v31 = vpop.xlane.xlu0 %2895  ;;  %v2729_v47 = vadd.f32 %v2728_v2, %v2199_v15 }
 0x26b   : > { %v3798_v54 = vmax.f32 %v3790_v34, 0.0  ;;  %v3791_v23 = vadd.f32 %v5972_v41, %v3779_v53  ;;  %v3776_v56 = vmul.f32 %v5968_v46, %v3708_v55  ;;  %3214 = vadd.xlane.f32.xlu1 %v3109_v18  ;;  %v3517_v34 = vsub.f32 %v5680_v63, %v5923_v44  ;;  %v2212_v51 = vpop.f32.mrf.mxu1  ;;  %v2741_v8 = vpop.f32.mrf.mxu0 }
 0x26c   : > { %4951 = vrsqrt.f32 %v3586_v30  ;;  %v3585_v39 = vadd.f32 1e-05, %v3457_v14  ;;  %v3456_v4 = vmax.f32 %v3392_v13, 0.0  ;;  %v2894_v7 = vpop.xlane.xlu1 %2893  ;;  %v6025_v53 = vmul.f32 0.0078125, %v2898_v5 }
 0x26d   : > { %3806 = vst [vmem:[%s6019_s25 + $0x10] sm:$0xff] %v3798_v54  ;;  %v3799_v19 = vmax.f32 %v3791_v23, 0.0  ;;  %v3788_v0 = vadd.f32 %v5972_v41, %v3776_v56  ;;  %3212 = vadd.xlane.f32.xlu0 %v3108_v40  ;;  %v2726_v15 = vadd.f32 %v5955_v37, %v5953_v26  ;;  %v6030_v22 = vadd.f32 %v5663_v43, %v2734_v9  ;;  %v4756_v13 = vpop.f32.mrf.mxu1 }
 0x26e   : > { %v4948_v55 = vpop.eup %4947  ;;  %4953 = vrsqrt.f32 %v3585_v39  ;;  %v3584_v2 = vadd.f32 1e-05, %v3456_v4  ;;  %v2892_v3 = vpop.xlane.xlu0 %2891  ;;  %v6033_v63 = vmul.f32 0.0078125, %v2896_v31  ;;  %v6036_v44 = vmul.f32 0.0078125, %v2894_v7 }
 0x26f   : > { %3807 = vst [vmem:[%s6019_s25 + $0x18] sm:$0xff] %v3799_v19  ;;  %v3796_v21 = vmax.f32 %v3788_v0, 0.0  ;;  %v3709_v18 = vmul.f32 %v4948_v55, %v3517_v34  ;;  %2969 = vadd.xlane.f32.xlu1 %v6014_v27  ;;  %v6039_v26 = vadd.f32 %v5663_v43, %v2729_v47  ;;  %v3335_v5 = vmul.f32 %v6025_v53, %v6025_v53  ;;  %v4836_v31 = vpop.f32.mrf.mxu0 }
 0x270   : > { %4955 = vrsqrt.f32 %v3584_v2  ;;  %v3155_v40 = vpop.xlane.xlu1 %3154  ;;  %v6047_v30 = vadd.f32 %v5663_v43, %v2726_v15  ;;  %v3334_v23 = vmul.f32 %v6033_v63, %v6033_v63  ;;  %v3523_v39 = vsub.f32 %v5689_v10, %v5940_v60 }
 0x271   : > { %3804 = vst [vmem:[%s6019_s25] sm:$0xff] %v3796_v21  ;;  %v3777_v37 = vmul.f32 %v5968_v46, %v3709_v18  ;;  %v3271_v9 = vmul.f32 0.0078125, %v3155_v40  ;;  %2967 = vadd.xlane.f32.xlu0 %v6030_v22  ;;  %v3333_v4 = vmul.f32 %v6036_v44, %v6036_v44  ;;  %v6057_v7 = vmul.f32 0.0078125, %v2892_v3 }
 0x272   : > { %v3153_v14 = vpop.xlane.xlu0 %3152  ;;  %v3115_v0 = vmul.f32 %v6014_v27, %v6014_v27  ;;  %v2750_v18 = vadd.f32 %v4835_v36, %v4755_v62  ;;  %v2753_v40 = vadd.f32 %v4836_v31, %v4756_v13  ;;  %v3114_v60 = vmul.f32 %v6030_v22, %v6030_v22 }
 0x273   : > { %v3789_v54 = vadd.f32 %v5972_v41, %v3777_v37  ;;  %v3399_v56 = vsub.f32 %v3271_v9, %v3335_v5  ;;  %v3270_v47 = vmul.f32 0.0078125, %v3153_v14  ;;  %2965 = vadd.xlane.f32.xlu1 %v6039_v26  ;;  %v3112_v3 = vmul.f32 %v6047_v30, %v6047_v30  ;;  %v2215_v37 = vpop.f32.mrf.mxu1  ;;  %v2744_v5 = vpop.f32.mrf.mxu0 }
 0x274   : > { %v3151_v19 = vpop.xlane.xlu1 %3150  ;;  %v3332_v62 = vmul.f32 %v6057_v7, %v6057_v7  ;;  %v3113_v31 = vmul.f32 %v6039_v26, %v6039_v26 }
 0x275   : > { %v3797_v34 = vmax.f32 %v3789_v54, 0.0  ;;  %v3463_v55 = vmax.f32 %v3399_v56, 0.0  ;;  %v3398_v15 = vsub.f32 %v3270_v47, %v3334_v23  ;;  %v3269_v2 = vmul.f32 0.0078125, %v3151_v19  ;;  %2963 = vadd.xlane.f32.xlu0 %v6047_v30 }
 0x276   : > { %v4950_v21 = vpop.eup %4949  ;;  %v3149_v10 = vpop.xlane.xlu0 %3148  ;;  %v3522_v56 = vsub.f32 %v5693_v12, %v5957_v6 }
 0x277   : > { %3805 = vst [vmem:[%s6019_s25 + $0x8] sm:$0xff] %v3797_v34  ;;  %v3715_v9 = vmul.f32 %v4950_v21, %v3523_v39  ;;  %v3591_v14 = vadd.f32 1e-05, %v3463_v55  ;;  %v3462_v54 = vmax.f32 %v3398_v15, 0.0  ;;  %v3397_v23 = vsub.f32 %v3269_v2, %v3333_v4  ;;  %3226 = vadd.xlane.f32.xlu1 %v3115_v0  ;;  %v6079_v21 = vpop.f32.mrf.mxu1 }
 0x278   : > { %v3268_v36 = vmul.f32 0.0078125, %v3149_v10  ;;  %v2906_v13 = vpop.xlane.xlu1 %2905  ;;  %v2742_v4 = vadd.f32 %v2741_v8, %v2212_v51  ;;  %v3521_v0 = vsub.f32 %v5697_v20, %v5977_v32  ;;  %v6077_v2 = vadd.f32 %v5663_v43, %v2753_v40  ;;  %v6081_v10 = vpop.f32.mrf.mxu0 }
 0x279   : > { %v4952_v47 = vpop.eup %4951  ;;  %v3783_v19 = vmul.f32 %v5968_v46, %v3715_v9  ;;  %4957 = vrsqrt.f32 %v3591_v14  ;;  %v3590_v39 = vadd.f32 1e-05, %v3462_v54  ;;  %v3461_v34 = vmax.f32 %v3397_v23, 0.0  ;;  %3224 = vadd.xlane.f32.xlu0 %v3114_v60 }
 0x27a   : > { %v3714_v12 = vmul.f32 %v4952_v47, %v3522_v56  ;;  %v3396_v6 = vsub.f32 %v3268_v36, %v3332_v62  ;;  %v2904_v55 = vpop.xlane.xlu0 %2903  ;;  %v3520_v51 = vsub.f32 %v5701_v17, %v5987_v42  ;;  %v2745_v40 = vadd.f32 %v2744_v5, %v2215_v37  ;;  %v6094_v42 = vld [vmem:[%s6815_s9] ss:$0 sm:$0xff]  ;;  %v6099_v37 = vpop.f32.mrf.mxu1 }
 0x27b   : > { %v4954_v15 = vpop.eup %4953  ;;  %v3795_v9 = vadd.f32 %v5972_v41, %v3783_v19  ;;  %4959 = vrsqrt.f32 %v3590_v39  ;;  %v3589_v14 = vadd.f32 1e-05, %v3461_v34  ;;  %3222 = vadd.xlane.f32.xlu1 %v3113_v31  ;;  %v6087_v23 = vmul.f32 0.0078125, %v2906_v13  ;;  %v6101_v5 = vpop.f32.mrf.mxu0 }
 0x27c   : > { %v3782_v20 = vmul.f32 %v5968_v46, %v3714_v12  ;;  %v3713_v32 = vmul.f32 %v4954_v15, %v3521_v0  ;;  %v3460_v8 = vmax.f32 %v3396_v6, 0.0  ;;  %v2902_v60 = vpop.xlane.xlu1 %2901  ;;  %v6097_v47 = vadd.f32 %v6094_v42, %v2750_v18 }
 0x27d   : > { %v4956_v43 = vpop.eup %4955  ;;  %v3803_v54 = vmax.f32 %v3795_v9, 0.0  ;;  %4961 = vrsqrt.f32 %v3589_v14  ;;  %3220 = vadd.xlane.f32.xlu0 %v3112_v3  ;;  %v6104_v3 = vmul.f32 0.0078125, %v2904_v55  ;;  %v6111_v18 = vrot.slane %v5943_v59, %v5916_v52 }
 0x27e   : > { %v3794_v56 = vadd.f32 %v5972_v41, %v3782_v20  ;;  %v3781_v62 = vmul.f32 %v5968_v46, %v3713_v32  ;;  %v3712_v36 = vmul.f32 %v4956_v43, %v3520_v51  ;;  %v3588_v31 = vadd.f32 1e-05, %v3460_v8  ;;  %v2900_v17 = vpop.xlane.xlu0 %2899  ;;  %v4760_v51 = vpop.f32.mrf.mxu1 }
 0x27f   : > { %3811 = vst [vmem:[%s6019_s25 + $0x38] sm:$0xff] %v3803_v54  ;;  %2977 = vadd.xlane.f32.xlu1 %v6077_v2  ;;  %v6114_v0 = vadd.f32 %v6094_v42, %v2742_v4  ;;  %v6117_v12 = vadd.f32 %v6094_v42, %v2745_v40  ;;  %v6119_v6 = vmul.f32 0.0078125, %v2902_v60  ;;  %v3339_v15 = vmul.f32 %v6087_v23, %v6087_v23  ;;  %v4840_v20 = vpop.f32.mrf.mxu0 }
 0x280   : > { %v3802_v13 = vmax.f32 %v3794_v56, 0.0  ;;  %v3793_v19 = vadd.f32 %v5972_v41, %v3781_v62  ;;  %v3780_v39 = vmul.f32 %v5968_v46, %v3712_v36  ;;  %4963 = vrsqrt.f32 %v3588_v31  ;;  %v3163_v34 = vpop.xlane.xlu1 %3162 }
 0x281   : > { %2975 = vadd.xlane.f32.xlu0 %v6097_v47  ;;  %v3275_v9 = vmul.f32 0.0078125, %v3163_v34  ;;  %v6128_v4 = vrot.slane %v5946_v11, %v5916_v52  ;;  %v3338_v32 = vmul.f32 %v6104_v3, %v6104_v3  ;;  %v6136_v43 = vmul.f32 0.0078125, %v2900_v17 }
 0x282   : > { %3810 = vst [vmem:[%s6019_s25 + $0x30] sm:$0xff] %v3802_v13  ;;  %v3801_v55 = vmax.f32 %v3793_v19, 0.0  ;;  %v3792_v46 = vadd.f32 %v5972_v41, %v3780_v39  ;;  %v3161_v14 = vpop.xlane.xlu0 %3160  ;;  %v3118_v41 = vmul.f32 %v6097_v47, %v6097_v47  ;;  %v3119_v52 = vmul.f32 %v6077_v2, %v6077_v2 }
 0x283   : > { %v3274_v8 = vmul.f32 0.0078125, %v3161_v14  ;;  %2973 = vadd.xlane.f32.xlu1 %v6117_v12  ;;  %v3403_v40 = vsub.f32 %v3275_v9, %v3339_v15  ;;  %v3527_v56 = vsub.f32 %v5714_v33, %v6025_v53  ;;  %v3337_v62 = vmul.f32 %v6119_v6, %v6119_v6  ;;  %v2760_v33 = vpop.f32.mrf.mxu0 }
 0x284   : > { %3809 = vst [vmem:[%s6019_s25 + $0x28] sm:$0xff] %v3801_v55  ;;  %v3800_v60 = vmax.f32 %v3792_v46, 0.0  ;;  %v3159_v54 = vpop.xlane.xlu1 %3158  ;;  %v2769_v19 = vadd.f32 %v4840_v20, %v4760_v51  ;;  %v3526_v17 = vsub.f32 %v5717_v35, %v6033_v63  ;;  %v3116_v55 = vmul.f32 %v6114_v0, %v6114_v0  ;;  %v2231_v46 = vpop.f32.mrf.mxu1 }
 0x285   : > { %v3402_v36 = vsub.f32 %v3274_v8, %v3338_v32  ;;  %v3273_v31 = vmul.f32 0.0078125, %v3159_v54  ;;  %2971 = vadd.xlane.f32.xlu0 %v6114_v0  ;;  %v3467_v39 = vmax.f32 %v3403_v40, 0.0  ;;  %v3525_v51 = vsub.f32 %v5721_v24, %v6036_v44 }
 0x286   : > { %v4958_v13 = vpop.eup %4957  ;;  %3808 = vst [vmem:[%s6019_s25 + $0x20] sm:$0xff] %v3800_v60  ;;  %v3157_v34 = vpop.xlane.xlu0 %3156  ;;  %v3336_v20 = vmul.f32 %v6136_v43, %v6136_v43  ;;  %v3117_v8 = vmul.f32 %v6117_v12, %v6117_v12  ;;  %v6160_v24 = vadd.f32 %v6094_v42, %v2769_v19 }
 0x287   : > { %v3719_v53 = vmul.f32 %v4958_v13, %v3527_v56  ;;  %v3466_v15 = vmax.f32 %v3402_v36, 0.0  ;;  %v3401_v9 = vsub.f32 %v3273_v31, %v3337_v62  ;;  %v3272_v14 = vmul.f32 0.0078125, %v3157_v34  ;;  %3234 = vadd.xlane.f32.xlu1 %v3119_v52  ;;  %v6162_v31 = vpop.f32.mrf.mxu1  ;;  %v6164_v13 = vpop.f32.mrf.mxu0 }
 0x288   : > { %v4960_v32 = vpop.eup %4959  ;;  %v3595_v35 = vadd.f32 1e-05, %v3467_v39  ;;  %v2914_v63 = vpop.xlane.xlu1 %2913  ;;  %v2766_v52 = vadd.f32 %v6081_v10, %v6079_v21  ;;  %v3524_v21 = vsub.f32 %v5725_v38, %v6057_v7 }
 0x289   : > { %v3819_v60 = vmul.f32 %v6111_v18, %v3719_v53  ;;  %v3718_v40 = vmul.f32 %v4960_v32, %v3526_v17  ;;  %v3594_v54 = vadd.f32 1e-05, %v3466_v15  ;;  %v3465_v56 = vmax.f32 %v3401_v9, 0.0  ;;  %3232 = vadd.xlane.f32.xlu0 %v3118_v41 }
 0x28a   : > { %v4962_v62 = vpop.eup %4961  ;;  %4965 = vrsqrt.f32 %v3595_v35  ;;  %v3400_v44 = vsub.f32 %v3272_v14, %v3336_v20  ;;  %v2912_v36 = vpop.xlane.xlu0 %2911  ;;  %v2761_v41 = vadd.f32 %v2760_v33, %v2231_v46  ;;  %v6172_v20 = vmul.f32 0.0078125, %v2914_v63 }
 0x28b   : > { %v3831_v39 = vadd.f32 %v6128_v4, %v3819_v60  ;;  %v3818_v17 = vmul.f32 %v6111_v18, %v3718_v40  ;;  %v3717_v34 = vmul.f32 %v4962_v62, %v3525_v51  ;;  %4967 = vrsqrt.f32 %v3594_v54  ;;  %3230 = vadd.xlane.f32.xlu1 %v3117_v8  ;;  %v6179_v35 = vpop.f32.mrf.mxu1  ;;  %v2773_v8 = vpop.f32.mrf.mxu0 }
 0x28c   : > { %v3593_v10 = vadd.f32 1e-05, %v3465_v56  ;;  %v3464_v19 = vmax.f32 %v3400_v44, 0.0  ;;  %v2910_v53 = vpop.xlane.xlu1 %2909  ;;  %v2758_v51 = vadd.f32 %v6101_v5, %v6099_v37  ;;  %v6177_v33 = vadd.f32 %v6094_v42, %v2766_v52 }
 0x28d   : > { %v4964_v15 = vpop.eup %4963  ;;  %v3839_v9 = vmax.f32 %v3831_v39, 0.0  ;;  %v3830_v14 = vadd.f32 %v6128_v4, %v3818_v17  ;;  %v3817_v32 = vmul.f32 %v6111_v18, %v3717_v34  ;;  %3228 = vadd.xlane.f32.xlu0 %v3116_v55  ;;  %v6183_v40 = vmul.f32 0.0078125, %v2912_v36  ;;  %v4764_v34 = vpop.f32.mrf.mxu1 }
 0x28e   : > { %v3716_v46 = vmul.f32 %v4964_v15, %v3524_v21  ;;  %4969 = vrsqrt.f32 %v3593_v10  ;;  %v3592_v38 = vadd.f32 1e-05, %v3464_v19  ;;  %v2908_v7 = vpop.xlane.xlu0 %2907  ;;  %v6187_v37 = vadd.f32 %v6094_v42, %v2761_v41  ;;  %v4844_v41 = vpop.f32.mrf.mxu0 }
 0x28f   : > { %3847 = vst [vmem:[%s6019_s25 + $0x58] sm:$0xff] %v3839_v9  ;;  %v3838_v60 = vmax.f32 %v3830_v14, 0.0  ;;  %v3829_v63 = vadd.f32 %v6128_v4, %v3817_v32  ;;  %2985 = vadd.xlane.f32.xlu1 %v6160_v24  ;;  %v3343_v56 = vmul.f32 %v6172_v20, %v6172_v20  ;;  %v6193_v62 = vmul.f32 0.0078125, %v2910_v53 }
 0x290   : > { %v3816_v5 = vmul.f32 %v6111_v18, %v3716_v46  ;;  %4971 = vrsqrt.f32 %v3592_v38  ;;  %v3171_v55 = vpop.xlane.xlu1 %3170  ;;  %v6197_v44 = vadd.f32 %v6094_v42, %v2758_v51  ;;  %v3854_v17 = vsub.s32 2, %v5383_v49 }
 0x291   : > { %3846 = vst [vmem:[%s6019_s25 + $0x50] sm:$0xff] %v3838_v60  ;;  %v3837_v54 = vmax.f32 %v3829_v63, 0.0  ;;  %v3279_v52 = vmul.f32 0.0078125, %v3171_v55  ;;  %2983 = vadd.xlane.f32.xlu0 %v6177_v33  ;;  %v3342_v21 = vmul.f32 %v6183_v40, %v6183_v40  ;;  %v6205_v15 = vmul.f32 0.0078125, %v2908_v7 }
 0x292   : > { %v3828_v36 = vadd.f32 %v6128_v4, %v3816_v5  ;;  %v3169_v39 = vpop.xlane.xlu0 %3168  ;;  %v3123_v14 = vmul.f32 %v6160_v24, %v6160_v24  ;;  %v3122_v32 = vmul.f32 %v6177_v33, %v6177_v33  ;;  %v3341_v51 = vmul.f32 %v6193_v62, %v6193_v62 }
 0x293   : > { %3845 = vst [vmem:[%s6019_s25 + $0x48] sm:$0xff] %v3837_v54  ;;  %v3407_v10 = vsub.f32 %v3279_v52, %v3343_v56  ;;  %v3278_v19 = vmul.f32 0.0078125, %v3169_v39  ;;  %2981 = vadd.xlane.f32.xlu1 %v6187_v37  ;;  %v2785_v63 = vadd.f32 %v4844_v41, %v4764_v34  ;;  %v3531_v7 = vsub.f32 %v5738_v57, %v6087_v23  ;;  %v2247_v52 = vpop.f32.mrf.mxu1 }
 0x294   : > { %v3836_v53 = vmax.f32 %v3828_v36, 0.0  ;;  %v3167_v9 = vpop.xlane.xlu1 %3166  ;;  %v3530_v5 = vsub.f32 %v5741_v58, %v6104_v3  ;;  %v3120_v54 = vmul.f32 %v6197_v44, %v6197_v44  ;;  %v2776_v36 = vpop.f32.mrf.mxu0  ;;  %v2782_v41 = vadd.f32 %v6164_v13, %v6162_v31 }
 0x295   : > { %v3471_v46 = vmax.f32 %v3407_v10, 0.0  ;;  %v3406_v38 = vsub.f32 %v3278_v19, %v3342_v21  ;;  %v3277_v60 = vmul.f32 0.0078125, %v3167_v9  ;;  %2979 = vadd.xlane.f32.xlu0 %v6197_v44  ;;  %v3340_v58 = vmul.f32 %v6205_v15, %v6205_v15 }
 0x296   : > { %3844 = vst [vmem:[%s6019_s25 + $0x40] sm:$0xff] %v3836_v53  ;;  %v3165_v55 = vpop.xlane.xlu0 %3164  ;;  %v3121_v3 = vmul.f32 %v6187_v37, %v6187_v37 }
 0x297   : > { %v4966_v56 = vpop.eup %4965  ;;  %v3599_v39 = vadd.f32 1e-05, %v3471_v46  ;;  %v3470_v21 = vmax.f32 %v3406_v38, 0.0  ;;  %v3405_v10 = vsub.f32 %v3277_v60, %v3341_v51  ;;  %v3276_v19 = vmul.f32 0.0078125, %v3165_v55  ;;  %3242 = vadd.xlane.f32.xlu1 %v3123_v14  ;;  %v6234_v55 = vpop.f32.mrf.mxu1 }
 0x298   : > { %v4968_v34 = vpop.eup %4967  ;;  %v3723_v57 = vmul.f32 %v4966_v56, %v3531_v7  ;;  %v2922_v23 = vpop.xlane.xlu1 %2921  ;;  %v2774_v51 = vadd.f32 %v2773_v8, %v6179_v35  ;;  %v3529_v14 = vsub.f32 %v5745_v16, %v6119_v6  ;;  %v6232_v7 = vadd.f32 %v6094_v42, %v2785_v63 }
 0x299   : > { %v3722_v53 = vmul.f32 %v4968_v34, %v3530_v5  ;;  %4973 = vrsqrt.f32 %v3599_v39  ;;  %v3598_v9 = vadd.f32 1e-05, %v3470_v21  ;;  %v3469_v46 = vmax.f32 %v3405_v10, 0.0  ;;  %3240 = vadd.xlane.f32.xlu0 %v3122_v32  ;;  %v6236_v5 = vpop.f32.mrf.mxu0 }
 0x29a   : > { %v3823_v31 = vmul.f32 %v6111_v18, %v3723_v57  ;;  %v3404_v13 = vsub.f32 %v3276_v19, %v3340_v58  ;;  %v2920_v38 = vpop.xlane.xlu0 %2919  ;;  %v3528_v16 = vsub.f32 %v5749_v1, %v6136_v43  ;;  %v2777_v63 = vadd.f32 %v2776_v36, %v2247_v52 }
 0x29b   : > { %v4970_v60 = vpop.eup %4969  ;;  %v3822_v56 = vmul.f32 %v6111_v18, %v3722_v53  ;;  %4975 = vrsqrt.f32 %v3598_v9  ;;  %v3597_v32 = vadd.f32 1e-05, %v3469_v46  ;;  %3238 = vadd.xlane.f32.xlu1 %v3121_v3  ;;  %v6243_v19 = vmul.f32 0.0078125, %v2922_v23  ;;  %v6249_v53 = vpop.f32.mrf.mxu1 }
 0x29c   : > { %v3835_v6 = vadd.f32 %v6128_v4, %v3823_v31  ;;  %v3721_v35 = vmul.f32 %v4970_v60, %v3529_v14  ;;  %v3468_v8 = vmax.f32 %v3404_v13, 0.0  ;;  %v2918_v39 = vpop.xlane.xlu1 %2917  ;;  %v6247_v43 = vadd.f32 %v6094_v42, %v2782_v41  ;;  %v6251_v52 = vpop.f32.mrf.mxu0 }
 0x29d   : > { %v4972_v21 = vpop.eup %4971  ;;  %v3834_v10 = vadd.f32 %v6128_v4, %v3822_v56  ;;  %4977 = vrsqrt.f32 %v3597_v32  ;;  %3236 = vadd.xlane.f32.xlu0 %v3120_v54  ;;  %v6253_v9 = vmul.f32 0.0078125, %v2920_v38  ;;  %v6262_v41 = vrot.slane %v5943_v59, %v3854_v17 }
 0x29e   : > { %v3843_v34 = vmax.f32 %v3835_v6, 0.0  ;;  %v3821_v57 = vmul.f32 %v6111_v18, %v3721_v35  ;;  %v3720_v58 = vmul.f32 %v4972_v21, %v3528_v16  ;;  %v3596_v3 = vadd.f32 1e-05, %v3468_v8  ;;  %v2916_v1 = vpop.xlane.xlu0 %2915  ;;  %v4768_v16 = vpop.f32.mrf.mxu1 }
 0x29f   : > { %v3842_v36 = vmax.f32 %v3834_v10, 0.0  ;;  %2993 = vadd.xlane.f32.xlu1 %v6232_v7  ;;  %v6265_v14 = vadd.f32 %v6094_v42, %v2774_v51  ;;  %v6268_v31 = vadd.f32 %v6094_v42, %v2777_v63  ;;  %v6271_v13 = vmul.f32 0.0078125, %v2918_v39  ;;  %v4848_v6 = vpop.f32.mrf.mxu0 }
 0x2a0   : > { %3851 = vst [vmem:[%s6019_s25 + $0x78] sm:$0xff] %v3843_v34  ;;  %v3833_v54 = vadd.f32 %v6128_v4, %v3821_v57  ;;  %v3820_v23 = vmul.f32 %v6111_v18, %v3720_v58  ;;  %4979 = vrsqrt.f32 %v3596_v3  ;;  %v3179_v46 = vpop.xlane.xlu1 %3178  ;;  %v3347_v60 = vmul.f32 %v6243_v19, %v6243_v19 }
 0x2a1   : > { %3850 = vst [vmem:[%s6019_s25 + $0x70] sm:$0xff] %v3842_v36  ;;  %2991 = vadd.xlane.f32.xlu0 %v6247_v43  ;;  %v3283_v56 = vmul.f32 0.0078125, %v3179_v46  ;;  %v6280_v51 = vrot.slane %v5946_v11, %v3854_v17  ;;  %v3346_v35 = vmul.f32 %v6253_v9, %v6253_v9  ;;  %v6288_v21 = vmul.f32 0.0078125, %v2916_v1 }
 0x2a2   : > { %v3841_v18 = vmax.f32 %v3833_v54, 0.0  ;;  %v3832_v38 = vadd.f32 %v6128_v4, %v3820_v23  ;;  %v3177_v32 = vpop.xlane.xlu0 %3176  ;;  %v3126_v4 = vmul.f32 %v6247_v43, %v6247_v43  ;;  %v3127_v17 = vmul.f32 %v6232_v7, %v6232_v7 }
 0x2a3   : > { %v3282_v8 = vmul.f32 0.0078125, %v3177_v32  ;;  %2989 = vadd.xlane.f32.xlu1 %v6268_v31  ;;  %v3411_v63 = vsub.f32 %v3283_v56, %v3347_v60  ;;  %v3535_v34 = vsub.f32 %v5762_v25, %v6172_v20  ;;  %v3345_v57 = vmul.f32 %v6271_v13, %v6271_v13 }
 0x2a4   : > { %3849 = vst [vmem:[%s6019_s25 + $0x68] sm:$0xff] %v3841_v18  ;;  %v3840_v39 = vmax.f32 %v3832_v38, 0.0  ;;  %v3175_v10 = vpop.xlane.xlu1 %3174  ;;  %v2801_v54 = vadd.f32 %v4848_v6, %v4768_v16  ;;  %v3534_v1 = vsub.f32 %v5765_v50, %v6183_v40  ;;  %v3124_v18 = vmul.f32 %v6265_v14, %v6265_v14  ;;  %v2263_v40 = vpop.f32.mrf.mxu1 }
 0x2a5   : > { %v3410_v58 = vsub.f32 %v3282_v8, %v3346_v35  ;;  %v3281_v3 = vmul.f32 0.0078125, %v3175_v10  ;;  %2987 = vadd.xlane.f32.xlu0 %v6265_v14  ;;  %v3475_v23 = vmax.f32 %v3411_v63, 0.0  ;;  %v3533_v32 = vsub.f32 %v5769_v28, %v6193_v62  ;;  %v2792_v8 = vpop.f32.mrf.mxu0 }
 0x2a6   : > { %v4974_v36 = vpop.eup %4973  ;;  %3848 = vst [vmem:[%s6019_s25 + $0x60] sm:$0xff] %v3840_v39  ;;  %v3173_v46 = vpop.xlane.xlu0 %3172  ;;  %v3344_v16 = vmul.f32 %v6288_v21, %v6288_v21  ;;  %v3125_v50 = vmul.f32 %v6268_v31, %v6268_v31  ;;  %v2798_v28 = vadd.f32 %v6236_v5, %v6234_v55  ;;  %v6312_v62 = vadd.f32 %v6094_v42, %v2801_v54 }
 0x2a7   : > { %v3727_v38 = vmul.f32 %v4974_v36, %v3535_v34  ;;  %v3474_v25 = vmax.f32 %v3410_v58, 0.0  ;;  %v3409_v20 = vsub.f32 %v3281_v3, %v3345_v57  ;;  %v3280_v60 = vmul.f32 0.0078125, %v3173_v46  ;;  %3250 = vadd.xlane.f32.xlu1 %v3127_v17 }
 0x2a8   : > { %v4976_v56 = vpop.eup %4975  ;;  %v3603_v6 = vadd.f32 1e-05, %v3475_v23  ;;  %v2930_v35 = vpop.xlane.xlu1 %2929 }
 0x2a9   : > { %v3859_v39 = vmul.f32 %v6262_v41, %v3727_v38  ;;  %v3726_v63 = vmul.f32 %v4976_v56, %v3534_v1  ;;  %v3602_v10 = vadd.f32 1e-05, %v3474_v25  ;;  %v3473_v34 = vmax.f32 %v3409_v20, 0.0  ;;  %3248 = vadd.xlane.f32.xlu0 %v3126_v4 }
 0x2aa   : > { %v4978_v17 = vpop.eup %4977  ;;  %4981 = vrsqrt.f32 %v3603_v6  ;;  %v3408_v57 = vsub.f32 %v3280_v60, %v3344_v16  ;;  %v2928_v58 = vpop.xlane.xlu0 %2927  ;;  %v2793_v1 = vadd.f32 %v2792_v8, %v2263_v40  ;;  %v3532_v4 = vsub.f32 %v5773_v29, %v6205_v15 }
 0x2ab   : > { %v3871_v3 = vadd.f32 %v6280_v51, %v3859_v39  ;;  %v3858_v36 = vmul.f32 %v6262_v41, %v3726_v63  ;;  %v3725_v23 = vmul.f32 %v4978_v17, %v3533_v32  ;;  %4983 = vrsqrt.f32 %v3602_v10  ;;  %3246 = vadd.xlane.f32.xlu1 %v3125_v50 }
 0x2ac   : > { %v3601_v46 = vadd.f32 1e-05, %v3473_v34  ;;  %v3472_v55 = vmax.f32 %v3408_v57, 0.0  ;;  %v2926_v5 = vpop.xlane.xlu1 %2925  ;;  %v6320_v60 = vmul.f32 0.0078125, %v2930_v35  ;;  %v2790_v56 = vadd.f32 %v6251_v52, %v6249_v53 }
 0x2ad   : > { %v4980_v54 = vpop.eup %4979  ;;  %v3879_v38 = vmax.f32 %v3871_v3, 0.0  ;;  %v3870_v25 = vadd.f32 %v6280_v51, %v3858_v36  ;;  %v3857_v20 = vmul.f32 %v6262_v41, %v3725_v23  ;;  %3244 = vadd.xlane.f32.xlu0 %v3124_v18  ;;  %v6325_v16 = vadd.f32 %v6094_v42, %v2798_v28 }
 0x2ae   : > { %v3724_v32 = vmul.f32 %v4980_v54, %v3532_v4  ;;  %4985 = vrsqrt.f32 %v3601_v46  ;;  %v3600_v29 = vadd.f32 1e-05, %v3472_v55  ;;  %v2924_v15 = vpop.xlane.xlu0 %2923  ;;  %v6329_v40 = vmul.f32 0.0078125, %v2928_v58 }
 0x2af   : > { %3887 = vst [vmem:[%s6019_s25 + $0x98] sm:$0xff] %v3879_v38  ;;  %v3878_v6 = vmax.f32 %v3870_v25, 0.0  ;;  %v3869_v50 = vadd.f32 %v6280_v51, %v3857_v20  ;;  %3001 = vadd.xlane.f32.xlu1 %v6312_v62  ;;  %v6333_v18 = vadd.f32 %v6094_v42, %v2793_v1  ;;  %v3351_v8 = vmul.f32 %v6320_v60, %v6320_v60 }
 0x2b0   : > { %v3856_v53 = vmul.f32 %v6262_v41, %v3724_v32  ;;  %4987 = vrsqrt.f32 %v3600_v29  ;;  %v3187_v52 = vpop.xlane.xlu1 %3186  ;;  %v6339_v39 = vmul.f32 0.0078125, %v2926_v5  ;;  %v6343_v10 = vadd.f32 %v6094_v42, %v2790_v56 }
 0x2b1   : > { %3886 = vst [vmem:[%s6019_s25 + $0x90] sm:$0xff] %v3878_v6  ;;  %v3877_v35 = vmax.f32 %v3869_v50, 0.0  ;;  %v3287_v63 = vmul.f32 0.0078125, %v3187_v52  ;;  %2999 = vadd.xlane.f32.xlu0 %v6325_v16  ;;  %v3350_v28 = vmul.f32 %v6329_v40, %v6329_v40  ;;  %v6350_v36 = vmul.f32 0.0078125, %v2924_v15 }
 0x2b2   : > { %v3868_v34 = vadd.f32 %v6280_v51, %v3856_v53  ;;  %v3185_v17 = vpop.xlane.xlu0 %3184  ;;  %v3129_v42 = vmul.f32 %v6333_v18, %v6333_v18  ;;  %v3349_v1 = vmul.f32 %v6339_v39, %v6339_v39  ;;  %v3539_v5 = vsub.f32 %v5786_v45, %v6243_v19 }
 0x2b3   : > { %3885 = vst [vmem:[%s6019_s25 + $0x88] sm:$0xff] %v3877_v35  ;;  %v3415_v57 = vsub.f32 %v3287_v63, %v3351_v8  ;;  %v3286_v58 = vmul.f32 0.0078125, %v3185_v17  ;;  %2997 = vadd.xlane.f32.xlu1 %v6333_v18  ;;  %v3538_v54 = vsub.f32 %v5789_v48, %v6253_v9  ;;  %v3128_v25 = vmul.f32 %v6343_v10, %v6343_v10  ;;  %v6861_v35 = vld [vmem:[#allocation6_spill] sm:$0xff] }
 0x2b4   : > { %v3876_v3 = vmax.f32 %v3868_v34, 0.0  ;;  %v3183_v23 = vpop.xlane.xlu1 %3182  ;;  %v3348_v53 = vmul.f32 %v6350_v36, %v6350_v36  ;;  %v3131_v45 = vmul.f32 %v6312_v62, %v6312_v62  ;;  %v3537_v8 = vsub.f32 %v6861_v35, %v6271_v13 }
 0x2b5   : > { %v3479_v4 = vmax.f32 %v3415_v57, 0.0  ;;  %v3414_v46 = vsub.f32 %v3286_v58, %v3350_v28  ;;  %v3285_v55 = vmul.f32 0.0078125, %v3183_v23  ;;  %2995 = vadd.xlane.f32.xlu0 %v6343_v10  ;;  %v6862_v23 = vld [vmem:[#allocation7_spill] sm:$0xff] }
 0x2b6   : > { %3884 = vst [vmem:[%s6019_s25 + $0x80] sm:$0xff] %v3876_v3  ;;  %v3181_v38 = vpop.xlane.xlu0 %3180  ;;  %v3130_v3 = vmul.f32 %v6325_v16, %v6325_v16 }
 0x2b7   : > { %v4982_v20 = vpop.eup %4981  ;;  %v3607_v56 = vadd.f32 1e-05, %v3479_v4  ;;  %v3478_v32 = vmax.f32 %v3414_v46, 0.0  ;;  %v3413_v29 = vsub.f32 %v3285_v55, %v3349_v1  ;;  %v3284_v15 = vmul.f32 0.0078125, %v3181_v38  ;;  %3254 = vadd.xlane.f32.xlu1 %v3129_v42 }
 0x2b8   : > { %v4984_v6 = vpop.eup %4983  ;;  %v3731_v50 = vmul.f32 %v4982_v20, %v3539_v5  ;;  %v2938_v52 = vpop.xlane.xlu1 %2937  ;;  %v3536_v42 = vsub.f32 %v6862_v23, %v6288_v21 }
 0x2b9   : > { %v3730_v48 = vmul.f32 %v4984_v6, %v3538_v54  ;;  %4989 = vrsqrt.f32 %v3607_v56  ;;  %v3606_v19 = vadd.f32 1e-05, %v3478_v32  ;;  %v3477_v9 = vmax.f32 %v3413_v29, 0.0  ;;  %3252 = vadd.xlane.f32.xlu0 %v3128_v25 }
 0x2ba   : > { %v3863_v63 = vmul.f32 %v6262_v41, %v3731_v50  ;;  %v3412_v34 = vsub.f32 %v3284_v15, %v3348_v53  ;;  %v2936_v17 = vpop.xlane.xlu0 %2935  ;;  %v6378_v54 = vmul.f32 0.0078125, %v2938_v52  ;;  %v3894_v53 = vsub.s32 3, %v5383_v49 }
 0x2bb   : > { %v4986_v28 = vpop.eup %4985  ;;  %v3862_v57 = vmul.f32 %v6262_v41, %v3730_v48  ;;  %4991 = vrsqrt.f32 %v3606_v19  ;;  %v3605_v58 = vadd.f32 1e-05, %v3477_v9  ;;  %3258 = vadd.xlane.f32.xlu1 %v3131_v45  ;;  %v6381_v29 = vmul.f32 0.0078125, %v2936_v17 }
 0x2bc   : > { %v3875_v1 = vadd.f32 %v6280_v51, %v3863_v63  ;;  %v3729_v13 = vmul.f32 %v4986_v28, %v3537_v8  ;;  %v3476_v4 = vmax.f32 %v3412_v34, 0.0  ;;  %v2934_v46 = vpop.xlane.xlu1 %2933  ;;  %v3355_v19 = vmul.f32 %v6378_v54, %v6378_v54 }
 0x2bd   : > { %v4988_v55 = vpop.eup %4987  ;;  %v3874_v5 = vadd.f32 %v6280_v51, %v3862_v57  ;;  %4993 = vrsqrt.f32 %v3605_v58  ;;  %3256 = vadd.xlane.f32.xlu0 %v3130_v3  ;;  %v6388_v52 = vmul.f32 0.0078125, %v2934_v46  ;;  %v3354_v8 = vmul.f32 %v6381_v29, %v6381_v29  ;;  %v6863_v57 = vld [vmem:[#allocation8_spill] sm:$0xff] }
 0x2be   : > { %v3883_v38 = vmax.f32 %v3875_v1, 0.0  ;;  %v3861_v25 = vmul.f32 %v6262_v41, %v3729_v13  ;;  %v3728_v20 = vmul.f32 %v4988_v55, %v3536_v42  ;;  %v3604_v56 = vadd.f32 1e-05, %v3476_v4  ;;  %v2932_v21 = vpop.xlane.xlu0 %2931  ;;  %v6864_v13 = vld [vmem:[#allocation9_spill] sm:$0xff] }
 0x2bf   : > { %v3882_v32 = vmax.f32 %v3874_v5, 0.0  ;;  %v6396_v34 = vmul.f32 0.0078125, %v2932_v21  ;;  %v3543_v58 = vsub.f32 %v6863_v57, %v6320_v60  ;;  %v6403_v1 = vrot.slane %v5943_v59, %v3894_v53  ;;  %v6865_v21 = vld [vmem:[#allocation10_spill] sm:$0xff] }
 0x2c0   : > { %3891 = vst [vmem:[%s6019_s25 + $0xb8] sm:$0xff] %v3883_v38  ;;  %v3873_v15 = vadd.f32 %v6280_v51, %v3861_v25  ;;  %v3860_v6 = vmul.f32 %v6262_v41, %v3728_v20  ;;  %4995 = vrsqrt.f32 %v3604_v56  ;;  %v3195_v50 = vpop.xlane.xlu1 %3194  ;;  %v3542_v4 = vsub.f32 %v6864_v13, %v6329_v40 }
 0x2c1   : > { %3890 = vst [vmem:[%s6019_s25 + $0xb0] sm:$0xff] %v3882_v32  ;;  %v3291_v9 = vmul.f32 0.0078125, %v3195_v50  ;;  %v6409_v56 = vrot.slane %v5946_v11, %v3894_v53  ;;  %v3541_v32 = vsub.f32 %v6865_v21, %v6339_v39 }
 0x2c2   : > { %v3881_v45 = vmax.f32 %v3873_v15, 0.0  ;;  %v3872_v48 = vadd.f32 %v6280_v51, %v3860_v6  ;;  %v3193_v35 = vpop.xlane.xlu0 %3192  ;;  %v3353_v51 = vmul.f32 %v6388_v52, %v6388_v52  ;;  %v3352_v15 = vmul.f32 %v6396_v34, %v6396_v34 }
 0x2c3   : > { %v3290_v41 = vmul.f32 0.0078125, %v3193_v35  ;;  %v3419_v17 = vsub.f32 %v3291_v9, %v3355_v19 }
 0x2c4   : > { %3889 = vst [vmem:[%s6019_s25 + $0xa8] sm:$0xff] %v3881_v45  ;;  %v3880_v63 = vmax.f32 %v3872_v48, 0.0  ;;  %v3191_v28 = vpop.xlane.xlu1 %3190 }
 0x2c5   : > { %v3418_v3 = vsub.f32 %v3290_v41, %v3354_v8  ;;  %v3289_v23 = vmul.f32 0.0078125, %v3191_v28  ;;  %v3483_v46 = vmax.f32 %v3419_v17, 0.0 }
 0x2c6   : > { %v4990_v42 = vpop.eup %4989  ;;  %3888 = vst [vmem:[%s6019_s25 + $0xa0] sm:$0xff] %v3880_v63  ;;  %v3189_v55 = vpop.xlane.xlu0 %3188  ;;  %v6866_v63 = vld [vmem:[#allocation11_spill] sm:$0xff] }
 0x2c7   : > { %v3735_v5 = vmul.f32 %v4990_v42, %v3543_v58  ;;  %v3482_v38 = vmax.f32 %v3418_v3, 0.0  ;;  %v3417_v25 = vsub.f32 %v3289_v23, %v3353_v51  ;;  %v3288_v20 = vmul.f32 0.0078125, %v3189_v55 }
 0x2c8   : > { %v4992_v60 = vpop.eup %4991  ;;  %v3611_v6 = vadd.f32 1e-05, %v3483_v46  ;;  %v2946_v50 = vpop.xlane.xlu1 %2945  ;;  %v3540_v17 = vsub.f32 %v6866_v63, %v6350_v36  ;;  %v6867_v63 = vld [vmem:[#allocation12_spill] sm:$0xff] }
 0x2c9   : > { %v3899_v40 = vmul.f32 %v6403_v1, %v3735_v5  ;;  %v3734_v45 = vmul.f32 %v4992_v60, %v3542_v4  ;;  %v3610_v48 = vadd.f32 1e-05, %v3482_v38  ;;  %v3481_v19 = vmax.f32 %v3417_v25, 0.0 }
 0x2ca   : > { %v4994_v9 = vpop.eup %4993  ;;  %4997 = vrsqrt.f32 %v3611_v6  ;;  %v3416_v35 = vsub.f32 %v3288_v20, %v3352_v15  ;;  %v2944_v8 = vpop.xlane.xlu0 %2943  ;;  %v6422_v13 = vmul.f32 0.0078125, %v2946_v50 }
 0x2cb   : > { %v3911_v53 = vadd.f32 %v6409_v56, %v3899_v40  ;;  %v3898_v41 = vmul.f32 %v6403_v1, %v3734_v45  ;;  %v3733_v39 = vmul.f32 %v4994_v9, %v3541_v32  ;;  %4999 = vrsqrt.f32 %v3610_v48 }
 0x2cc   : > { %v3609_v28 = vadd.f32 1e-05, %v3481_v19  ;;  %v3480_v57 = vmax.f32 %v3416_v35, 0.0  ;;  %v2942_v58 = vpop.xlane.xlu1 %2941  ;;  %v6426_v38 = vmul.f32 0.0078125, %v2944_v8  ;;  %v3359_v21 = vmul.f32 %v6422_v13, %v6422_v13 }
 0x2cd   : > { %v4996_v51 = vpop.eup %4995  ;;  %v3919_v3 = vmax.f32 %v3911_v53, 0.0  ;;  %v3910_v23 = vadd.f32 %v6409_v56, %v3898_v41  ;;  %v3897_v42 = vmul.f32 %v6403_v1, %v3733_v39  ;;  %v6432_v32 = vmul.f32 0.0078125, %v2942_v58 }
 0x2ce   : > { %v3732_v4 = vmul.f32 %v4996_v51, %v3540_v17  ;;  %5001 = vrsqrt.f32 %v3609_v28  ;;  %v3608_v46 = vadd.f32 1e-05, %v3480_v57  ;;  %v2940_v55 = vpop.xlane.xlu0 %2939  ;;  %v3358_v40 = vmul.f32 %v6426_v38, %v6426_v38  ;;  %v6868_v28 = vld [vmem:[#allocation13_spill] sm:$0xff] }
 0x2cf   : > { %3927 = vst [vmem:[%s6019_s25 + $0xd8] sm:$0xff] %v3919_v3  ;;  %v3918_v5 = vmax.f32 %v3910_v23, 0.0  ;;  %v3909_v36 = vadd.f32 %v6409_v56, %v3897_v42  ;;  %v6438_v9 = vmul.f32 0.0078125, %v2940_v55  ;;  %v3357_v8 = vmul.f32 %v6432_v32, %v6432_v32 }
 0x2d0   : > { %v3896_v25 = vmul.f32 %v6403_v1, %v3732_v4  ;;  %5003 = vrsqrt.f32 %v3608_v46  ;;  %v3203_v20 = vpop.xlane.xlu1 %3202  ;;  %v3547_v17 = vsub.f32 %v6867_v63, %v6378_v54  ;;  %v3546_v57 = vsub.f32 %v6868_v28, %v6381_v29  ;;  %v6869_v54 = vld [vmem:[#allocation14_spill] sm:$0xff] }
 0x2d1   : > { %3926 = vst [vmem:[%s6019_s25 + $0xd0] sm:$0xff] %v3918_v5  ;;  %v3917_v60 = vmax.f32 %v3909_v36, 0.0  ;;  %v3295_v15 = vmul.f32 0.0078125, %v3203_v20  ;;  %v3356_v5 = vmul.f32 %v6438_v9, %v6438_v9 }
 0x2d2   : > { %v3908_v6 = vadd.f32 %v6409_v56, %v3896_v25  ;;  %v3201_v50 = vpop.xlane.xlu0 %3200 }
 0x2d3   : > { %3925 = vst [vmem:[%s6019_s25 + $0xc8] sm:$0xff] %v3917_v60  ;;  %v3423_v45 = vsub.f32 %v3295_v15, %v3359_v21  ;;  %v3294_v48 = vmul.f32 0.0078125, %v3201_v50  ;;  %v3545_v21 = vsub.f32 %v6869_v54, %v6388_v52 }
 0x2d4   : > { %v3916_v19 = vmax.f32 %v3908_v6, 0.0  ;;  %v3199_v35 = vpop.xlane.xlu1 %3198 }
 0x2d5   : > { %v3487_v53 = vmax.f32 %v3423_v45, 0.0  ;;  %v3422_v41 = vsub.f32 %v3294_v48, %v3358_v40  ;;  %v3293_v39 = vmul.f32 0.0078125, %v3199_v35  ;;  %v6870_v48 = vld [vmem:[#allocation15_spill] sm:$0xff] }
 0x2d6   : > { %3924 = vst [vmem:[%s6019_s25 + $0xc0] sm:$0xff] %v3916_v19  ;;  %v3197_v58 = vpop.xlane.xlu0 %3196  ;;  %v3544_v19 = vsub.f32 %v6870_v48, %v6396_v34 }
 0x2d7   : > { %v4998_v51 = vpop.eup %4997  ;;  %v3615_v3 = vadd.f32 1e-05, %v3487_v53  ;;  %v3486_v23 = vmax.f32 %v3422_v41, 0.0  ;;  %v3421_v42 = vsub.f32 %v3293_v39, %v3357_v8  ;;  %v3292_v4 = vmul.f32 0.0078125, %v3197_v58 }
 0x2d8   : > { %v5000_v46 = vpop.eup %4999  ;;  %v3739_v55 = vmul.f32 %v4998_v51, %v3547_v17  ;;  %v2954_v36 = vpop.xlane.xlu1 %2953 }
 0x2d9   : > { %v3738_v25 = vmul.f32 %v5000_v46, %v3546_v57  ;;  %5005 = vrsqrt.f32 %v3615_v3  ;;  %v3614_v20 = vadd.f32 1e-05, %v3486_v23  ;;  %v3485_v60 = vmax.f32 %v3421_v42, 0.0 }
 0x2da   : > { %v3903_v29 = vmul.f32 %v6403_v1, %v3739_v55  ;;  %v3420_v15 = vsub.f32 %v3292_v4, %v3356_v5  ;;  %v2952_v6 = vpop.xlane.xlu0 %2951  ;;  %v6457_v63 = vmul.f32 0.0078125, %v2954_v36  ;;  %v3934_v46 = vsub.s32 4, %v5383_v49 }
 0x2db   : > { %v5002_v50 = vpop.eup %5001  ;;  %v3902_v40 = vmul.f32 %v6403_v1, %v3738_v25  ;;  %5007 = vrsqrt.f32 %v3614_v20  ;;  %v3613_v45 = vadd.f32 1e-05, %v3485_v60  ;;  %v6460_v3 = vmul.f32 0.0078125, %v2952_v6 }
 0x2dc   : > { %v3915_v35 = vadd.f32 %v6409_v56, %v3903_v29  ;;  %v3737_v8 = vmul.f32 %v5002_v50, %v3545_v21  ;;  %v3484_v53 = vmax.f32 %v3420_v15, 0.0  ;;  %v2950_v41 = vpop.xlane.xlu1 %2949  ;;  %v3363_v25 = vmul.f32 %v6457_v63, %v6457_v63  ;;  %v6871_v50 = vld [vmem:[#allocation16_spill] sm:$0xff] }
 0x2dd   : > { %v5004_v39 = vpop.eup %5003  ;;  %v3914_v52 = vadd.f32 %v6409_v56, %v3902_v40  ;;  %5009 = vrsqrt.f32 %v3613_v45  ;;  %v6467_v55 = vmul.f32 0.0078125, %v2950_v41  ;;  %v3362_v54 = vmul.f32 %v6460_v3, %v6460_v3 }
 0x2de   : > { %v3923_v17 = vmax.f32 %v3915_v35, 0.0  ;;  %v3901_v28 = vmul.f32 %v6403_v1, %v3737_v8  ;;  %v3736_v57 = vmul.f32 %v5004_v39, %v3544_v19  ;;  %v3612_v58 = vadd.f32 1e-05, %v3484_v53  ;;  %v2948_v51 = vpop.xlane.xlu0 %2947  ;;  %v6872_v8 = vld [vmem:[#allocation17_spill] sm:$0xff] }
 0x2df   : > { %v3922_v34 = vmax.f32 %v3914_v52, 0.0  ;;  %v6475_v29 = vmul.f32 0.0078125, %v2948_v51  ;;  %v3551_v40 = vsub.f32 %v6871_v50, %v6422_v13  ;;  %v6482_v35 = vrot.slane %v5943_v59, %v3934_v46  ;;  %v6873_v51 = vld [vmem:[#allocation18_spill] sm:$0xff] }
 0x2e0   : > { %3931 = vst [vmem:[%s6019_s25 + $0xf8] sm:$0xff] %v3923_v17  ;;  %v3913_v23 = vadd.f32 %v6409_v56, %v3901_v28  ;;  %v3900_v42 = vmul.f32 %v6403_v1, %v3736_v57  ;;  %5011 = vrsqrt.f32 %v3612_v58  ;;  %v3211_v4 = vpop.xlane.xlu1 %3210  ;;  %v3550_v53 = vsub.f32 %v6872_v8, %v6426_v38 }
 0x2e1   : > { %3930 = vst [vmem:[%s6019_s25 + $0xf0] sm:$0xff] %v3922_v34  ;;  %v3299_v20 = vmul.f32 0.0078125, %v3211_v4  ;;  %v6488_v58 = vrot.slane %v5946_v11, %v3934_v46  ;;  %v3549_v34 = vsub.f32 %v6873_v51, %v6432_v32 }
 0x2e2   : > { %v3921_v5 = vmax.f32 %v3913_v23, 0.0  ;;  %v3912_v36 = vadd.f32 %v6409_v56, %v3900_v42  ;;  %v3209_v60 = vpop.xlane.xlu0 %3208  ;;  %v3361_v56 = vmul.f32 %v6467_v55, %v6467_v55  ;;  %v3360_v23 = vmul.f32 %v6475_v29, %v6475_v29 }
 0x2e3   : > { %v3298_v1 = vmul.f32 0.0078125, %v3209_v60  ;;  %v3427_v15 = vsub.f32 %v3299_v20, %v3363_v25 }
 0x2e4   : > { %3929 = vst [vmem:[%s6019_s25 + $0xe8] sm:$0xff] %v3921_v5  ;;  %v3920_v21 = vmax.f32 %v3912_v36, 0.0  ;;  %v3207_v6 = vpop.xlane.xlu1 %3206 }
 0x2e5   : > { %v3426_v45 = vsub.f32 %v3298_v1, %v3362_v54  ;;  %v3297_v48 = vmul.f32 0.0078125, %v3207_v6  ;;  %v3491_v41 = vmax.f32 %v3427_v15, 0.0 }
 0x2e6   : > { %v5006_v19 = vpop.eup %5005  ;;  %3928 = vst [vmem:[%s6019_s25 + $0xe0] sm:$0xff] %v3920_v21  ;;  %v3205_v39 = vpop.xlane.xlu0 %3204  ;;  %v6874_v21 = vld [vmem:[#allocation19_spill] sm:$0xff] }
 0x2e7   : > { %v3743_v52 = vmul.f32 %v5006_v19, %v3551_v40  ;;  %v3490_v17 = vmax.f32 %v3426_v45, 0.0  ;;  %v3425_v28 = vsub.f32 %v3297_v48, %v3361_v56  ;;  %v3296_v57 = vmul.f32 0.0078125, %v3205_v39 }
 0x2e8   : > { %v5008_v13 = vpop.eup %5007  ;;  %v3619_v42 = vadd.f32 1e-05, %v3491_v41  ;;  %v2962_v4 = vpop.xlane.xlu1 %2961  ;;  %v3548_v15 = vsub.f32 %v6874_v21, %v6438_v9  ;;  %v6875_v21 = vld [vmem:[#allocation20_spill] sm:$0xff] }
 0x2e9   : > { %v3939_v38 = vmul.f32 %v6482_v35, %v3743_v52  ;;  %v3742_v5 = vmul.f32 %v5008_v13, %v3550_v53  ;;  %v3618_v36 = vadd.f32 1e-05, %v3490_v17  ;;  %v3489_v25 = vmax.f32 %v3425_v28, 0.0 }
 0x2ea   : > { %v5010_v20 = vpop.eup %5009  ;;  %5013 = vrsqrt.f32 %v3619_v42  ;;  %v3424_v60 = vsub.f32 %v3296_v57, %v3360_v23  ;;  %v2960_v54 = vpop.xlane.xlu0 %2959  ;;  %v6501_v8 = vmul.f32 0.0078125, %v2962_v4 }
 0x2eb   : > { %v3951_v46 = vadd.f32 %v6488_v58, %v3939_v38  ;;  %v3938_v1 = vmul.f32 %v6482_v35, %v3742_v5  ;;  %v3741_v32 = vmul.f32 %v5010_v20, %v3549_v34  ;;  %5015 = vrsqrt.f32 %v3618_v36 }
 0x2ec   : > { %v3617_v6 = vadd.f32 1e-05, %v3489_v25  ;;  %v3488_v50 = vmax.f32 %v3424_v60, 0.0  ;;  %v2958_v40 = vpop.xlane.xlu1 %2957  ;;  %v6505_v17 = vmul.f32 0.0078125, %v2960_v54  ;;  %v3367_v51 = vmul.f32 %v6501_v8, %v6501_v8 }
 0x2ed   : > { %v5012_v56 = vpop.eup %5011  ;;  %v3959_v45 = vmax.f32 %v3951_v46, 0.0  ;;  %v3950_v48 = vadd.f32 %v6488_v58, %v3938_v1  ;;  %v3937_v19 = vmul.f32 %v6482_v35, %v3741_v32  ;;  %v6511_v34 = vmul.f32 0.0078125, %v2958_v40 }
 0x2ee   : > { %v3740_v53 = vmul.f32 %v5012_v56, %v3548_v15  ;;  %5017 = vrsqrt.f32 %v3617_v6  ;;  %v3616_v41 = vadd.f32 1e-05, %v3488_v50  ;;  %v2956_v39 = vpop.xlane.xlu0 %2955  ;;  %v3366_v38 = vmul.f32 %v6505_v17, %v6505_v17  ;;  %v6876_v6 = vld [vmem:[#allocation21_spill] sm:$0xff] }
 0x2ef   : > { %3967 = vst [vmem:[%s6019_s25 + $0x118] sm:$0xff] %v3959_v45  ;;  %v3958_v52 = vmax.f32 %v3950_v48, 0.0  ;;  %v3949_v9 = vadd.f32 %v6488_v58, %v3937_v19  ;;  %v6517_v20 = vmul.f32 0.0078125, %v2956_v39  ;;  %v3365_v54 = vmul.f32 %v6511_v34, %v6511_v34 }
 0x2f0   : > { %v3936_v28 = vmul.f32 %v6482_v35, %v3740_v53  ;;  %5019 = vrsqrt.f32 %v3616_v41  ;;  %v3219_v57 = vpop.xlane.xlu1 %3218  ;;  %v3555_v15 = vsub.f32 %v6875_v21, %v6457_v63  ;;  %v3554_v50 = vsub.f32 %v6876_v6, %v6460_v3  ;;  %v6877_v63 = vld [vmem:[#allocation22_spill] sm:$0xff] }
 0x2f1   : > { %3966 = vst [vmem:[%s6019_s25 + $0x110] sm:$0xff] %v3958_v52  ;;  %v3957_v13 = vmax.f32 %v3949_v9, 0.0  ;;  %v3303_v23 = vmul.f32 0.0078125, %v3219_v57  ;;  %v3364_v52 = vmul.f32 %v6517_v20, %v6517_v20 }
 0x2f2   : > { %v3948_v42 = vadd.f32 %v6488_v58, %v3936_v28  ;;  %v3217_v4 = vpop.xlane.xlu0 %3216 }
 0x2f3   : > { %3965 = vst [vmem:[%s6019_s25 + $0x108] sm:$0xff] %v3957_v13  ;;  %v3431_v5 = vsub.f32 %v3303_v23, %v3367_v51  ;;  %v3302_v36 = vmul.f32 0.0078125, %v3217_v4  ;;  %v3553_v51 = vsub.f32 %v6877_v63, %v6467_v55 }
 0x2f4   : > { %v3956_v25 = vmax.f32 %v3948_v42, 0.0  ;;  %v3215_v60 = vpop.xlane.xlu1 %3214 }
 0x2f5   : > { %v3495_v46 = vmax.f32 %v3431_v5, 0.0  ;;  %v3430_v1 = vsub.f32 %v3302_v36, %v3366_v38  ;;  %v3301_v32 = vmul.f32 0.0078125, %v3215_v60  ;;  %v6878_v36 = vld [vmem:[#allocation23_spill] sm:$0xff] }
 0x2f6   : > { %3964 = vst [vmem:[%s6019_s25 + $0x100] sm:$0xff] %v3956_v25  ;;  %v3213_v40 = vpop.xlane.xlu0 %3212  ;;  %v3552_v25 = vsub.f32 %v6878_v36, %v6475_v29 }
 0x2f7   : > { %v5014_v56 = vpop.eup %5013  ;;  %v3623_v45 = vadd.f32 1e-05, %v3495_v46  ;;  %v3494_v48 = vmax.f32 %v3430_v1, 0.0  ;;  %v3429_v19 = vsub.f32 %v3301_v32, %v3365_v54  ;;  %v3300_v53 = vmul.f32 0.0078125, %v3213_v40 }
 0x2f8   : > { %v5016_v41 = vpop.eup %5015  ;;  %v3747_v39 = vmul.f32 %v5014_v56, %v3555_v15  ;;  %v2970_v9 = vpop.xlane.xlu1 %2969 }
 0x2f9   : > { %v3746_v28 = vmul.f32 %v5016_v41, %v3554_v50  ;;  %5021 = vrsqrt.f32 %v3623_v45  ;;  %v3622_v57 = vadd.f32 1e-05, %v3494_v48  ;;  %v3493_v13 = vmax.f32 %v3429_v19, 0.0 }
 0x2fa   : > { %v3943_v3 = vmul.f32 %v6482_v35, %v3747_v39  ;;  %v3428_v23 = vsub.f32 %v3300_v53, %v3364_v52  ;;  %v2968_v42 = vpop.xlane.xlu0 %2967  ;;  %v6536_v21 = vmul.f32 0.0078125, %v2970_v9  ;;  %v3974_v41 = vsub.s32 5, %v5383_v49 }
 0x2fb   : > { %v5018_v4 = vpop.eup %5017  ;;  %v3942_v38 = vmul.f32 %v6482_v35, %v3746_v28  ;;  %5023 = vrsqrt.f32 %v3622_v57  ;;  %v3621_v5 = vadd.f32 1e-05, %v3493_v13  ;;  %v6539_v45 = vmul.f32 0.0078125, %v2968_v42 }
 0x2fc   : > { %v3955_v60 = vadd.f32 %v6488_v58, %v3943_v3  ;;  %v3745_v54 = vmul.f32 %v5018_v4, %v3553_v51  ;;  %v3492_v46 = vmax.f32 %v3428_v23, 0.0  ;;  %v2966_v1 = vpop.xlane.xlu1 %2965  ;;  %v3371_v28 = vmul.f32 %v6536_v21, %v6536_v21  ;;  %v6879_v4 = vld [vmem:[#allocation24_spill] sm:$0xff] }
 0x2fd   : > { %v5020_v32 = vpop.eup %5019  ;;  %v3954_v55 = vadd.f32 %v6488_v58, %v3942_v38  ;;  %5025 = vrsqrt.f32 %v3621_v5  ;;  %v6546_v39 = vmul.f32 0.0078125, %v2966_v1  ;;  %v3370_v63 = vmul.f32 %v6539_v45, %v6539_v45 }
 0x2fe   : > { %v3963_v15 = vmax.f32 %v3955_v60, 0.0  ;;  %v3941_v6 = vmul.f32 %v6482_v35, %v3745_v54  ;;  %v3744_v50 = vmul.f32 %v5020_v32, %v3552_v25  ;;  %v3620_v40 = vadd.f32 1e-05, %v3492_v46  ;;  %v2964_v56 = vpop.xlane.xlu0 %2963  ;;  %v6880_v54 = vld [vmem:[#allocation25_spill] sm:$0xff] }
 0x2ff   : > { %v3962_v29 = vmax.f32 %v3954_v55, 0.0  ;;  %v6554_v3 = vmul.f32 0.0078125, %v2964_v56  ;;  %v3559_v38 = vsub.f32 %v6879_v4, %v6501_v8  ;;  %v6561_v60 = vrot.slane %v5943_v59, %v3974_v41 }
 0x300   : > { %3971 = vst [vmem:[%s6019_s25 + $0x138] sm:$0xff] %v3963_v15  ;;  %v3953_v48 = vadd.f32 %v6488_v58, %v3941_v6  ;;  %v3940_v19 = vmul.f32 %v6482_v35, %v3744_v50  ;;  %5027 = vrsqrt.f32 %v3620_v40  ;;  %v3227_v53 = vpop.xlane.xlu1 %3226  ;;  %v3558_v46 = vsub.f32 %v6880_v54, %v6505_v17 }
 0x301   : > { %3970 = vst [vmem:[%s6019_s25 + $0x130] sm:$0xff] %v3962_v29  ;;  %v3307_v57 = vmul.f32 0.0078125, %v3227_v53  ;;  %v6567_v40 = vrot.slane %v5946_v11, %v3974_v41  ;;  %v3557_v56 = vsub.f32 %v5961_v61, %v6511_v34  ;;  %v3368_v29 = vmul.f32 %v6554_v3, %v6554_v3  ;;  %v6881_v34 = vld [vmem:[#allocation26_spill] sm:$0xff] }
 0x302   : > { %v3961_v52 = vmax.f32 %v3953_v48, 0.0  ;;  %v3952_v9 = vadd.f32 %v6488_v58, %v3940_v19  ;;  %v3225_v13 = vpop.xlane.xlu0 %3224  ;;  %v3369_v58 = vmul.f32 %v6546_v39, %v6546_v39 }
 0x303   : > { %v3306_v35 = vmul.f32 0.0078125, %v3225_v13  ;;  %v3435_v23 = vsub.f32 %v3307_v57, %v3371_v28 }
 0x304   : > { %3969 = vst [vmem:[%s6019_s25 + $0x128] sm:$0xff] %v3961_v52  ;;  %v3960_v51 = vmax.f32 %v3952_v9, 0.0  ;;  %v3223_v42 = vpop.xlane.xlu1 %3222 }
 0x305   : > { %v3434_v5 = vsub.f32 %v3306_v35, %v3370_v63  ;;  %v3305_v36 = vmul.f32 0.0078125, %v3223_v42  ;;  %v3499_v1 = vmax.f32 %v3435_v23, 0.0  ;;  %v3556_v35 = vsub.f32 %v6881_v34, %v6517_v20 }
 0x306   : > { %v5022_v25 = vpop.eup %5021  ;;  %3968 = vst [vmem:[%s6019_s25 + $0x120] sm:$0xff] %v3960_v51  ;;  %v3221_v32 = vpop.xlane.xlu0 %3220  ;;  %v3562_v34 = vsub.f32 %v6030_v22, %v6539_v45 }
 0x307   : > { %v3751_v55 = vmul.f32 %v5022_v25, %v3559_v38  ;;  %v3498_v15 = vmax.f32 %v3434_v5, 0.0  ;;  %v3433_v6 = vsub.f32 %v3305_v36, %v3369_v58  ;;  %v3304_v50 = vmul.f32 0.0078125, %v3221_v32 }
 0x308   : > { %v5024_v8 = vpop.eup %5023  ;;  %v3627_v48 = vadd.f32 1e-05, %v3499_v1  ;;  %v2978_v19 = vpop.xlane.xlu1 %2977 }
 0x309   : > { %v3979_v17 = vmul.f32 %v6561_v60, %v3751_v55  ;;  %v3750_v53 = vmul.f32 %v5024_v8, %v3558_v46  ;;  %v3626_v52 = vadd.f32 1e-05, %v3498_v15  ;;  %v3497_v9 = vmax.f32 %v3433_v6, 0.0 }
 0x30a   : > { %v5026_v28 = vpop.eup %5025  ;;  %5029 = vrsqrt.f32 %v3627_v48  ;;  %v3432_v57 = vsub.f32 %v3304_v50, %v3368_v29  ;;  %v2976_v13 = vpop.xlane.xlu0 %2975  ;;  %v6580_v36 = vmul.f32 0.0078125, %v2978_v19 }
 0x30b   : > { %v3991_v41 = vadd.f32 %v6567_v40, %v3979_v17  ;;  %v3978_v63 = vmul.f32 %v6561_v60, %v3750_v53  ;;  %v3749_v61 = vmul.f32 %v5026_v28, %v3557_v56  ;;  %5031 = vrsqrt.f32 %v3626_v52 }
 0x30c   : > { %v3625_v51 = vadd.f32 1e-05, %v3497_v9  ;;  %v3496_v23 = vmax.f32 %v3432_v57, 0.0  ;;  %v2974_v42 = vpop.xlane.xlu1 %2973  ;;  %v6584_v32 = vmul.f32 0.0078125, %v2976_v13  ;;  %v3375_v50 = vmul.f32 %v6580_v36, %v6580_v36 }
 0x30d   : > { %v5028_v4 = vpop.eup %5027  ;;  %v3999_v38 = vmax.f32 %v3991_v41, 0.0  ;;  %v3990_v58 = vadd.f32 %v6567_v40, %v3978_v63  ;;  %v3977_v5 = vmul.f32 %v6561_v60, %v3749_v61  ;;  %v6590_v8 = vmul.f32 0.0078125, %v2974_v42 }
 0x30e   : > { %v3748_v25 = vmul.f32 %v5028_v4, %v3556_v35  ;;  %5033 = vrsqrt.f32 %v3625_v51  ;;  %v3624_v54 = vadd.f32 1e-05, %v3496_v23  ;;  %v2972_v46 = vpop.xlane.xlu0 %2971  ;;  %v3374_v19 = vmul.f32 %v6584_v32, %v6584_v32 }
 0x30f   : > { %4007 = vst [vmem:[%s6019_s25 + $0x158] sm:$0xff] %v3999_v38  ;;  %v3998_v1 = vmax.f32 %v3990_v58, 0.0  ;;  %v3989_v20 = vadd.f32 %v6567_v40, %v3977_v5  ;;  %v6596_v9 = vmul.f32 0.0078125, %v2972_v46  ;;  %v3373_v57 = vmul.f32 %v6590_v8, %v6590_v8 }
 0x310   : > { %v3976_v55 = vmul.f32 %v6561_v60, %v3748_v25  ;;  %5035 = vrsqrt.f32 %v3624_v54  ;;  %v3235_v15 = vpop.xlane.xlu1 %3234  ;;  %v3563_v61 = vsub.f32 %v6014_v27, %v6536_v21  ;;  %v3561_v27 = vsub.f32 %v6039_v26, %v6546_v39 }
 0x311   : > { %4006 = vst [vmem:[%s6019_s25 + $0x150] sm:$0xff] %v3998_v1  ;;  %v3997_v6 = vmax.f32 %v3989_v20, 0.0  ;;  %v3311_v56 = vmul.f32 0.0078125, %v3235_v15  ;;  %v3372_v25 = vmul.f32 %v6596_v9, %v6596_v9 }
 0x312   : > { %v3988_v29 = vadd.f32 %v6567_v40, %v3976_v55  ;;  %v3233_v48 = vpop.xlane.xlu0 %3232 }
 0x313   : > { %4005 = vst [vmem:[%s6019_s25 + $0x148] sm:$0xff] %v3997_v6  ;;  %v3439_v17 = vsub.f32 %v3311_v56, %v3375_v50  ;;  %v3310_v53 = vmul.f32 0.0078125, %v3233_v48  ;;  %v3560_v50 = vsub.f32 %v6047_v30, %v6554_v3 }
 0x314   : > { %v3996_v52 = vmax.f32 %v3988_v29, 0.0  ;;  %v3231_v28 = vpop.xlane.xlu1 %3230 }
 0x315   : > { %v3503_v13 = vmax.f32 %v3439_v17, 0.0  ;;  %v3438_v41 = vsub.f32 %v3310_v53, %v3374_v19  ;;  %v3309_v63 = vmul.f32 0.0078125, %v3231_v28 }
 0x316   : > { %4004 = vst [vmem:[%s6019_s25 + $0x140] sm:$0xff] %v3996_v52  ;;  %v3229_v35 = vpop.xlane.xlu0 %3228 }
 0x317   : > { %v5030_v51 = vpop.eup %5029  ;;  %v3631_v23 = vadd.f32 1e-05, %v3503_v13  ;;  %v3502_v42 = vmax.f32 %v3438_v41, 0.0  ;;  %v3437_v4 = vsub.f32 %v3309_v63, %v3373_v57  ;;  %v3308_v38 = vmul.f32 0.0078125, %v3229_v35 }
 0x318   : > { %v5032_v58 = vpop.eup %5031  ;;  %v3755_v5 = vmul.f32 %v5030_v51, %v3563_v61  ;;  %v2986_v54 = vpop.xlane.xlu1 %2985 }
 0x319   : > { %v3754_v46 = vmul.f32 %v5032_v58, %v3562_v34  ;;  %5037 = vrsqrt.f32 %v3631_v23  ;;  %v3630_v1 = vadd.f32 1e-05, %v3502_v42  ;;  %v3501_v20 = vmax.f32 %v3437_v4, 0.0 }
 0x31a   : > { %v3983_v22 = vmul.f32 %v6561_v60, %v3755_v5  ;;  %v3436_v21 = vsub.f32 %v3308_v38, %v3372_v25  ;;  %v2984_v45 = vpop.xlane.xlu0 %2983  ;;  %v6615_v39 = vmul.f32 0.0078125, %v2986_v54  ;;  %v4014_v34 = vsub.s32 6, %v5383_v49 }
 0x31b   : > { %v5034_v55 = vpop.eup %5033  ;;  %v3982_v15 = vmul.f32 %v6561_v60, %v3754_v46  ;;  %5039 = vrsqrt.f32 %v3630_v1  ;;  %v3629_v6 = vadd.f32 1e-05, %v3501_v20  ;;  %v6618_v3 = vmul.f32 0.0078125, %v2984_v45 }
 0x31c   : > { %v3995_v56 = vadd.f32 %v6567_v40, %v3983_v22  ;;  %v3753_v29 = vmul.f32 %v5034_v55, %v3561_v27  ;;  %v3500_v48 = vmax.f32 %v3436_v21, 0.0  ;;  %v2982_v19 = vpop.xlane.xlu1 %2981  ;;  %v3379_v42 = vmul.f32 %v6615_v39, %v6615_v39 }
 0x31d   : > { %v5036_v17 = vpop.eup %5035  ;;  %v3994_v26 = vadd.f32 %v6567_v40, %v3982_v15  ;;  %5041 = vrsqrt.f32 %v3629_v6  ;;  %v6625_v35 = vmul.f32 0.0078125, %v2982_v19  ;;  %v3378_v58 = vmul.f32 %v6618_v3, %v6618_v3 }
 0x31e   : > { %v4003_v53 = vmax.f32 %v3995_v56, 0.0  ;;  %v3981_v52 = vmul.f32 %v6561_v60, %v3753_v29  ;;  %v3752_v28 = vmul.f32 %v5036_v17, %v3560_v50  ;;  %v3628_v57 = vadd.f32 1e-05, %v3500_v48  ;;  %v2980_v13 = vpop.xlane.xlu0 %2979 }
 0x31f   : > { %v4002_v30 = vmax.f32 %v3994_v26, 0.0  ;;  %v6633_v25 = vmul.f32 0.0078125, %v2980_v13  ;;  %v3567_v1 = vsub.f32 %v6077_v2, %v6580_v36  ;;  %v6640_v21 = vrot.slane %v5943_v59, %v4014_v34 }
 0x320   : > { %4011 = vst [vmem:[%s6019_s25 + $0x178] sm:$0xff] %v4003_v53  ;;  %v3993_v41 = vadd.f32 %v6567_v40, %v3981_v52  ;;  %v3980_v63 = vmul.f32 %v6561_v60, %v3752_v28  ;;  %5043 = vrsqrt.f32 %v3628_v57  ;;  %v3243_v61 = vpop.xlane.xlu1 %3242  ;;  %v3566_v45 = vsub.f32 %v6097_v47, %v6584_v32 }
 0x321   : > { %4010 = vst [vmem:[%s6019_s25 + $0x170] sm:$0xff] %v4002_v30  ;;  %v3315_v4 = vmul.f32 0.0078125, %v3243_v61  ;;  %v6646_v36 = vrot.slane %v5946_v11, %v4014_v34  ;;  %v3565_v48 = vsub.f32 %v6117_v12, %v6590_v8  ;;  %v3376_v19 = vmul.f32 %v6633_v25, %v6633_v25 }
 0x322   : > { %v4001_v51 = vmax.f32 %v3993_v41, 0.0  ;;  %v3992_v23 = vadd.f32 %v6567_v40, %v3980_v63  ;;  %v3241_v38 = vpop.xlane.xlu0 %3240  ;;  %v3377_v40 = vmul.f32 %v6625_v35, %v6625_v35  ;;  %v3564_v8 = vsub.f32 %v6114_v0, %v6596_v9 }
 0x323   : > { %v3314_v60 = vmul.f32 0.0078125, %v3241_v38  ;;  %v3443_v54 = vsub.f32 %v3315_v4, %v3379_v42 }
 0x324   : > { %4009 = vst [vmem:[%s6019_s25 + $0x168] sm:$0xff] %v4001_v51  ;;  %v4000_v5 = vmax.f32 %v3992_v23, 0.0  ;;  %v3239_v46 = vpop.xlane.xlu1 %3238 }
 0x325   : > { %v3442_v20 = vsub.f32 %v3314_v60, %v3378_v58  ;;  %v3313_v27 = vmul.f32 0.0078125, %v3239_v46  ;;  %v3507_v55 = vmax.f32 %v3443_v54, 0.0 }
 0x326   : > { %v5038_v22 = vpop.eup %5037  ;;  %4008 = vst [vmem:[%s6019_s25 + $0x160] sm:$0xff] %v4000_v5  ;;  %v3237_v15 = vpop.xlane.xlu0 %3236 }
 0x327   : > { %v3759_v6 = vmul.f32 %v5038_v22, %v3567_v1  ;;  %v3506_v50 = vmax.f32 %v3442_v20, 0.0  ;;  %v3441_v56 = vsub.f32 %v3313_v27, %v3377_v40  ;;  %v3312_v29 = vmul.f32 0.0078125, %v3237_v15 }
 0x328   : > { %v5040_v2 = vpop.eup %5039  ;;  %v3635_v17 = vadd.f32 1e-05, %v3507_v55  ;;  %v2994_v26 = vpop.xlane.xlu1 %2993 }
 0x329   : > { %v4019_v47 = vmul.f32 %v6640_v21, %v3759_v6  ;;  %v3758_v32 = vmul.f32 %v5040_v2, %v3566_v45  ;;  %v3634_v53 = vadd.f32 1e-05, %v3506_v50  ;;  %v3505_v52 = vmax.f32 %v3441_v56, 0.0 }
 0x32a   : > { %v5042_v28 = vpop.eup %5041  ;;  %5045 = vrsqrt.f32 %v3635_v17  ;;  %v3440_v57 = vsub.f32 %v3312_v29, %v3376_v19  ;;  %v2992_v13 = vpop.xlane.xlu0 %2991  ;;  %v6659_v38 = vmul.f32 0.0078125, %v2994_v26 }
 0x32b   : > { %v4031_v30 = vadd.f32 %v6646_v36, %v4019_v47  ;;  %v4018_v41 = vmul.f32 %v6640_v21, %v3758_v32  ;;  %v3757_v12 = vmul.f32 %v5042_v28, %v3565_v48  ;;  %5047 = vrsqrt.f32 %v3634_v53 }
 0x32c   : > { %v3633_v63 = vadd.f32 1e-05, %v3505_v52  ;;  %v3504_v61 = vmax.f32 %v3440_v57, 0.0  ;;  %v2990_v34 = vpop.xlane.xlu1 %2989  ;;  %v6663_v9 = vmul.f32 0.0078125, %v2992_v13  ;;  %v3383_v20 = vmul.f32 %v6659_v38, %v6659_v38 }
 0x32d   : > { %v5044_v51 = vpop.eup %5043  ;;  %v4039_v23 = vmax.f32 %v4031_v30, 0.0  ;;  %v4030_v42 = vadd.f32 %v6646_v36, %v4018_v41  ;;  %v4017_v4 = vmul.f32 %v6640_v21, %v3757_v12  ;;  %v6669_v27 = vmul.f32 0.0078125, %v2990_v34 }
 0x32e   : > { %v3756_v58 = vmul.f32 %v5044_v51, %v3564_v8  ;;  %5049 = vrsqrt.f32 %v3633_v63  ;;  %v3632_v60 = vadd.f32 1e-05, %v3504_v61  ;;  %v2988_v5 = vpop.xlane.xlu0 %2987  ;;  %v3382_v15 = vmul.f32 %v6663_v9, %v6663_v9 }
 0x32f   : > { %4047 = vst [vmem:[%s6019_s25 + $0x198] sm:$0xff] %v4039_v23  ;;  %v4038_v54 = vmax.f32 %v4030_v42, 0.0  ;;  %v4029_v0 = vadd.f32 %v6646_v36, %v4017_v4  ;;  %v6675_v29 = vmul.f32 0.0078125, %v2988_v5  ;;  %v3381_v48 = vmul.f32 %v6669_v27, %v6669_v27 }
 0x330   : > { %v4016_v46 = vmul.f32 %v6640_v21, %v3756_v58  ;;  %5051 = vrsqrt.f32 %v3632_v60  ;;  %v3251_v1 = vpop.xlane.xlu1 %3250  ;;  %v3571_v47 = vsub.f32 %v6160_v24, %v6615_v39  ;;  %v3570_v32 = vsub.f32 %v6177_v33, %v6618_v3 }
 0x331   : > { %4046 = vst [vmem:[%s6019_s25 + $0x190] sm:$0xff] %v4038_v54  ;;  %v4037_v40 = vmax.f32 %v4029_v0, 0.0  ;;  %v3319_v22 = vmul.f32 0.0078125, %v3251_v1  ;;  %v3380_v8 = vmul.f32 %v6675_v29, %v6675_v29  ;;  %v3569_v24 = vsub.f32 %v6187_v37, %v6625_v35 }
 0x332   : > { %v4028_v45 = vadd.f32 %v6646_v36, %v4016_v46  ;;  %v3249_v55 = vpop.xlane.xlu0 %3248  ;;  %v3568_v58 = vsub.f32 %v6197_v44, %v6633_v25 }
 0x333   : > { %4045 = vst [vmem:[%s6019_s25 + $0x188] sm:$0xff] %v4037_v40  ;;  %v3447_v6 = vsub.f32 %v3319_v22, %v3383_v20  ;;  %v3318_v50 = vmul.f32 0.0078125, %v3249_v55 }
 0x334   : > { %v4036_v56 = vmax.f32 %v4028_v45, 0.0  ;;  %v3247_v2 = vpop.xlane.xlu1 %3246 }
 0x335   : > { %v3511_v19 = vmax.f32 %v3447_v6, 0.0  ;;  %v3446_v17 = vsub.f32 %v3318_v50, %v3382_v15  ;;  %v3317_v26 = vmul.f32 0.0078125, %v3247_v2  ;;  %v4054_v50 = vsub.s32 7, %v5383_v49 }
 0x336   : > { %4044 = vst [vmem:[%s6019_s25 + $0x180] sm:$0xff] %v4036_v56  ;;  %v3245_v53 = vpop.xlane.xlu0 %3244 }
 0x337   : > { %v5046_v52 = vpop.eup %5045  ;;  %v3639_v28 = vadd.f32 1e-05, %v3511_v19  ;;  %v3510_v57 = vmax.f32 %v3446_v17, 0.0  ;;  %v3445_v13 = vsub.f32 %v3317_v26, %v3381_v48  ;;  %v3316_v30 = vmul.f32 0.0078125, %v3245_v53 }
 0x338   : > { %v5048_v41 = vpop.eup %5047  ;;  %v3763_v12 = vmul.f32 %v5046_v52, %v3571_v47  ;;  %v3002_v63 = vpop.xlane.xlu1 %3001 }
 0x339   : > { %v3762_v61 = vmul.f32 %v5048_v41, %v3570_v32  ;;  %5053 = vrsqrt.f32 %v3639_v28  ;;  %v3638_v34 = vadd.f32 1e-05, %v3510_v57  ;;  %v3509_v51 = vmax.f32 %v3445_v13, 0.0 }
 0x33a   : > { %v4023_v33 = vmul.f32 %v6640_v21, %v3763_v12  ;;  %v3444_v39 = vsub.f32 %v3316_v30, %v3380_v8  ;;  %v3000_v3 = vpop.xlane.xlu0 %2999  ;;  %v6704_v56 = vmul.f32 0.0078125, %v3002_v63  ;;  %v3575_v28 = vsub.f32 %v6232_v7, %v6659_v38 }
 0x33b   : > { %v5050_v23 = vpop.eup %5049  ;;  %v4022_v42 = vmul.f32 %v6640_v21, %v3762_v61  ;;  %5055 = vrsqrt.f32 %v3638_v34  ;;  %v3637_v4 = vadd.f32 1e-05, %v3509_v51  ;;  %v6712_v53 = vmul.f32 0.0078125, %v3000_v3 }
 0x33c   : > { %v4035_v60 = vadd.f32 %v6646_v36, %v4023_v33  ;;  %v3761_v5 = vmul.f32 %v5050_v23, %v3569_v24  ;;  %v3508_v54 = vmax.f32 %v3444_v39, 0.0  ;;  %v2998_v0 = vpop.xlane.xlu1 %2997  ;;  %v6719_v41 = vrot.slane %v5943_v59, %v4054_v50 }
 0x33d   : > { %v5052_v46 = vpop.eup %5051  ;;  %v4034_v37 = vadd.f32 %v6646_v36, %v4022_v42  ;;  %5057 = vrsqrt.f32 %v3637_v4  ;;  %v6695_v55 = vmul.f32 0.0078125, %v2998_v0  ;;  %v3574_v12 = vsub.f32 %v6247_v43, %v6663_v9 }
 0x33e   : > { %v4043_v35 = vmax.f32 %v4035_v60, 0.0  ;;  %v4021_v1 = vmul.f32 %v6640_v21, %v3761_v5  ;;  %v3760_v40 = vmul.f32 %v5052_v46, %v3568_v58  ;;  %v3636_v20 = vadd.f32 1e-05, %v3508_v54  ;;  %v2996_v22 = vpop.xlane.xlu0 %2995 }
 0x33f   : > { %v4042_v45 = vmax.f32 %v4034_v37, 0.0  ;;  %v6697_v44 = vmul.f32 0.0078125, %v2996_v22  ;;  %v3385_v19 = vmul.f32 %v6695_v55, %v6695_v55  ;;  %v4067_v38 = vrot.slane %v5946_v11, %v4054_v50 }
 0x340   : > { %4051 = vst [vmem:[%s6019_s25 + $0x1b8] sm:$0xff] %v4043_v35  ;;  %v4033_v25 = vadd.f32 %v6646_v36, %v4021_v1  ;;  %v4020_v15 = vmul.f32 %v6640_v21, %v3760_v40  ;;  %5059 = vrsqrt.f32 %v3636_v20  ;;  %v3255_v6 = vpop.xlane.xlu1 %3254  ;;  %v3573_v33 = vsub.f32 %v6268_v31, %v6669_v27 }
 0x341   : > { %4050 = vst [vmem:[%s6019_s25 + $0x1b0] sm:$0xff] %v4042_v45  ;;  %v3321_v17 = vmul.f32 0.0078125, %v3255_v6  ;;  %v3384_v47 = vmul.f32 %v6697_v44, %v6697_v44  ;;  %v3386_v59 = vmul.f32 %v6712_v53, %v6712_v53  ;;  %v3572_v31 = vsub.f32 %v6265_v14, %v6675_v29 }
 0x342   : > { %v4041_v2 = vmax.f32 %v4033_v25, 0.0  ;;  %v4032_v48 = vadd.f32 %v6646_v36, %v4020_v15  ;;  %v3253_v26 = vpop.xlane.xlu0 %3252  ;;  %v3387_v36 = vmul.f32 %v6704_v56, %v6704_v56  ;;  %v3577_v25 = vsub.f32 %v6333_v18, %v6695_v55 }
 0x343   : > { %v3320_v21 = vmul.f32 0.0078125, %v3253_v26  ;;  %v3449_v49 = vsub.f32 %v3321_v17, %v3385_v19  ;;  %v3576_v6 = vsub.f32 %v6343_v10, %v6697_v44  ;;  %v3579_v19 = vsub.f32 %v6312_v62, %v6704_v56 }
 0x344   : > { %4049 = vst [vmem:[%s6019_s25 + $0x1a8] sm:$0xff] %v4041_v2  ;;  %v4040_v32 = vmax.f32 %v4032_v48, 0.0  ;;  %v3259_v52 = vpop.xlane.xlu1 %3258  ;;  %v3578_v18 = vsub.f32 %v6325_v16, %v6712_v53 }
 0x345   : > { %v3448_v57 = vsub.f32 %v3320_v21, %v3384_v47  ;;  %v3323_v13 = vmul.f32 0.0078125, %v3259_v52  ;;  %v3513_v8 = vmax.f32 %v3449_v49, 0.0 }
 0x346   : > { %v5054_v30 = vpop.eup %5053  ;;  %4048 = vst [vmem:[%s6019_s25 + $0x1a0] sm:$0xff] %v4040_v32  ;;  %v3257_v63 = vpop.xlane.xlu0 %3256 }
 0x347   : > { %v3767_v61 = vmul.f32 %v5054_v30, %v3575_v28  ;;  %v3512_v34 = vmax.f32 %v3448_v57, 0.0  ;;  %v3451_v51 = vsub.f32 %v3323_v13, %v3387_v36  ;;  %v3322_v24 = vmul.f32 0.0078125, %v3257_v63 }
 0x348   : > { %v5056_v7 = vpop.eup %5055  ;;  %v3641_v39 = vadd.f32 1e-05, %v3513_v8 }
 0x349   : > { %v4059_v3 = vmul.f32 %v6719_v41, %v3767_v61  ;;  %v3766_v23 = vmul.f32 %v5056_v7, %v3574_v12  ;;  %v3640_v43 = vadd.f32 1e-05, %v3512_v34  ;;  %v3515_v9 = vmax.f32 %v3451_v51, 0.0 }
 0x34a   : > { %v5058_v42 = vpop.eup %5057  ;;  %5061 = vrsqrt.f32 %v3641_v39  ;;  %v3450_v4 = vsub.f32 %v3322_v24, %v3386_v59 }
 0x34b   : > { %v4071_v58 = vadd.f32 %v4067_v38, %v4059_v3  ;;  %v4058_v60 = vmul.f32 %v6719_v41, %v3766_v23  ;;  %v3765_v11 = vmul.f32 %v5058_v42, %v3573_v33  ;;  %5063 = vrsqrt.f32 %v3640_v43 }
 0x34c   : > { %v3643_v27 = vadd.f32 1e-05, %v3515_v9  ;;  %v3514_v5 = vmax.f32 %v3450_v4, 0.0 }
 0x34d   : > { %v5060_v54 = vpop.eup %5059  ;;  %v4079_v0 = vmax.f32 %v4071_v58, 0.0  ;;  %v4070_v46 = vadd.f32 %v4067_v38, %v4058_v60  ;;  %v4057_v37 = vmul.f32 %v6719_v41, %v3765_v11 }
 0x34e   : > { %v3764_v35 = vmul.f32 %v5060_v54, %v3572_v31  ;;  %5065 = vrsqrt.f32 %v3643_v27  ;;  %v3642_v1 = vadd.f32 1e-05, %v3514_v5 }
 0x34f   : > { %4087 = vst [vmem:[%s6019_s25 + $0x1d8] sm:$0xff] %v4079_v0  ;;  %v4078_v40 = vmax.f32 %v4070_v46, 0.0  ;;  %v4069_v20 = vadd.f32 %v4067_v38, %v4057_v37 }
 0x350   : > { %v4056_v22 = vmul.f32 %v6719_v41, %v3764_v35  ;;  %5067 = vrsqrt.f32 %v3642_v1 }
 0x351   : > { %4086 = vst [vmem:[%s6019_s25 + $0x1d0] sm:$0xff] %v4078_v40  ;;  %v4077_v14 = vmax.f32 %v4069_v20, 0.0 }
 0x352   : > { %v4068_v29 = vadd.f32 %v4067_v38, %v4056_v22 }
 0x353   : > { %4085 = vst [vmem:[%s6019_s25 + $0x1c8] sm:$0xff] %v4077_v14 }
 0x354   : > { %v4076_v45 = vmax.f32 %v4068_v29, 0.0 }
 0x356   : > { %4084 = vst [vmem:[%s6019_s25 + $0x1c0] sm:$0xff] %v4076_v45 }
 0x357   : > { %v5062_v15 = vpop.eup %5061 }
 0x358   : > { %v5064_v50 = vpop.eup %5063  ;;  %v3769_v2 = vmul.f32 %v5062_v15, %v3577_v25 }
 0x359   : > { %v3768_v48 = vmul.f32 %v5064_v50, %v3576_v6 }
 0x35a   : > { %v4061_v17 = vmul.f32 %v6719_v41, %v3769_v2 }
 0x35b   : > { %v5066_v26 = vpop.eup %5065  ;;  %v4060_v47 = vmul.f32 %v6719_v41, %v3768_v48 }
 0x35c   : > { %v4073_v55 = vadd.f32 %v4067_v38, %v4061_v17  ;;  %v3771_v10 = vmul.f32 %v5066_v26, %v3579_v19 }
 0x35d   : > { %v5068_v44 = vpop.eup %5067  ;;  %v4072_v21 = vadd.f32 %v4067_v38, %v4060_v47 }
 0x35e   : > { %v4081_v32 = vmax.f32 %v4073_v55, 0.0  ;;  %v4063_v62 = vmul.f32 %v6719_v41, %v3771_v10  ;;  %v3770_v56 = vmul.f32 %v5068_v44, %v3578_v18 }
 0x35f   : > { %v4080_v49 = vmax.f32 %v4072_v21, 0.0 }
 0x360   : > { %4089 = vst [vmem:[%s6019_s25 + $0x1e8] sm:$0xff] %v4081_v32  ;;  %v4075_v52 = vadd.f32 %v4067_v38, %v4063_v62  ;;  %v4062_v28 = vmul.f32 %v6719_v41, %v3770_v56 }
 0x361   : > { %4088 = vst [vmem:[%s6019_s25 + $0x1e0] sm:$0xff] %v4080_v49 }
 0x362   : > { %v4083_v16 = vmax.f32 %v4075_v52, 0.0  ;;  %v4074_v53 = vadd.f32 %v4067_v38, %v4062_v28 }
 0x364   : > { %4091 = vst [vmem:[%s6019_s25 + $0x1f8] sm:$0xff] %v4083_v16  ;;  %v4082_v36 = vmax.f32 %v4074_v53, 0.0 }
 0x366   : > { %4090 = vst [vmem:[%s6019_s25 + $0x1f0] sm:$0xff] %v4082_v36 }
 0x367   : > { %5083 = shalt.err (!%p5080_p7)
}
 0x368   : > { %s5084_s12 = scalar_lea.hbm %s6758_s11, 8192  ;;  %s5088_s28 = scalar_lea.hbm %s6816_s10, 16384 }
 0x369   : > { %p5085_p8 = scmp.ne.s32.totalorder %s6758_s11, %s5084_s12  ;;  %p5089_p11 = scmp.lt.s32.totalorder %s6758_s11, %s6816_s10 }
 0x36a   : > { %p5090_p12 = scmp.lt.s32.totalorder %s5088_s28, %s5084_s12 }
 0x36b   : > { %p5086_p9 = pnand %p5085_p8, %p5230_p5 }
 0x36c   : > { %p5091_p13 = por %p5090_p12, %p5089_p11 }
 0x36d   : > { %p5087_p10 = pneg %p5086_p9 }
 0x36f   : > { %p5092_p0 = pnand %p5091_p13, %p5087_p10 }
 0x371   : > { %5095 = shalt.err (!%p5092_p0)
}
 0x372   : > { %s5135_s17 = smov 128   ;;  %s5136_s18 = smov 8  }
 0x373   : > { %4850 = dma.vmem_to_hbm [thread:$0]  (%p5230_p5), %s6760_s27, 8192, %s6758_s11, %s6766_s30, %s5135_s17, %s5135_s17, %s5136_s18  }
 0x374 PF: > { %p4856_p1 = scmp.ge.s32.totalorder %s5130_s16, 2  ;;  %s4121_s20 = sand.u32 1, %s5118_s13  }
 0x375   : > { %s4122_s12 = scalar_lea.sflag [#allocation4], %s4121_s20 }
 0x376   : > { %p4853_p2 = pnand %p4856_p1, %p5234_p6 }
 0x378   : > { %p4854_p3 = pneg %p4853_p2 }
 0x37a   : > { %5113 = dma.done.wait (%p4854_p3), %s4122_s12, 8192  }
 0x37b   : > { %5115 = vsyncadd (%p4854_p3), %s4122_s12, 4294959104  ;;  %p20_p4 = scmp.ge.s32.totalorder %s5217_s19, 4   ;;  %s6882_s13 = smov %s5122_s14 }
 0x37c   : > { %s6883_s14 = smov %s5126_s15  ;;  %s6884_s15 = smov %s5228_s22 }
 0x37d   : > { %s6885_s16 = smov %s5217_s19  ;;  %22 = sbr.rel (!%p20_p4) target bundleno = 3 (0x3), region = 101 }
 0x382   :  { %4127 = vsyncpa [#allocation4], 1 }
 0x383   :  { %4129 = vsyncpa [#allocation4 + $0x1], 1 }

</bundles_post_ra>
